<compile_context>
chip_gen: v7x
topology: tpu7x:2x2x1
jax: 0.10.0
libtpu: 0.0.40
codegen_flags: <defaults>
</compile_context>

<pallas_src>
import numpy as np
import jax
import jax.numpy as jnp
from jax.experimental import pallas as pl
from jax.experimental.pallas import tpu as pltpu

COL0 = 8  # interior start column inside the padded scratches (sublane-aligned)


def _zero_halo(ref, H, W):
    """Clear only the 1-wide halo that the 3x3 taps actually read (no full zero-fill)."""
    Hp, Wp, C = ref.shape
    dt = ref.dtype
    ref[0:1, :, :] = jnp.zeros((1, Wp, C), dt)                        # top halo row
    ref[H + 1:H + 2, :, :] = jnp.zeros((1, Wp, C), dt)                # bottom halo row
    ref[:, COL0 - 1:COL0, :] = jnp.zeros((Hp, 1, C), dt)              # left halo column
    ref[:, COL0 + W:COL0 + W + 1, :] = jnp.zeros((Hp, 1, C), dt)      # right halo column


def _conv3x3(src_ref, w_ref, H, W):
    """3x3 same-conv of a zero-padded VMEM scratch with kh-packed weights.

    src_ref: (H+2, Wp, Cin) scratch; data at rows [0, H+2) x cols [COL0-1, COL0+W+1)
    w_ref  : (3, 3*Cin, Cout) with w_ref[kw, kh*Cin + ci, co] = weight[kh, kw, ci, co]
    returns: (H, W, Cout) float32 accumulator
    """
    acc = None
    for kw in range(3):                                   # 3 fat dots: K = 3*Cin each
        c0 = COL0 - 1 + kw
        sl = src_ref[:, c0:c0 + W, :]                     # (H+2, W, Cin)
        # TODO(synk): the kw=0/2 slices are sublane-misaligned; a pltpu.roll-based
        #             shift would move that work to the XLU.
        patch = jnp.concatenate(                           # stack the 3 kh taps along K
            [sl[0:H], sl[1:H + 1], sl[2:H + 2]], axis=-1)  # (H, W, 3*Cin)
        t = jnp.einsum('hwi,io->hwo', patch.astype(jnp.bfloat16), w_ref[kw],
                       preferred_element_type=jnp.float32)
        acc = t if acc is None else acc + t
    return acc


def basic_block_kernel(x_ref, w1_ref, s1_ref, b1_ref, w2_ref, s2_ref, b2_ref,
                       out_ref, xpad_ref, mid_ref):
    """Fused conv3x3 -> BN -> ReLU -> conv3x3 -> BN -> +identity -> ReLU (one batch element)."""
    _, H, W, Cin = x_ref.shape
    C = out_ref.shape[-1]

    x = x_ref[0]                                           # (H, W, Cin) f32 — also identity

    # ---- conv1: pad x into a VMEM scratch (halo-only zeroing, aligned interior write) ----
    _zero_halo(xpad_ref, H, W)
    xpad_ref[1:H + 1, COL0:COL0 + W, :] = x

    acc1 = _conv3x3(xpad_ref, w1_ref, H, W)                # (H, W, C) f32
    s1 = s1_ref[...].reshape(1, 1, C)
    b1 = b1_ref[...].reshape(1, 1, C)
    out1 = jnp.maximum(acc1 * s1 + b1, 0.0)                # BN1 + ReLU (f32)

    # ---- conv2 on the padded intermediate ----
    _zero_halo(mid_ref, H, W)
    mid_ref[1:H + 1, COL0:COL0 + W, :] = out1

    acc2 = _conv3x3(mid_ref, w2_ref, H, W)
    s2 = s2_ref[...].reshape(1, 1, C)
    b2 = b2_ref[...].reshape(1, 1, C)
    out_ref[0] = jnp.maximum(acc2 * s2 + b2 + x, 0.0)      # BN2 + residual + final ReLU


def basic_block_pallas(x_nhwc, w1_hwio, bn1, w2_hwio, bn2, eps=1e-5):
    """x_nhwc: (N,H,W,Cin) f32; w*_hwio: (3,3,Cin,C); bn* = (gamma, beta, running_mean, running_var)."""
    N, H, W, Cin = x_nhwc.shape
    C = w1_hwio.shape[-1]
    assert Cin == C, "stride=1 / downsample=None BasicBlock requires inplanes == planes"
    # TODO(synk): stride>1 / downsample branch and training-mode BatchNorm
    #             (batch statistics + running-stat updates) are not implemented.

    def fold_bn(bn):
        gamma, beta, mean, var = bn
        scale = gamma / jnp.sqrt(var + eps)
        bias = beta - mean * scale
        return (scale.reshape(1, C).astype(jnp.float32),
                bias.reshape(1, C).astype(jnp.float32))

    s1, b1 = fold_bn(bn1)
    s2, b2 = fold_bn(bn2)

    def pack_w(w):  # (3,3,Ci,Co) HWIO -> (kw, kh*Ci + ci, co), bf16 for the MXU
        ci, co = w.shape[2], w.shape[3]
        return jnp.transpose(w, (1, 0, 2, 3)).reshape(3, 3 * ci, co).astype(jnp.bfloat16)

    w1_p, w2_p = pack_w(w1_hwio), pack_w(w2_hwio)

    Wp = ((COL0 + W + 1) + 7) // 8 * 8                     # padded scratch width (÷8)

    return pl.pallas_call(
        basic_block_kernel,
        out_shape=jax.ShapeDtypeStruct((N, H, W, C), jnp.float32),
        grid=(N,),
        in_specs=[
            pl.BlockSpec((1, H, W, Cin), lambda n: (n, 0, 0, 0)),   # x (conv1 input + identity)
            pl.BlockSpec((3, 3 * Cin, C), lambda n: (0, 0, 0)),     # packed conv1 weights (bf16)
            pl.BlockSpec((1, C), lambda n: (0, 0)),                 # bn1 scale
            pl.BlockSpec((1, C), lambda n: (0, 0)),                 # bn1 bias
            pl.BlockSpec((3, 3 * C, C), lambda n: (0, 0, 0)),       # packed conv2 weights (bf16)
            pl.BlockSpec((1, C), lambda n: (0, 0)),                 # bn2 scale
            pl.BlockSpec((1, C), lambda n: (0, 0)),                 # bn2 bias
        ],
        out_specs=pl.BlockSpec((1, H, W, C), lambda n: (n, 0, 0, 0)),
        scratch_shapes=[pltpu.VMEM((H + 2, Wp, Cin), jnp.float32),  # padded conv1 input
                        pltpu.VMEM((H + 2, Wp, C), jnp.float32)],   # padded conv2 input
        compiler_params=pltpu.CompilerParams(
            dimension_semantics=("parallel",),     # batch axis sharded across v7x's 2 TCs
            vmem_limit_bytes=32 * 1024 * 1024),
    )(x_nhwc, w1_p, s1, b1, w2_p, s2, b2)


def basic_block_reference(x_nhwc, w1, bn1, w2, bn2, eps=1e-5):
    """Plain-JAX reference with the same bf16-on-MXU / f32-accumulate dataflow."""
    dn = ('NHWC', 'HWIO', 'NHWC')

    def conv(x, w):
        return jax.lax.conv_general_dilated(
            x.astype(jnp.bfloat16), w.astype(jnp.bfloat16), (1, 1), ((1, 1), (1, 1)),
            dimension_numbers=dn, preferred_element_type=jnp.float32)

    def bn(y, p):
        gamma, beta, mean, var = p
        s = gamma / jnp.sqrt(var + eps)
        return y * s + (beta - mean * s)

    out = jnp.maximum(bn(conv(x_nhwc, w1), bn1), 0.0)
    out = bn(conv(out, w2), bn2) + x_nhwc
    return jnp.maximum(out, 0.0)


if __name__ == "__main__":
    # BasicBlock(128, 128), stride=1, downsample=None — batch=2, spatial 16x16.
    N, C, H, W = 2, 128, 16, 16

    key = jax.random.PRNGKey(0)
    keys = jax.random.split(key, 10)

    # PyTorch-convention NCHW input, transposed to channels-last for the TPU kernel.
    x_nchw = jax.random.normal(keys[0], (N, C, H, W), dtype=jnp.float32)
    x_nhwc = jnp.transpose(x_nchw, (0, 2, 3, 1))

    # Conv weights: PyTorch OIHW -> HWIO.
    w1_oihw = jax.random.normal(keys[1], (C, C, 3, 3), dtype=jnp.float32) * 0.05
    w2_oihw = jax.random.normal(keys[2], (C, C, 3, 3), dtype=jnp.float32) * 0.05
    w1 = jnp.transpose(w1_oihw, (2, 3, 1, 0))   # (3,3,Cin,Cout)
    w2 = jnp.transpose(w2_oihw, (2, 3, 1, 0))

    # Inference-mode BatchNorm parameters (gamma, beta, running_mean, running_var).
    bn1 = (jax.random.uniform(keys[3], (C,), minval=0.5, maxval=1.5),
           jax.random.normal(keys[4], (C,)) * 0.1,
           jax.random.normal(keys[5], (C,)) * 0.1,
           jax.random.uniform(keys[6], (C,), minval=0.5, maxval=1.5))
    bn2 = (jax.random.uniform(keys[7], (C,), minval=0.5, maxval=1.5),
           jax.random.normal(keys[8], (C,)) * 0.1,
           jax.random.normal(keys[9], (C,)) * 0.1,
           jax.random.uniform(keys[6], (C,), minval=0.5, maxval=1.5))

    out_nhwc = jax.block_until_ready(basic_block_pallas(x_nhwc, w1, bn1, w2, bn2))
    out_nchw = jnp.transpose(out_nhwc, (0, 3, 1, 2))       # back to PyTorch NCHW

    ref_nhwc = basic_block_reference(x_nhwc, w1, bn1, w2, bn2)
    np.testing.assert_allclose(np.asarray(out_nhwc), np.asarray(ref_nhwc),
                               rtol=2e-2, atol=2e-2)
    assert out_nchw.shape == (N, C, H, W)

    print("KERNEL_OK")
</pallas_src>

<mosaic_0001>
module attributes {stable_mosaic.version = 11 : i64} {
  func.func @basic_block_kernel(%arg0: i32, %arg1: memref<1x16x16x128xf32, #tpu.memory_space<vmem>>, %arg2: memref<3x384x128xbf16, #tpu.memory_space<vmem>>, %arg3: memref<1x128xf32, #tpu.memory_space<vmem>>, %arg4: memref<1x128xf32, #tpu.memory_space<vmem>>, %arg5: memref<3x384x128xbf16, #tpu.memory_space<vmem>>, %arg6: memref<1x128xf32, #tpu.memory_space<vmem>>, %arg7: memref<1x128xf32, #tpu.memory_space<vmem>>, %arg8: memref<1x16x16x128xf32, #tpu.memory_space<vmem>>, %arg9: memref<18x32x128xf32, #tpu.memory_space<vmem>>, %arg10: memref<18x32x128xf32, #tpu.memory_space<vmem>>) attributes {dimension_semantics = [#tpu.dimension_semantics<parallel>], iteration_bounds = array<i64: 2>, scalar_prefetch = 0 : i64, scratch_operands = 2 : i64, tpu.core_type = #tpu.core_type<tc>, window_params = [{transform_indices = @transform_0, window_bounds = array<i64: 1, 16, 16, 128>}, {pipeline_mode = #tpu.pipeline_mode<synchronous>, transform_indices = @transform_1, window_bounds = array<i64: 3, 384, 128>}, {pipeline_mode = #tpu.pipeline_mode<synchronous>, transform_indices = @transform_2, window_bounds = array<i64: 1, 128>}, {pipeline_mode = #tpu.pipeline_mode<synchronous>, transform_indices = @transform_3, window_bounds = array<i64: 1, 128>}, {pipeline_mode = #tpu.pipeline_mode<synchronous>, transform_indices = @transform_4, window_bounds = array<i64: 3, 384, 128>}, {pipeline_mode = #tpu.pipeline_mode<synchronous>, transform_indices = @transform_5, window_bounds = array<i64: 1, 128>}, {pipeline_mode = #tpu.pipeline_mode<synchronous>, transform_indices = @transform_6, window_bounds = array<i64: 1, 128>}, {transform_indices = @transform_7, window_bounds = array<i64: 1, 16, 16, 128>}]} {
    %c0 = arith.constant 0 : index
    %c0_0 = arith.constant 0 : index
    %c0_1 = arith.constant 0 : index
    %c0_2 = arith.constant 0 : index
    %0 = vector.load %arg1[%c0, %c0_0, %c0_1, %c0_2] : memref<1x16x16x128xf32, #tpu.memory_space<vmem>>, vector<1x16x16x128xf32>
    %1 = vector.shape_cast %0 : vector<1x16x16x128xf32> to vector<16x16x128xf32>
    %cst = arith.constant 0.000000e+00 : f32
    %2 = vector.broadcast %cst : f32 to vector<1x32x128xf32>
    %c0_3 = arith.constant 0 : index
    %c0_4 = arith.constant 0 : index
    %c0_5 = arith.constant 0 : index
    %3 = vector.load %arg9[%c0_3, %c0_4, %c0_5] : memref<18x32x128xf32, #tpu.memory_space<vmem>>, vector<1x32x128xf32>
    tpu.vector_store %arg9[%c0_3, %c0_4, %c0_5], %2 {strides = array<i32>} : memref<18x32x128xf32, #tpu.memory_space<vmem>>, vector<1x32x128xf32>,
    %cst_6 = arith.constant 0.000000e+00 : f32
    %4 = vector.broadcast %cst_6 : f32 to vector<1x32x128xf32>
    %c17 = arith.constant 17 : index
    %c0_7 = arith.constant 0 : index
    %c0_8 = arith.constant 0 : index
    %5 = vector.load %arg9[%c17, %c0_7, %c0_8] : memref<18x32x128xf32, #tpu.memory_space<vmem>>, vector<1x32x128xf32>
    tpu.vector_store %arg9[%c17, %c0_7, %c0_8], %4 {strides = array<i32>} : memref<18x32x128xf32, #tpu.memory_space<vmem>>, vector<1x32x128xf32>,
    %cst_9 = arith.constant 0.000000e+00 : f32
    %6 = vector.broadcast %cst_9 : f32 to vector<18x1x128xf32>
    %c0_10 = arith.constant 0 : index
    %c7 = arith.constant 7 : index
    %c0_11 = arith.constant 0 : index
    %7 = vector.load %arg9[%c0_10, %c7, %c0_11] : memref<18x32x128xf32, #tpu.memory_space<vmem>>, vector<18x1x128xf32>
    tpu.vector_store %arg9[%c0_10, %c7, %c0_11], %6 {strides = array<i32>} : memref<18x32x128xf32, #tpu.memory_space<vmem>>, vector<18x1x128xf32>,
    %cst_12 = arith.constant 0.000000e+00 : f32
    %8 = vector.broadcast %cst_12 : f32 to vector<18x1x128xf32>
    %c0_13 = arith.constant 0 : index
    %c24 = arith.constant 24 : index
    %c0_14 = arith.constant 0 : index
    %9 = vector.load %arg9[%c0_13, %c24, %c0_14] : memref<18x32x128xf32, #tpu.memory_space<vmem>>, vector<18x1x128xf32>
    tpu.vector_store %arg9[%c0_13, %c24, %c0_14], %8 {strides = array<i32>} : memref<18x32x128xf32, #tpu.memory_space<vmem>>, vector<18x1x128xf32>,
    %c1 = arith.constant 1 : index
    %c8 = arith.constant 8 : index
    %c0_15 = arith.constant 0 : index
    %10 = vector.load %arg9[%c1, %c8, %c0_15] : memref<18x32x128xf32, #tpu.memory_space<vmem>>, vector<16x16x128xf32>
    tpu.vector_store %arg9[%c1, %c8, %c0_15], %1 {strides = array<i32>} : memref<18x32x128xf32, #tpu.memory_space<vmem>>, vector<16x16x128xf32>,
    %c0_16 = arith.constant 0 : index
    %c7_17 = arith.constant 7 : index
    %c0_18 = arith.constant 0 : index
    %11 = vector.load %arg9[%c0_16, %c7_17, %c0_18] : memref<18x32x128xf32, #tpu.memory_space<vmem>>, vector<18x16x128xf32>
    %12 = vector.extract_strided_slice %11 {offsets = [0, 0, 0], sizes = [16, 16, 128], strides = [1, 1, 1]} : vector<18x16x128xf32> to vector<16x16x128xf32>
    %13 = vector.extract_strided_slice %11 {offsets = [1, 0, 0], sizes = [16, 16, 128], strides = [1, 1, 1]} : vector<18x16x128xf32> to vector<16x16x128xf32>
    %14 = vector.extract_strided_slice %11 {offsets = [2, 0, 0], sizes = [16, 16, 128], strides = [1, 1, 1]} : vector<18x16x128xf32> to vector<16x16x128xf32>
    %15 = tpu.concatenate %12, %13, %14 in 2 : vector<16x16x128xf32>, vector<16x16x128xf32>, vector<16x16x128xf32> -> vector<16x16x384xf32>
    %16 = arith.truncf %15 : vector<16x16x384xf32> to vector<16x16x384xbf16>
    %c0_19 = arith.constant 0 : index
    %c0_20 = arith.constant 0 : index
    %c0_21 = arith.constant 0 : index
    %17 = vector.load %arg2[%c0_19, %c0_20, %c0_21] : memref<3x384x128xbf16, #tpu.memory_space<vmem>>, vector<1x384x128xbf16>
    %18 = vector.shape_cast %17 : vector<1x384x128xbf16> to vector<384x128xbf16>
    "tpu.trace_start"() <{level = 10 : i32, message = "hwi,io->hwo"}> : () -> ()
    %cst_22 = arith.constant dense<0.000000e+00> : vector<16x16x128xf32>
    %19 = tpu.matmul %16, %18, %cst_22 {dimension_numbers = #tpu.dot_dimension_numbers<[2], [0], [0, 1], [1], [0, 0, 0, 1, 1, 1], [], []>} : vector<16x16x384xbf16>, vector<384x128xbf16>, vector<16x16x128xf32> -> vector<16x16x128xf32>
    "tpu.trace_stop"() : () -> ()
    %c0_23 = arith.constant 0 : index
    %c8_24 = arith.constant 8 : index
    %c0_25 = arith.constant 0 : index
    %20 = vector.load %arg9[%c0_23, %c8_24, %c0_25] : memref<18x32x128xf32, #tpu.memory_space<vmem>>, vector<18x16x128xf32>
    %21 = vector.extract_strided_slice %20 {offsets = [0, 0, 0], sizes = [16, 16, 128], strides = [1, 1, 1]} : vector<18x16x128xf32> to vector<16x16x128xf32>
    %22 = vector.extract_strided_slice %20 {offsets = [1, 0, 0], sizes = [16, 16, 128], strides = [1, 1, 1]} : vector<18x16x128xf32> to vector<16x16x128xf32>
    %23 = vector.extract_strided_slice %20 {offsets = [2, 0, 0], sizes = [16, 16, 128], strides = [1, 1, 1]} : vector<18x16x128xf32> to vector<16x16x128xf32>
    %24 = tpu.concatenate %21, %22, %23 in 2 : vector<16x16x128xf32>, vector<16x16x128xf32>, vector<16x16x128xf32> -> vector<16x16x384xf32>
    %25 = arith.truncf %24 : vector<16x16x384xf32> to vector<16x16x384xbf16>
    %c1_26 = arith.constant 1 : index
    %c0_27 = arith.constant 0 : index
    %c0_28 = arith.constant 0 : index
    %26 = vector.load %arg2[%c1_26, %c0_27, %c0_28] : memref<3x384x128xbf16, #tpu.memory_space<vmem>>, vector<1x384x128xbf16>
    %27 = vector.shape_cast %26 : vector<1x384x128xbf16> to vector<384x128xbf16>
    "tpu.trace_start"() <{level = 10 : i32, message = "hwi,io->hwo"}> : () -> ()
    %cst_29 = arith.constant dense<0.000000e+00> : vector<16x16x128xf32>
    %28 = tpu.matmul %25, %27, %cst_29 {dimension_numbers = #tpu.dot_dimension_numbers<[2], [0], [0, 1], [1], [0, 0, 0, 1, 1, 1], [], []>} : vector<16x16x384xbf16>, vector<384x128xbf16>, vector<16x16x128xf32> -> vector<16x16x128xf32>
    "tpu.trace_stop"() : () -> ()
    %29 = arith.addf %19, %28 : vector<16x16x128xf32>
    %c0_30 = arith.constant 0 : index
    %c9 = arith.constant 9 : index
    %c0_31 = arith.constant 0 : index
    %30 = vector.load %arg9[%c0_30, %c9, %c0_31] : memref<18x32x128xf32, #tpu.memory_space<vmem>>, vector<18x16x128xf32>
    %31 = vector.extract_strided_slice %30 {offsets = [0, 0, 0], sizes = [16, 16, 128], strides = [1, 1, 1]} : vector<18x16x128xf32> to vector<16x16x128xf32>
    %32 = vector.extract_strided_slice %30 {offsets = [1, 0, 0], sizes = [16, 16, 128], strides = [1, 1, 1]} : vector<18x16x128xf32> to vector<16x16x128xf32>
    %33 = vector.extract_strided_slice %30 {offsets = [2, 0, 0], sizes = [16, 16, 128], strides = [1, 1, 1]} : vector<18x16x128xf32> to vector<16x16x128xf32>
    %34 = tpu.concatenate %31, %32, %33 in 2 : vector<16x16x128xf32>, vector<16x16x128xf32>, vector<16x16x128xf32> -> vector<16x16x384xf32>
    %35 = arith.truncf %34 : vector<16x16x384xf32> to vector<16x16x384xbf16>
    %c2 = arith.constant 2 : index
    %c0_32 = arith.constant 0 : index
    %c0_33 = arith.constant 0 : index
    %36 = vector.load %arg2[%c2, %c0_32, %c0_33] : memref<3x384x128xbf16, #tpu.memory_space<vmem>>, vector<1x384x128xbf16>
    %37 = vector.shape_cast %36 : vector<1x384x128xbf16> to vector<384x128xbf16>
    "tpu.trace_start"() <{level = 10 : i32, message = "hwi,io->hwo"}> : () -> ()
    %cst_34 = arith.constant dense<0.000000e+00> : vector<16x16x128xf32>
    %38 = tpu.matmul %35, %37, %cst_34 {dimension_numbers = #tpu.dot_dimension_numbers<[2], [0], [0, 1], [1], [0, 0, 0, 1, 1, 1], [], []>} : vector<16x16x384xbf16>, vector<384x128xbf16>, vector<16x16x128xf32> -> vector<16x16x128xf32>
    "tpu.trace_stop"() : () -> ()
    %39 = arith.addf %29, %38 : vector<16x16x128xf32>
    %c0_35 = arith.constant 0 : index
    %c0_36 = arith.constant 0 : index
    %40 = vector.load %arg3[%c0_35, %c0_36] : memref<1x128xf32, #tpu.memory_space<vmem>>, vector<1x128xf32>
    %41 = vector.shape_cast %40 : vector<1x128xf32> to vector<1x1x128xf32>
    %c0_37 = arith.constant 0 : index
    %c0_38 = arith.constant 0 : index
    %42 = vector.load %arg4[%c0_37, %c0_38] : memref<1x128xf32, #tpu.memory_space<vmem>>, vector<1x128xf32>
    %43 = vector.shape_cast %42 : vector<1x128xf32> to vector<1x1x128xf32>
    %44 = vector.broadcast %41 : vector<1x1x128xf32> to vector<16x16x128xf32>
    %45 = arith.mulf %39, %44 : vector<16x16x128xf32>
    %46 = vector.broadcast %43 : vector<1x1x128xf32> to vector<16x16x128xf32>
    %47 = arith.addf %45, %46 : vector<16x16x128xf32>
    %cst_39 = arith.constant 0.000000e+00 : f32
    %48 = vector.broadcast %cst_39 : f32 to vector<16x16x128xf32>
    %49 = arith.maximumf %47, %48 : vector<16x16x128xf32>
    %cst_40 = arith.constant 0.000000e+00 : f32
    %50 = vector.broadcast %cst_40 : f32 to vector<1x32x128xf32>
    %c0_41 = arith.constant 0 : index
    %c0_42 = arith.constant 0 : index
    %c0_43 = arith.constant 0 : index
    %51 = vector.load %arg10[%c0_41, %c0_42, %c0_43] : memref<18x32x128xf32, #tpu.memory_space<vmem>>, vector<1x32x128xf32>
    tpu.vector_store %arg10[%c0_41, %c0_42, %c0_43], %50 {strides = array<i32>} : memref<18x32x128xf32, #tpu.memory_space<vmem>>, vector<1x32x128xf32>,
    %cst_44 = arith.constant 0.000000e+00 : f32
    %52 = vector.broadcast %cst_44 : f32 to vector<1x32x128xf32>
    %c17_45 = arith.constant 17 : index
    %c0_46 = arith.constant 0 : index
    %c0_47 = arith.constant 0 : index
    %53 = vector.load %arg10[%c17_45, %c0_46, %c0_47] : memref<18x32x128xf32, #tpu.memory_space<vmem>>, vector<1x32x128xf32>
    tpu.vector_store %arg10[%c17_45, %c0_46, %c0_47], %52 {strides = array<i32>} : memref<18x32x128xf32, #tpu.memory_space<vmem>>, vector<1x32x128xf32>,
    %cst_48 = arith.constant 0.000000e+00 : f32
    %54 = vector.broadcast %cst_48 : f32 to vector<18x1x128xf32>
    %c0_49 = arith.constant 0 : index
    %c7_50 = arith.constant 7 : index
    %c0_51 = arith.constant 0 : index
    %55 = vector.load %arg10[%c0_49, %c7_50, %c0_51] : memref<18x32x128xf32, #tpu.memory_space<vmem>>, vector<18x1x128xf32>
    tpu.vector_store %arg10[%c0_49, %c7_50, %c0_51], %54 {strides = array<i32>} : memref<18x32x128xf32, #tpu.memory_space<vmem>>, vector<18x1x128xf32>,
    %cst_52 = arith.constant 0.000000e+00 : f32
    %56 = vector.broadcast %cst_52 : f32 to vector<18x1x128xf32>
    %c0_53 = arith.constant 0 : index
    %c24_54 = arith.constant 24 : index
    %c0_55 = arith.constant 0 : index
    %57 = vector.load %arg10[%c0_53, %c24_54, %c0_55] : memref<18x32x128xf32, #tpu.memory_space<vmem>>, vector<18x1x128xf32>
    tpu.vector_store %arg10[%c0_53, %c24_54, %c0_55], %56 {strides = array<i32>} : memref<18x32x128xf32, #tpu.memory_space<vmem>>, vector<18x1x128xf32>,
    %c1_56 = arith.constant 1 : index
    %c8_57 = arith.constant 8 : index
    %c0_58 = arith.constant 0 : index
    %58 = vector.load %arg10[%c1_56, %c8_57, %c0_58] : memref<18x32x128xf32, #tpu.memory_space<vmem>>, vector<16x16x128xf32>
    tpu.vector_store %arg10[%c1_56, %c8_57, %c0_58], %49 {strides = array<i32>} : memref<18x32x128xf32, #tpu.memory_space<vmem>>, vector<16x16x128xf32>,
    %c0_59 = arith.constant 0 : index
    %c7_60 = arith.constant 7 : index
    %c0_61 = arith.constant 0 : index
    %59 = vector.load %arg10[%c0_59, %c7_60, %c0_61] : memref<18x32x128xf32, #tpu.memory_space<vmem>>, vector<18x16x128xf32>
    %60 = vector.extract_strided_slice %59 {offsets = [0, 0, 0], sizes = [16, 16, 128], strides = [1, 1, 1]} : vector<18x16x128xf32> to vector<16x16x128xf32>
    %61 = vector.extract_strided_slice %59 {offsets = [1, 0, 0], sizes = [16, 16, 128], strides = [1, 1, 1]} : vector<18x16x128xf32> to vector<16x16x128xf32>
    %62 = vector.extract_strided_slice %59 {offsets = [2, 0, 0], sizes = [16, 16, 128], strides = [1, 1, 1]} : vector<18x16x128xf32> to vector<16x16x128xf32>
    %63 = tpu.concatenate %60, %61, %62 in 2 : vector<16x16x128xf32>, vector<16x16x128xf32>, vector<16x16x128xf32> -> vector<16x16x384xf32>
    %64 = arith.truncf %63 : vector<16x16x384xf32> to vector<16x16x384xbf16>
    %c0_62 = arith.constant 0 : index
    %c0_63 = arith.constant 0 : index
    %c0_64 = arith.constant 0 : index
    %65 = vector.load %arg5[%c0_62, %c0_63, %c0_64] : memref<3x384x128xbf16, #tpu.memory_space<vmem>>, vector<1x384x128xbf16>
    %66 = vector.shape_cast %65 : vector<1x384x128xbf16> to vector<384x128xbf16>
    "tpu.trace_start"() <{level = 10 : i32, message = "hwi,io->hwo"}> : () -> ()
    %cst_65 = arith.constant dense<0.000000e+00> : vector<16x16x128xf32>
    %67 = tpu.matmul %64, %66, %cst_65 {dimension_numbers = #tpu.dot_dimension_numbers<[2], [0], [0, 1], [1], [0, 0, 0, 1, 1, 1], [], []>} : vector<16x16x384xbf16>, vector<384x128xbf16>, vector<16x16x128xf32> -> vector<16x16x128xf32>
    "tpu.trace_stop"() : () -> ()
    %c0_66 = arith.constant 0 : index
    %c8_67 = arith.constant 8 : index
    %c0_68 = arith.constant 0 : index
    %68 = vector.load %arg10[%c0_66, %c8_67, %c0_68] : memref<18x32x128xf32, #tpu.memory_space<vmem>>, vector<18x16x128xf32>
    %69 = vector.extract_strided_slice %68 {offsets = [0, 0, 0], sizes = [16, 16, 128], strides = [1, 1, 1]} : vector<18x16x128xf32> to vector<16x16x128xf32>
    %70 = vector.extract_strided_slice %68 {offsets = [1, 0, 0], sizes = [16, 16, 128], strides = [1, 1, 1]} : vector<18x16x128xf32> to vector<16x16x128xf32>
    %71 = vector.extract_strided_slice %68 {offsets = [2, 0, 0], sizes = [16, 16, 128], strides = [1, 1, 1]} : vector<18x16x128xf32> to vector<16x16x128xf32>
    %72 = tpu.concatenate %69, %70, %71 in 2 : vector<16x16x128xf32>, vector<16x16x128xf32>, vector<16x16x128xf32> -> vector<16x16x384xf32>
    %73 = arith.truncf %72 : vector<16x16x384xf32> to vector<16x16x384xbf16>
    %c1_69 = arith.constant 1 : index
    %c0_70 = arith.constant 0 : index
    %c0_71 = arith.constant 0 : index
    %74 = vector.load %arg5[%c1_69, %c0_70, %c0_71] : memref<3x384x128xbf16, #tpu.memory_space<vmem>>, vector<1x384x128xbf16>
    %75 = vector.shape_cast %74 : vector<1x384x128xbf16> to vector<384x128xbf16>
    "tpu.trace_start"() <{level = 10 : i32, message = "hwi,io->hwo"}> : () -> ()
    %cst_72 = arith.constant dense<0.000000e+00> : vector<16x16x128xf32>
    %76 = tpu.matmul %73, %75, %cst_72 {dimension_numbers = #tpu.dot_dimension_numbers<[2], [0], [0, 1], [1], [0, 0, 0, 1, 1, 1], [], []>} : vector<16x16x384xbf16>, vector<384x128xbf16>, vector<16x16x128xf32> -> vector<16x16x128xf32>
    "tpu.trace_stop"() : () -> ()
    %77 = arith.addf %67, %76 : vector<16x16x128xf32>
    %c0_73 = arith.constant 0 : index
    %c9_74 = arith.constant 9 : index
    %c0_75 = arith.constant 0 : index
    %78 = vector.load %arg10[%c0_73, %c9_74, %c0_75] : memref<18x32x128xf32, #tpu.memory_space<vmem>>, vector<18x16x128xf32>
    %79 = vector.extract_strided_slice %78 {offsets = [0, 0, 0], sizes = [16, 16, 128], strides = [1, 1, 1]} : vector<18x16x128xf32> to vector<16x16x128xf32>
    %80 = vector.extract_strided_slice %78 {offsets = [1, 0, 0], sizes = [16, 16, 128], strides = [1, 1, 1]} : vector<18x16x128xf32> to vector<16x16x128xf32>
    %81 = vector.extract_strided_slice %78 {offsets = [2, 0, 0], sizes = [16, 16, 128], strides = [1, 1, 1]} : vector<18x16x128xf32> to vector<16x16x128xf32>
    %82 = tpu.concatenate %79, %80, %81 in 2 : vector<16x16x128xf32>, vector<16x16x128xf32>, vector<16x16x128xf32> -> vector<16x16x384xf32>
    %83 = arith.truncf %82 : vector<16x16x384xf32> to vector<16x16x384xbf16>
    %c2_76 = arith.constant 2 : index
    %c0_77 = arith.constant 0 : index
    %c0_78 = arith.constant 0 : index
    %84 = vector.load %arg5[%c2_76, %c0_77, %c0_78] : memref<3x384x128xbf16, #tpu.memory_space<vmem>>, vector<1x384x128xbf16>
    %85 = vector.shape_cast %84 : vector<1x384x128xbf16> to vector<384x128xbf16>
    "tpu.trace_start"() <{level = 10 : i32, message = "hwi,io->hwo"}> : () -> ()
    %cst_79 = arith.constant dense<0.000000e+00> : vector<16x16x128xf32>
    %86 = tpu.matmul %83, %85, %cst_79 {dimension_numbers = #tpu.dot_dimension_numbers<[2], [0], [0, 1], [1], [0, 0, 0, 1, 1, 1], [], []>} : vector<16x16x384xbf16>, vector<384x128xbf16>, vector<16x16x128xf32> -> vector<16x16x128xf32>
    "tpu.trace_stop"() : () -> ()
    %87 = arith.addf %77, %86 : vector<16x16x128xf32>
    %c0_80 = arith.constant 0 : index
    %c0_81 = arith.constant 0 : index
    %88 = vector.load %arg6[%c0_80, %c0_81] : memref<1x128xf32, #tpu.memory_space<vmem>>, vector<1x128xf32>
    %89 = vector.shape_cast %88 : vector<1x128xf32> to vector<1x1x128xf32>
    %c0_82 = arith.constant 0 : index
    %c0_83 = arith.constant 0 : index
    %90 = vector.load %arg7[%c0_82, %c0_83] : memref<1x128xf32, #tpu.memory_space<vmem>>, vector<1x128xf32>
    %91 = vector.shape_cast %90 : vector<1x128xf32> to vector<1x1x128xf32>
    %92 = vector.broadcast %89 : vector<1x1x128xf32> to vector<16x16x128xf32>
    %93 = arith.mulf %87, %92 : vector<16x16x128xf32>
    %94 = vector.broadcast %91 : vector<1x1x128xf32> to vector<16x16x128xf32>
    %95 = arith.addf %93, %94 : vector<16x16x128xf32>
    %96 = arith.addf %95, %1 : vector<16x16x128xf32>
    %cst_84 = arith.constant 0.000000e+00 : f32
    %97 = vector.broadcast %cst_84 : f32 to vector<16x16x128xf32>
    %98 = arith.maximumf %96, %97 : vector<16x16x128xf32>
    %c0_85 = arith.constant 0 : index
    %c0_86 = arith.constant 0 : index
    %c0_87 = arith.constant 0 : index
    %c0_88 = arith.constant 0 : index
    %99 = vector.load %arg8[%c0_85, %c0_86, %c0_87, %c0_88] : memref<1x16x16x128xf32, #tpu.memory_space<vmem>>, vector<1x16x16x128xf32>
    %100 = vector.shape_cast %99 : vector<1x16x16x128xf32> to vector<16x16x128xf32>
    %101 = vector.shape_cast %98 : vector<16x16x128xf32> to vector<1x16x16x128xf32>
    tpu.vector_store %arg8[%c0_85, %c0_86, %c0_87, %c0_88], %101 {strides = array<i32>} : memref<1x16x16x128xf32, #tpu.memory_space<vmem>>, vector<1x16x16x128xf32>,
    return
  }
  func.func @transform_0(%arg0: i32) -> (i32, i32, i32, i32) {
    %c0_i32 = arith.constant 0 : i32
    %c0_i32_0 = arith.constant 0 : i32
    %c0_i32_1 = arith.constant 0 : i32
    %c0_i32_2 = arith.constant 0 : i32
    return %arg0, %c0_i32, %c0_i32_0, %c0_i32_1 : i32, i32, i32, i32
  }
  func.func @transform_1(%arg0: i32) -> (i32, i32, i32) {
    %c0_i32 = arith.constant 0 : i32
    %c0_i32_0 = arith.constant 0 : i32
    %c0_i32_1 = arith.constant 0 : i32
    %c0_i32_2 = arith.constant 0 : i32
    return %c0_i32, %c0_i32_0, %c0_i32_1 : i32, i32, i32
  }
  func.func @transform_2(%arg0: i32) -> (i32, i32) {
    %c0_i32 = arith.constant 0 : i32
    %c0_i32_0 = arith.constant 0 : i32
    %c0_i32_1 = arith.constant 0 : i32
    return %c0_i32, %c0_i32_0 : i32, i32
  }
  func.func @transform_3(%arg0: i32) -> (i32, i32) {
    %c0_i32 = arith.constant 0 : i32
    %c0_i32_0 = arith.constant 0 : i32
    %c0_i32_1 = arith.constant 0 : i32
    return %c0_i32, %c0_i32_0 : i32, i32
  }
  func.func @transform_4(%arg0: i32) -> (i32, i32, i32) {
    %c0_i32 = arith.constant 0 : i32
    %c0_i32_0 = arith.constant 0 : i32
    %c0_i32_1 = arith.constant 0 : i32
    %c0_i32_2 = arith.constant 0 : i32
    return %c0_i32, %c0_i32_0, %c0_i32_1 : i32, i32, i32
  }
  func.func @transform_5(%arg0: i32) -> (i32, i32) {
    %c0_i32 = arith.constant 0 : i32
    %c0_i32_0 = arith.constant 0 : i32
    %c0_i32_1 = arith.constant 0 : i32
    return %c0_i32, %c0_i32_0 : i32, i32
  }
  func.func @transform_6(%arg0: i32) -> (i32, i32) {
    %c0_i32 = arith.constant 0 : i32
    %c0_i32_0 = arith.constant 0 : i32
    %c0_i32_1 = arith.constant 0 : i32
    return %c0_i32, %c0_i32_0 : i32, i32
  }
  func.func @transform_7(%arg0: i32) -> (i32, i32, i32, i32) {
    %c0_i32 = arith.constant 0 : i32
    %c0_i32_0 = arith.constant 0 : i32
    %c0_i32_1 = arith.constant 0 : i32
    %c0_i32_2 = arith.constant 0 : i32
    return %arg0, %c0_i32, %c0_i32_0, %c0_i32_1 : i32, i32, i32, i32
  }
}

</mosaic_0001>

<bundles_post_ra>
// kernel: tpu_custom_call.1
= control target key start
LH: loop header
LB: loop body
LE: loop exit
PB: predicated region body
PF: predicated region fallthrough
CT: control target
= control target key end

     0   :  { %12 = vsyncpa [#allocation5], 0  ;;  %s8091_s0 = inlined_call_operand.hbm [shape: f32[2,16,16,128], index: 0, kind: input, shape index: {}]   ;;  %s8092_s1 = inlined_call_operand.hbm [shape: bf16[3,384,128], index: 1, kind: input, shape index: {}]   ;;  %s8093_s2 = inlined_call_operand.vmem [shape: f32[1,128], index: 2, kind: input, shape index: {}]   ;;  %s8094_s3 = inlined_call_operand.vmem [shape: f32[1,128], index: 3, kind: input, shape index: {}]   ;;  %s8095_s4 = inlined_call_operand.hbm [shape: bf16[3,384,128], index: 4, kind: input, shape index: {}]   ;;  %s8096_s5 = inlined_call_operand.vmem [shape: f32[1,128], index: 5, kind: input, shape index: {}]   ;;  %s8097_s6 = inlined_call_operand.vmem [shape: f32[1,128], index: 6, kind: input, shape index: {}]   ;;  %s8098_s7 = inlined_call_operand.hbm [shape: f32[2,16,16,128], index: 7, kind: output, shape index: {}]  }
   0x1   :  { %14 = vsyncpa [#allocation5 + $0x1], 0 }
   0x2   :  { %15 = vsyncpa [#allocation8], 0 }
   0x3   :  { %16 = vsyncpa [#allocation6], 0 }
   0x4   :  { %18 = vsyncpa [#allocation6 + $0x1], 0  ;;  %s6434_s24 = smov 0   ;;  %s6436_s25 = smov 0  }
   0x5   :  { %s6438_s26 = smov 0   ;;  %s6440_s27 = smov 0  }
   0x6 LB: > { %s6455_s28 = sadd.s32 4294967295, %s6380_s27   ;;  %s4381_s29 = sadd.s32 4294967294, %s6380_s27   ;;  %s6380_s27 = sphi %s6440_s27, %s8142_s27   ;;  %s6376_s26 = sphi %s6438_s26, %s8141_s26   ;;  %s6372_s25 = sphi %s6436_s25, %s8140_s25   ;;  %s6368_s24 = sphi %s6434_s24, %s8139_s24  }
   0x7   : > { %p44_p0 = scmp.ne.s32.totalorder %s6372_s25, %s6368_s24  ;;  %p8099_p1 = scmp.eq.s32.totalorder %s6455_s28, 0 }
   0x8   : > { %p200_p3 = scmp.eq.s32.totalorder %s4381_s29, 1  ;;  %p4382_p5 = scmp.ge.s32.totalorder %s6380_s27, 1 }
   0x9   : > { %p6464_p4 = por %p8099_p1, %p44_p0  ;;  %p207_p7 = scmp.lt.s32.totalorder %s6380_s27, 3 }
   0xa   : > { %p6469_p6 = por %p200_p3, %p44_p0  ;;  %s6382_s10 = smov [#allocation7]  }
   0xb   : > { %s8102_s30 = scalar_select %p6464_p4, 1, 0 }
   0xc   : > { %s8103_s8 = scalar_select %p6469_p6, 1, 0 }
   0xd   : > { %p6474_p8 = pnand %p4382_p5, %p207_p7  ;;  %s219_s11 = sshll.u32 %s6382_s10, 4  ;;  %s6478_s11 = int_to_ptr.vmem [resolvable:$true] %s219_s11 }
   0xe   : > { %s6383_s13 = smov [#allocation9]   ;;  %s6224_s17 = scalar_lea.hbm %s8092_s1, 9216 }
   0xf   : > { %p5985_p9 = pneg %p6474_p8  ;;  %s238_s14 = sshll.u32 %s6383_s13, 4  ;;  %s6489_s14 = int_to_ptr.vmem [resolvable:$true] %s238_s14 }
  0x10   : > { %p6225_p12 = scmp.ne.s32.totalorder %s8092_s1, %s6224_s17  ;;  %p6231_p5 = scmp.lt.u32.totalorder %s6224_s17, %s8092_s1 }
  0x11   : > { %p6485_p11 = pnand %p5985_p9, %p8099_p1 }
  0x13   : > { %p6226_p13 = pneg %p6485_p11 }
  0x15   : > { %p6227_p0 = pnand %p6226_p13, %p6225_p12 }
  0x17   : > { %p6228_p3 = pneg %p6227_p0 }
  0x19   : > { %p6233_p7 = pnand %p6231_p5, %p6228_p3 }
  0x1b   : > { %6236 = shalt.err (!%p6233_p7)
}
  0x1c   : > { %s6237_s22 = scalar_lea.vmem %s6478_s11, 9216  ;;  %p6245_p2 = scmp.lt.s32.totalorder %s6478_s11, %s6478_s11 }
  0x1d   : > { %p6238_p9 = scmp.ne.s32.totalorder %s6478_s11, %s6237_s22  ;;  %p6246_p12 = scmp.lt.s32.totalorder %s6237_s22, %s6237_s22 }
  0x1f   : > { %p6240_p10 = pnand %p6238_p9, %p6226_p13  ;;  %p6247_p0 = por %p6246_p12, %p6245_p2 }
  0x21   : > { %p6241_p1 = pneg %p6240_p10 }
  0x23   : > { %p6248_p6 = pnand %p6247_p0, %p6241_p1 }
  0x25   : > { %6251 = shalt.err (!%p6248_p6)
}
  0x26   : > { %s6384_s23 = smov 64   ;;  %s6385_s29 = smov 4  }
  0x27   : > { %5988 = dma.hbm_to_vmem [thread:$0]  (!%p6485_p11), %s8092_s1, 9216, %s6478_s11, [#allocation8], %s6384_s23, %s6384_s23, %s6385_s29  }
  0x28   : > { %s6252_s17 = scalar_lea.hbm %s8095_s4, 9216 }
  0x29   : > { %p6253_p2 = scmp.ne.s32.totalorder %s8095_s4, %s6252_s17  ;;  %p6259_p10 = scmp.lt.u32.totalorder %s6252_s17, %s8095_s4 }
  0x2b   : > { %p6255_p1 = pnand %p6253_p2, %p6226_p13 }
  0x2d   : > { %p6256_p6 = pneg %p6255_p1 }
  0x2f   : > { %p6261_p3 = pnand %p6259_p10, %p6256_p6 }
  0x31   : > { %6264 = shalt.err (!%p6261_p3)
}
  0x32   : > { %s6265_s11 = scalar_lea.vmem %s6489_s14, 9216  ;;  %p6273_p12 = scmp.lt.s32.totalorder %s6489_s14, %s6489_s14 }
  0x33   : > { %p6266_p5 = scmp.ne.s32.totalorder %s6489_s14, %s6265_s11  ;;  %p6274_p0 = scmp.lt.s32.totalorder %s6265_s11, %s6265_s11 }
  0x35   : > { %p6268_p7 = pnand %p6266_p5, %p6226_p13  ;;  %p6275_p2 = por %p6274_p0, %p6273_p12 }
  0x37   : > { %p6269_p9 = pneg %p6268_p7 }
  0x39   : > { %p6276_p1 = pnand %p6275_p2, %p6269_p9 }
  0x3b   : > { %6279 = shalt.err (!%p6276_p1)
}
  0x3c   : > { %5991 = dma.hbm_to_vmem [thread:$0]  (!%p6485_p11), %s8095_s4, 9216, %s6489_s14, [#allocation8], %s6384_s23, %s6384_s23, %s6385_s29  }
  0x3d   : > { %s6544_s13 = sadd.s32 1, %s6380_s27   ;;  %s31_s12 = sadd.s32 1, %s6376_s26 }
  0x3e   : > { %s28_s15 = ssub.s32 %s6380_s27, %s6544_s13  ;;  %p38_p13 = scmp.ne.s32.totalorder %s6376_s26, %s6372_s25 }
  0x3f   : > { %p29_p6 = scmp.eq.s32.totalorder %s28_s15, 0  ;;  %p39_p10 = scmp.eq.s32.totalorder %s6380_s27, 0 }
  0x40   : > { %p8106_p3 = scmp.eq.s32.totalorder %s6455_s28, 1  ;;  %p6002_p7 = scmp.lt.s32.totalorder %s6380_s27, 2 }
  0x41   : > { %s6560_s17 = scalar_select %p29_p6, %s6376_s26, %s31_s12  }
  0x42   : > { %p6554_p5 = por %p8106_p3, %p38_p13  ;;  %p40_p9 = por %p39_p10, %p38_p13 }
  0x43   : > { %s258_s18 = sand.u32 1, %s6376_s26   ;;  %s4547_s14 = sshll.u32 %s6380_s27, 12 }
  0x44   : > { %s8107_s16 = scalar_select %p6554_p5, 1, 0 }
  0x45   : > { %s4386_s19 = sshll.u32 %s258_s18, 8  ;;  %s6567_s20 = scalar_lea.hbm %s8091_s0, %s4547_s14 }
  0x46   : > { %s262_s21 = scalar_lea.vmem [#allocation4], %s4386_s19  ;;  %p6571_p11 = pnand %p6002_p7, %p40_p9 }
  0x47   : > { %s269_s11 = sshll.u32 %s262_s21, 4  ;;  %s6575_s10 = scalar_lea.sflag [#allocation5], %s258_s18  ;;  %s6569_s11 = int_to_ptr.vmem [resolvable:$true] %s269_s11 }
  0x48   : > { %s6280_s12 = scalar_lea.hbm %s6567_s20, 4096  ;;  %p6282_p0 = pneg %p6571_p11 }
  0x49   : > { %p6281_p12 = scmp.ne.s32.totalorder %s6567_s20, %s6280_s12  ;;  %s6285_s14 = scalar_lea.hbm %s8091_s0, 8192 }
  0x4a   : > { %p6286_p13 = scmp.lt.u32.totalorder %s6567_s20, %s8091_s0  ;;  %p6287_p6 = scmp.lt.u32.totalorder %s6285_s14, %s6280_s12 }
  0x4b   : > { %p6283_p2 = pnand %p6282_p0, %p6281_p12  ;;  %p6289_p3 = scmp.lt.u32.totalorder %s6280_s12, %s6567_s20 }
  0x4c   : > { %p6288_p10 = por %p6287_p6, %p6286_p13 }
  0x4d   : > { %p6284_p1 = pneg %p6283_p2 }
  0x4e   : > { %p6290_p7 = por %p6289_p3, %p6288_p10 }
  0x50   : > { %p6291_p9 = pnand %p6290_p7, %p6284_p1 }
  0x52   : > { %6294 = shalt.err (!%p6291_p9)
}
  0x53   : > { %s6295_s18 = scalar_lea.vmem %s6569_s11, 4096  ;;  %s6386_s21 = smov [#allocation4]  }
  0x54   : > { %p6296_p12 = scmp.ne.s32.totalorder %s6569_s11, %s6295_s18  ;;  %s6300_s15 = sshll.u32 %s6386_s21, 4  ;;  %s6301_s15 = int_to_ptr.vmem [resolvable:$false] %s6300_s15 }
  0x55   : > { %s6302_s19 = scalar_lea.vmem %s6301_s15, 8192  ;;  %p6303_p4 = scmp.lt.s32.totalorder %s6569_s11, %s6301_s15 }
  0x56   : > { %p6298_p2 = pnand %p6296_p12, %p6282_p0  ;;  %p6304_p13 = scmp.lt.s32.totalorder %s6302_s19, %s6295_s18 }
  0x58   : > { %p6299_p5 = pneg %p6298_p2  ;;  %p6305_p6 = por %p6304_p13, %p6303_p4 }
  0x5a   : > { %p6306_p10 = pnand %p6305_p6, %p6299_p5 }
  0x5c   : > { %6309 = shalt.err (!%p6306_p10)
}
  0x5d   : > { %s6387_s12 = smov 128   ;;  %s6388_s14 = smov 8  }
  0x5e   : > { %5995 = dma.hbm_to_vmem [thread:$0]  (!%p6571_p11), %s6567_s20, 4096, %s6569_s11, %s6575_s10, %s6387_s12, %s6387_s12, %s6388_s14  }
  0x5f   : > { %281 = sbr.rel (%p6474_p8) target bundleno = 1184 (0x4a0), region = 48 }
  0x66   : > { %s6606_s23 = sand.u32 1, %s6372_s25   ;;  %p8109_p4 = scmp.ne.s32.totalorder %s8102_s30, 0 }
  0x67   : > { %s4390_s29 = sshll.u32 %s6606_s23, 8  ;;  %s284_s18 = scalar_lea.sflag [#allocation5], %s6606_s23 }
  0x68   : > { %s6612_s21 = scalar_lea.vmem [#allocation4], %s4390_s29 }
  0x69   : > { %6355 = dma.done.wait (%p8109_p4), %s284_s18, 4096  }
  0x6a   : > { %6357 = vsyncadd (%p8109_p4), %s284_s18, 4294963200  ;;  %p8110_p5 = scmp.eq.s32.totalorder %s6455_s28, 0 }
  0x6c   : > { %6359 = dma.done.wait (%p8110_p5), [#allocation8], 18432   ;;  %p8111_p8 = pmov %p8110_p5 }
  0x6d   : > { %v6389_v0 = vmov 0.0   ;;  %v6047_v1 = vld [vmem:[#allocation7 + $0x100] sm:$0xff]   ;;  %v6051_v5 = vld [vmem:[#allocation7 + $0x108] sm:$0xff]   ;;  %v6055_v9 = vld [vmem:[#allocation7 + $0x110] sm:$0xff]   ;;  %v6390_v44 = vmov 0.0|0.0   ;;  %s7924_s12 = scalar_lea.vmem [#allocation10], %s4390_s29 }
  0x6e   : > { %6361 = vsyncadd (%p8111_p8), [#allocation8], 4294948864  ;;  %369 = vst [vmem:[#allocation2 + $0x27] sm:$0x1] %v6389_v0  ;;  %v6048_v2 = vld [vmem:[#allocation7 + $0x40] sm:$0xff]   ;;  %4549 = vmatprep.subr.bf16.mxu0 %v6047_v1  ;;  %v6052_v6 = vld [vmem:[#allocation7 + $0x48] sm:$0xff]  }
  0x6f   : > { %359 = vst [vmem:[#allocation2] sm:$0xff] %v6389_v0  ;;  %360 = vst [vmem:[#allocation2 + $0x8] sm:$0xff] %v6389_v0  ;;  %v6049_v3 = vld [vmem:[#allocation7 + $0xc0] sm:$0xff]   ;;  %4685 = vmatprep.subr.bf16.mxu1 %v6048_v2  ;;  %v6053_v7 = vld [vmem:[#allocation7 + $0xc8] sm:$0xff]   ;;  %s4548_s14 = sshll.u32 %s6455_s28, 12  ;;  %s4289_s29 = sshll.u32 %s7924_s12, 4  ;;  %s8044_s29 = int_to_ptr.vmem [resolvable:$true] %s4289_s29 }
  0x70   : > { %361 = vst [vmem:[#allocation2 + $0x10] sm:$0xff] %v6389_v0  ;;  %362 = vst [vmem:[#allocation2 + $0x18] sm:$0xff] %v6389_v0  ;;  %v6050_v4 = vld [vmem:[#allocation7] sm:$0xff]   ;;  %4550 = vmatpush3.bf16.msra.mxu0 %v6049_v3  ;;  %v6054_v8 = vld [vmem:[#allocation7 + $0x8] sm:$0xff]   ;;  %s8042_s30 = scalar_lea.hbm %s8098_s7, %s4548_s14  ;;  %s4276_s28 = scalar_lea.sflag [#allocation6], %s6606_s23 }
  0x71   : > { %364 = vst [vmem:[#allocation2 + $0x220] sm:$0xff] %v6389_v0  ;;  %365 = vst [vmem:[#allocation2 + $0x228] sm:$0xff] %v6389_v0  ;;  %4686 = vmatpush3.bf16.msra.mxu1 %v6050_v4  ;;  %4551 = vmatprep.subr.bf16.mxu0 %v6051_v5  ;;  %v6056_v10 = vld [vmem:[#allocation7 + $0x50] sm:$0xff]   ;;  %v6059_v13 = vld [vmem:[#allocation7 + $0x118] sm:$0xff]   ;;  %s6310_s9 = scalar_lea.vmem %s8044_s29, 4096  ;;  %p8136_p0 = scmp.ne.s32.totalorder %s8107_s16, 0 }
  0x72   : > { %366 = vst [vmem:[#allocation2 + $0x230] sm:$0xff] %v6389_v0  ;;  %367 = vst [vmem:[#allocation2 + $0x238] sm:$0xff] %v6389_v0  ;;  %4687 = vmatprep.subr.bf16.mxu1 %v6052_v6  ;;  %v6057_v11 = vld [vmem:[#allocation7 + $0xd0] sm:$0xff]   ;;  %v6060_v14 = vld [vmem:[#allocation7 + $0x58] sm:$0xff]   ;;  %p6311_p11 = scmp.ne.s32.totalorder %s8044_s29, %s6310_s9  ;;  %s6391_s20 = smov [#allocation10]  }
  0x73   : > { %370 = vst [vmem:[#allocation2 + $0x47] sm:$0x1] %v6389_v0  ;;  %371 = vst [vmem:[#allocation2 + $0x67] sm:$0x1] %v6389_v0  ;;  %v6058_v12 = vld [vmem:[#allocation7 + $0x10] sm:$0xff]   ;;  %v6061_v15 = vld [vmem:[#allocation7 + $0xd8] sm:$0xff]  }
  0x74   : > { %372 = vst [vmem:[#allocation2 + $0x87] sm:$0x1] %v6389_v0  ;;  %373 = vst [vmem:[#allocation2 + $0xa7] sm:$0x1] %v6389_v0  ;;  %4552 = vmatpush3.bf16.msra.mxu0 %v6053_v7  ;;  %v6062_v16 = vld [vmem:[#allocation7 + $0x18] sm:$0xff]   ;;  %v6063_v17 = vld [vmem:[#allocation7 + $0x120] sm:$0xff]   ;;  %p6312_p1 = pnand %p6311_p11, %p8136_p0 }
  0x75   : > { %374 = vst [vmem:[#allocation2 + $0xc7] sm:$0x1] %v6389_v0  ;;  %375 = vst [vmem:[#allocation2 + $0xe7] sm:$0x1] %v6389_v0  ;;  %4688 = vmatpush3.bf16.msra.mxu1 %v6054_v8  ;;  %4553 = vmatprep.subr.bf16.mxu0 %v6055_v9  ;;  %v6064_v18 = vld [vmem:[#allocation7 + $0x60] sm:$0xff]   ;;  %v6067_v21 = vld [vmem:[#allocation7 + $0x128] sm:$0xff]  }
  0x76   : > { %376 = vst [vmem:[#allocation2 + $0x107] sm:$0x1] %v6389_v0  ;;  %377 = vst [vmem:[#allocation2 + $0x127] sm:$0x1] %v6389_v0  ;;  %4689 = vmatprep.subr.bf16.mxu1 %v6056_v10  ;;  %v6065_v19 = vld [vmem:[#allocation7 + $0xe0] sm:$0xff]   ;;  %v6068_v22 = vld [vmem:[#allocation7 + $0x68] sm:$0xff]   ;;  %p6313_p3 = pneg %p6312_p1 }
  0x77   : > { %378 = vst [vmem:[#allocation2 + $0x147] sm:$0x1] %v6389_v0  ;;  %379 = vst [vmem:[#allocation2 + $0x167] sm:$0x1] %v6389_v0  ;;  %v6066_v20 = vld [vmem:[#allocation7 + $0x20] sm:$0xff]   ;;  %v6069_v23 = vld [vmem:[#allocation7 + $0xe8] sm:$0xff]  }
  0x78   : > { %380 = vst [vmem:[#allocation2 + $0x187] sm:$0x1] %v6389_v0  ;;  %381 = vst [vmem:[#allocation2 + $0x1a7] sm:$0x1] %v6389_v0  ;;  %4554 = vmatpush3.bf16.msra.mxu0 %v6057_v11  ;;  %v6070_v24 = vld [vmem:[#allocation7 + $0x28] sm:$0xff]   ;;  %v6071_v25 = vld [vmem:[#allocation7 + $0x130] sm:$0xff]  }
  0x79   : > { %382 = vst [vmem:[#allocation2 + $0x1c7] sm:$0x1] %v6389_v0  ;;  %383 = vst [vmem:[#allocation2 + $0x1e7] sm:$0x1] %v6389_v0  ;;  %4690 = vmatpush3.bf16.msra.mxu1 %v6058_v12  ;;  %4555 = vmatprep.subr.bf16.mxu0 %v6059_v13  ;;  %v6072_v26 = vld [vmem:[#allocation7 + $0x70] sm:$0xff]   ;;  %v6075_v29 = vld [vmem:[#allocation7 + $0x138] sm:$0xff]  }
  0x7a   : > { %384 = vst [vmem:[#allocation2 + $0x207] sm:$0x1] %v6389_v0  ;;  %387 = vst [vmem:[#allocation2 + $0x38] sm:$0x1] %v6389_v0  ;;  %4691 = vmatprep.subr.bf16.mxu1 %v6060_v14  ;;  %v6073_v27 = vld [vmem:[#allocation7 + $0xf0] sm:$0xff]   ;;  %v6076_v30 = vld [vmem:[#allocation7 + $0x78] sm:$0xff]  }
  0x7b   : > { %388 = vst [vmem:[#allocation2 + $0x58] sm:$0x1] %v6389_v0  ;;  %389 = vst [vmem:[#allocation2 + $0x78] sm:$0x1] %v6389_v0  ;;  %v6074_v28 = vld [vmem:[#allocation7 + $0x30] sm:$0xff]   ;;  %v6077_v31 = vld [vmem:[#allocation7 + $0xf8] sm:$0xff]  }
  0x7c   : > { %390 = vst [vmem:[#allocation2 + $0x98] sm:$0x1] %v6389_v0  ;;  %391 = vst [vmem:[#allocation2 + $0xb8] sm:$0x1] %v6389_v0  ;;  %4556 = vmatpush3.bf16.msra.mxu0 %v6061_v15  ;;  %v6078_v32 = vld [vmem:[#allocation7 + $0x38] sm:$0xff]   ;;  %v327_v33 = vld [vmem:[%s6612_s21] sm:$0xff] }
  0x7d   : > { %392 = vst [vmem:[#allocation2 + $0xd8] sm:$0x1] %v6389_v0  ;;  %393 = vst [vmem:[#allocation2 + $0xf8] sm:$0x1] %v6389_v0  ;;  %4692 = vmatpush3.bf16.msra.mxu1 %v6062_v16  ;;  %4557 = vmatprep.subr.bf16.mxu0 %v6063_v17  ;;  %v328_v34 = vld [vmem:[%s6612_s21 + $0x8] sm:$0xff]  ;;  %v6079_v36 = vld [vmem:[#allocation7 + $0x140] sm:$0xff]  }
  0x7e   : > { %394 = vst [vmem:[#allocation2 + $0x118] sm:$0x1] %v6389_v0  ;;  %395 = vst [vmem:[#allocation2 + $0x138] sm:$0x1] %v6389_v0  ;;  %4693 = vmatprep.subr.bf16.mxu1 %v6064_v18  ;;  %v576_v35 = vpack.c.bf16 %v328_v34, %v327_v33  ;;  %v329_v37 = vld [vmem:[%s6612_s21 + $0x10] sm:$0xff]  ;;  %v330_v38 = vld [vmem:[%s6612_s21 + $0x18] sm:$0xff] }
  0x7f   : > { %396 = vst [vmem:[#allocation2 + $0x158] sm:$0x1] %v6389_v0  ;;  %397 = vst [vmem:[#allocation2 + $0x178] sm:$0x1] %v6389_v0  ;;  %v438_v40 = vld [vmem:[#allocation2 + $0xf] sm:$0xff]  ;;  %v6714_v41 = vpack.c.bf16 %v330_v38, %v329_v37  ;;  %v331_v42 = vld [vmem:[%s6612_s21 + $0x20] sm:$0xff] }
  0x80   : > { %398 = vst [vmem:[#allocation2 + $0x198] sm:$0x1] %v6389_v0  ;;  %399 = vst [vmem:[#allocation2 + $0x1b8] sm:$0x1] %v6389_v0  ;;  %4558 = vmatpush3.bf16.msra.mxu0 %v6065_v19  ;;  %818 = vmatprep.mubr.bf16.mxu0 %v576_v35  ;;  %v332_v43 = vld [vmem:[%s6612_s21 + $0x28] sm:$0xff]  ;;  %v333_v46 = vld [vmem:[%s6612_s21 + $0x30] sm:$0xff] }
  0x81   : > { %400 = vst [vmem:[#allocation2 + $0x1d8] sm:$0x1] %v6389_v0  ;;  %401 = vst [vmem:[#allocation2 + $0x1f8] sm:$0x1] %v6389_v0  ;;  %4694 = vmatpush3.bf16.msra.mxu1 %v6066_v20  ;;  %4559 = vmatprep.subr.bf16.mxu0 %v6067_v21  ;;  %v6080_v45 = vld [vmem:[#allocation7 + $0x148] sm:$0xff]   ;;  %v334_v47 = vld [vmem:[%s6612_s21 + $0x38] sm:$0xff]  ;;  %v6745_v59 = vpack.c.bf16 %v332_v43, %v331_v42 }
  0x82   : > { %402 = vst [vmem:[#allocation2 + $0x218] sm:$0x1] %v6389_v0  ;;  %2285 = vst [vmem:[#allocation3] sm:$0xff] %v6389_v0  ;;  %4695 = vmatprep.subr.bf16.mxu1 %v6068_v22  ;;  %v6723_v48 = vld [vmem:[%s6612_s21 + $0x40] sm:$0xff]  ;;  %v6726_v49 = vld [vmem:[%s6612_s21 + $0x48] sm:$0xff]  ;;  %v6770_v8 = vpack.c.bf16 %v334_v47, %v333_v46  ;;  %s6314_s11 = sshll.u32 %s6391_s20, 4  ;;  %s6315_s11 = int_to_ptr.vmem [resolvable:$false] %s6314_s11 }
  0x83   : > { %2286 = vst [vmem:[#allocation3 + $0x8] sm:$0xff] %v6389_v0  ;;  %2287 = vst [vmem:[#allocation3 + $0x10] sm:$0xff] %v6389_v0  ;;  %v6081_v50 = vld [vmem:[#allocation7 + $0x150] sm:$0xff]   ;;  %v6734_v52 = vld [vmem:[%s6612_s21 + $0x58] sm:$0xff]  ;;  %s6316_s22 = scalar_lea.vmem %s6315_s11, 8192  ;;  %p6317_p7 = scmp.lt.s32.totalorder %s8044_s29, %s6315_s11 }
  0x84   : > { %2288 = vst [vmem:[#allocation3 + $0x18] sm:$0xff] %v6389_v0  ;;  %2290 = vst [vmem:[#allocation3 + $0x220] sm:$0xff] %v6389_v0  ;;  %4560 = vmatpush3.bf16.msra.mxu0 %v6069_v23  ;;  %v6731_v51 = vld [vmem:[%s6612_s21 + $0x50] sm:$0xff]  ;;  %v6737_v53 = vld [vmem:[%s6612_s21 + $0x60] sm:$0xff]  ;;  %p6318_p9 = scmp.lt.s32.totalorder %s6316_s22, %s6310_s9 }
  0x85   : > { %2291 = vst [vmem:[#allocation3 + $0x228] sm:$0xff] %v6389_v0  ;;  %2292 = vst [vmem:[#allocation3 + $0x230] sm:$0xff] %v6389_v0  ;;  %4696 = vmatpush3.bf16.msra.mxu1 %v6070_v24  ;;  %4561 = vmatprep.subr.bf16.mxu0 %v6071_v25  ;;  %v6742_v57 = vld [vmem:[%s6612_s21 + $0x68] sm:$0xff]  ;;  %v6749_v62 = vld [vmem:[%s6612_s21 + $0x70] sm:$0xff]  ;;  %v6810_v24 = vpack.c.bf16 %v6726_v49, %v6723_v48 }
  0x86   : > { %2293 = vst [vmem:[#allocation3 + $0x238] sm:$0xff] %v6389_v0  ;;  %2295 = vst [vmem:[#allocation3 + $0x27] sm:$0x1] %v6389_v0  ;;  %4697 = vmatprep.subr.bf16.mxu1 %v6072_v26  ;;  %v6754_v1 = vld [vmem:[%s6612_s21 + $0x78] sm:$0xff]  ;;  %v6083_v4 = vld [vmem:[#allocation7 + $0x80] sm:$0xff]   ;;  %p6319_p12 = por %p6318_p9, %p6317_p7 }
  0x87   : > { %2296 = vst [vmem:[#allocation3 + $0x47] sm:$0x1] %v6389_v0  ;;  %2297 = vst [vmem:[#allocation3 + $0x67] sm:$0x1] %v6389_v0  ;;  %v6761_v5 = vld [vmem:[%s6612_s21 + $0x80] sm:$0xff]  ;;  %v6764_v6 = vld [vmem:[%s6612_s21 + $0x88] sm:$0xff] }
  0x88   : > { %2298 = vst [vmem:[#allocation3 + $0x87] sm:$0x1] %v6389_v0  ;;  %2299 = vst [vmem:[#allocation3 + $0xa7] sm:$0x1] %v6389_v0  ;;  %4562 = vmatpush3.bf16.msra.mxu0 %v6073_v27  ;;  %v6084_v9 = vld [vmem:[#allocation7 + $0x160] sm:$0xff]   ;;  %v6773_v10 = vld [vmem:[%s6612_s21 + $0x90] sm:$0xff]  ;;  %p6320_p2 = pnand %p6319_p12, %p6313_p3 }
  0x89   : > { %2300 = vst [vmem:[#allocation3 + $0xc7] sm:$0x1] %v6389_v0  ;;  %2301 = vst [vmem:[#allocation3 + $0xe7] sm:$0x1] %v6389_v0  ;;  %4698 = vmatpush3.bf16.msra.mxu1 %v6074_v28  ;;  %4563 = vmatprep.subr.bf16.mxu0 %v6075_v29  ;;  %v6776_v11 = vld [vmem:[%s6612_s21 + $0x98] sm:$0xff]  ;;  %v6085_v12 = vld [vmem:[#allocation7 + $0x88] sm:$0xff]  }
  0x8a   : > { %2302 = vst [vmem:[#allocation3 + $0x107] sm:$0x1] %v6389_v0  ;;  %2303 = vst [vmem:[#allocation3 + $0x127] sm:$0x1] %v6389_v0  ;;  %4699 = vmatprep.subr.bf16.mxu1 %v6076_v30  ;;  %v6781_v13 = vld [vmem:[%s6612_s21 + $0xa0] sm:$0xff]  ;;  %v6785_v14 = vld [vmem:[%s6612_s21 + $0xa8] sm:$0xff] }
  0x8b   : > { %2304 = vst [vmem:[#allocation3 + $0x147] sm:$0x1] %v6389_v0  ;;  %2305 = vst [vmem:[#allocation3 + $0x167] sm:$0x1] %v6389_v0  ;;  %v6086_v15 = vld [vmem:[#allocation7 + $0x168] sm:$0xff]   ;;  %v6792_v16 = vld [vmem:[%s6612_s21 + $0xb0] sm:$0xff] }
  0x8c   : > { %2306 = vst [vmem:[#allocation3 + $0x187] sm:$0x1] %v6389_v0  ;;  %2307 = vst [vmem:[#allocation3 + $0x1a7] sm:$0x1] %v6389_v0  ;;  %4564 = vmatpush3.bf16.msra.mxu0 %v6077_v31  ;;  %v6795_v17 = vld [vmem:[%s6612_s21 + $0xb8] sm:$0xff]  ;;  %v6087_v20 = vld [vmem:[#allocation7 + $0x90] sm:$0xff]  }
  0x8d   : > { %2308 = vst [vmem:[#allocation3 + $0x1c7] sm:$0x1] %v6389_v0  ;;  %2309 = vst [vmem:[#allocation3 + $0x1e7] sm:$0x1] %v6389_v0  ;;  %4700 = vmatpush3.bf16.msra.mxu1 %v6078_v32  ;;  %5365 = vmatprep.subr.bf16.mxu0 %v6079_v36  ;;  %v6800_v21 = vld [vmem:[%s6612_s21 + $0xc0] sm:$0xff]  ;;  %v6803_v22 = vld [vmem:[%s6612_s21 + $0xc8] sm:$0xff] }
  0x8e   : > { %2310 = vst [vmem:[#allocation3 + $0x207] sm:$0x1] %v6389_v0  ;;  %2313 = vst [vmem:[#allocation3 + $0x38] sm:$0x1] %v6389_v0  ;;  %5413 = vmatprep.subr.bf16.mxu1 %v6083_v4  ;;  %v6088_v25 = vld [vmem:[#allocation7 + $0x170] sm:$0xff]   ;;  %v6817_v27 = vld [vmem:[%s6612_s21 + $0xd8] sm:$0xff] }
  0x8f   : > { %2314 = vst [vmem:[#allocation3 + $0x58] sm:$0x1] %v6389_v0  ;;  %2315 = vst [vmem:[#allocation3 + $0x78] sm:$0x1] %v6389_v0  ;;  %819 = vmatmul.mubr.bf16.vlgmr.msra.gmra.mrb[0].mxu0 %v6390_v44  ;;  %v6814_v26 = vld [vmem:[%s6612_s21 + $0xd0] sm:$0xff]  ;;  %v6089_v28 = vld [vmem:[#allocation7 + $0x98] sm:$0xff]  }
  0x90   : > { %2316 = vst [vmem:[#allocation3 + $0x98] sm:$0x1] %v6389_v0  ;;  %2317 = vst [vmem:[#allocation3 + $0xb8] sm:$0x1] %v6389_v0  ;;  %5366 = vmatpush3.bf16.msra.mxu0 %v6079_v36  ;;  %826 = vmatprep.mubr.bf16.mxu0 %v6714_v41  ;;  %v6824_v29 = vld [vmem:[%s6612_s21 + $0xe0] sm:$0xff]  ;;  %v6827_v30 = vld [vmem:[%s6612_s21 + $0xe8] sm:$0xff]  ;;  %v6837_v36 = vpack.c.bf16 %v6734_v52, %v6731_v51 }
  0x91   : > { %2318 = vst [vmem:[#allocation3 + $0xd8] sm:$0x1] %v6389_v0  ;;  %2319 = vst [vmem:[#allocation3 + $0xf8] sm:$0x1] %v6389_v0  ;;  %5367 = vmatprep.subr.bf16.mxu0 %v6080_v45 }
  0x92   : > { %2320 = vst [vmem:[#allocation3 + $0x118] sm:$0x1] %v6389_v0  ;;  %2321 = vst [vmem:[#allocation3 + $0x138] sm:$0x1] %v6389_v0 }
  0x93   : > { %2322 = vst [vmem:[#allocation3 + $0x158] sm:$0x1] %v6389_v0  ;;  %2323 = vst [vmem:[#allocation3 + $0x178] sm:$0x1] %v6389_v0 }
  0x94   : > { %2324 = vst [vmem:[#allocation3 + $0x198] sm:$0x1] %v6389_v0  ;;  %2325 = vst [vmem:[#allocation3 + $0x1b8] sm:$0x1] %v6389_v0  ;;  %5368 = vmatpush3.bf16.msra.mxu0 %v6080_v45  ;;  %v6095_v45 = vld [vmem:[#allocation7 + $0x1c0] sm:$0xff]  }
  0x95   : > { %2326 = vst [vmem:[#allocation3 + $0x1d8] sm:$0x1] %v6389_v0  ;;  %2327 = vst [vmem:[#allocation3 + $0x1f8] sm:$0x1] %v6389_v0  ;;  %5369 = vmatprep.subr.bf16.mxu0 %v6081_v50 }
  0x96   : > { %2328 = vst [vmem:[#allocation3 + $0x218] sm:$0x1] %v6389_v0  ;;  %368 = vst [vmem:[#allocation2 + $0x7] sm:$0x1] %v6389_v0 }
  0x97   : > { %385 = vst [vmem:[#allocation2 + $0x227] sm:$0x1] %v6389_v0  ;;  %386 = vst [vmem:[#allocation2 + $0x18] sm:$0x1] %v6389_v0  ;;  %827 = vmatmul.mubr.bf16.gmra.mrb[4].mxu0 %v576_v35 }
  0x98   : > { %403 = vst [vmem:[#allocation2 + $0x238] sm:$0x1] %v6389_v0  ;;  %2294 = vst [vmem:[#allocation3 + $0x7] sm:$0x1] %v6389_v0  ;;  %834 = vmatprep.mubr.bf16.mxu0 %v6745_v59  ;;  %5370 = vmatpush3.bf16.msra.mxu0 %v6081_v50 }
  0x99   : > { %2311 = vst [vmem:[#allocation3 + $0x227] sm:$0x1] %v6389_v0  ;;  %2312 = vst [vmem:[#allocation3 + $0x18] sm:$0x1] %v6389_v0 }
  0x9a   : > { %2329 = vst [vmem:[#allocation3 + $0x238] sm:$0x1] %v6389_v0  ;;  %405 = vst [vmem:[#allocation2 + $0x28] sm:$0xff] %v327_v33  ;;  %v6082_v0 = vld [vmem:[#allocation7 + $0x158] sm:$0xff]  }
  0x9b   : > { %406 = vst [vmem:[#allocation2 + $0x30] sm:$0xff] %v328_v34  ;;  %407 = vst [vmem:[#allocation2 + $0x48] sm:$0xff] %v329_v37  ;;  %5371 = vmatprep.subr.bf16.mxu0 %v6082_v0  ;;  %v6090_v33 = vld [vmem:[#allocation7 + $0x178] sm:$0xff]   ;;  %v6091_v34 = vld [vmem:[#allocation7 + $0xa0] sm:$0xff]  }
  0x9c   : > { %408 = vst [vmem:[#allocation2 + $0x50] sm:$0xff] %v330_v38  ;;  %409 = vst [vmem:[#allocation2 + $0x68] sm:$0xff] %v331_v42  ;;  %5372 = vmatpush3.bf16.msra.mxu0 %v6082_v0  ;;  %v6840_v37 = vld [vmem:[%s6612_s21 + $0xf0] sm:$0xff]  ;;  %v6843_v38 = vld [vmem:[%s6612_s21 + $0xf8] sm:$0xff] }
  0x9d   : > { %v437_v39 = vld [vmem:[#allocation2 + $0x7] sm:$0xff]  ;;  %410 = vst [vmem:[#allocation2 + $0x70] sm:$0xff] %v332_v43  ;;  %411 = vst [vmem:[#allocation2 + $0x88] sm:$0xff] %v333_v46  ;;  %5373 = vmatprep.subr.bf16.mxu0 %v6084_v9  ;;  %v6093_v42 = vld [vmem:[#allocation7 + $0xb0] sm:$0xff]  }
  0x9e   : > { %412 = vst [vmem:[#allocation2 + $0x90] sm:$0xff] %v334_v47  ;;  %413 = vst [vmem:[#allocation2 + $0xa8] sm:$0xff] %v6723_v48  ;;  %v473_v56 = vpack.c.bf16 %v438_v40, %v437_v39  ;;  %v6092_v39 = vld [vmem:[#allocation7 + $0xa8] sm:$0xff]   ;;  %v6855_v47 = vpack.c.bf16 %v6742_v57, %v6737_v53  ;;  %v6094_v48 = vld [vmem:[#allocation7 + $0xb8] sm:$0xff]  }
  0x9f   : > { %414 = vst [vmem:[#allocation2 + $0xb0] sm:$0xff] %v6726_v49  ;;  %415 = vst [vmem:[#allocation2 + $0xc8] sm:$0xff] %v6731_v51  ;;  %835 = vmatmul.mubr.bf16.gmra.mrb[8].mxu0 %v6714_v41  ;;  %v6861_v51 = vld [vmem:[#allocation7 + $0x200] sm:$0xff]  }
  0xa0   : > { %416 = vst [vmem:[#allocation2 + $0xd0] sm:$0xff] %v6734_v52  ;;  %417 = vst [vmem:[#allocation2 + $0xe8] sm:$0xff] %v6737_v53  ;;  %842 = vmatprep.mubr.bf16.mxu0 %v6770_v8  ;;  %5374 = vmatpush3.bf16.msra.mxu0 %v6084_v9  ;;  %v6867_v53 = vpack.c.bf16 %v6754_v1, %v6749_v62  ;;  %v6908_v9 = vpack.c.bf16 %v6795_v17, %v6792_v16 }
  0xa1   : > { %v439_v54 = vld [vmem:[#allocation2 + $0x27] sm:$0xff]  ;;  %418 = vst [vmem:[#allocation2 + $0xf0] sm:$0xff] %v6742_v57  ;;  %419 = vst [vmem:[#allocation2 + $0x108] sm:$0xff] %v6749_v62  ;;  %5375 = vmatprep.subr.bf16.mxu0 %v6086_v15  ;;  %v6878_v57 = vpack.c.bf16 %v6764_v6, %v6761_v5  ;;  %v6888_v62 = vpack.c.bf16 %v6776_v11, %v6773_v10 }
  0xa2   : > { %v440_v55 = vld [vmem:[#allocation2 + $0x2f] sm:$0xff]  ;;  %v441_v60 = vld [vmem:[#allocation2 + $0x47] sm:$0xff]  ;;  %420 = vst [vmem:[#allocation2 + $0x110] sm:$0xff] %v6754_v1  ;;  %421 = vst [vmem:[#allocation2 + $0x128] sm:$0xff] %v6761_v5 }
  0xa3   : > { %v474_v58 = vpack.c.bf16 %v440_v55, %v439_v54  ;;  %v442_v61 = vld [vmem:[#allocation2 + $0x4f] sm:$0xff]  ;;  %v443_v2 = vld [vmem:[#allocation2 + $0x67] sm:$0xff]  ;;  %422 = vst [vmem:[#allocation2 + $0x130] sm:$0xff] %v6764_v6  ;;  %423 = vst [vmem:[#allocation2 + $0x148] sm:$0xff] %v6773_v10 }
  0xa4   : > { %v6751_v63 = vpack.c.bf16 %v442_v61, %v441_v60  ;;  %v444_v3 = vld [vmem:[#allocation2 + $0x6f] sm:$0xff]  ;;  %424 = vst [vmem:[#allocation2 + $0x150] sm:$0xff] %v6776_v11  ;;  %425 = vst [vmem:[#allocation2 + $0x168] sm:$0xff] %v6781_v13  ;;  %v445_v18 = vld [vmem:[#allocation2 + $0x87] sm:$0xff]  ;;  %5376 = vmatpush3.bf16.msra.mxu0 %v6086_v15 }
  0xa5   : > { %1284 = vmatprep.mubr.bf16.mxu1 %v474_v58  ;;  %v6768_v7 = vpack.c.bf16 %v444_v3, %v443_v2  ;;  %426 = vst [vmem:[#allocation2 + $0x170] sm:$0xff] %v6785_v14  ;;  %v446_v19 = vld [vmem:[#allocation2 + $0x8f] sm:$0xff]  ;;  %427 = vst [vmem:[#allocation2 + $0x188] sm:$0xff] %v6792_v16  ;;  %5377 = vmatprep.subr.bf16.mxu0 %v6088_v25  ;;  %v447_v31 = vld [vmem:[#allocation2 + $0xa7] sm:$0xff]  ;;  %v6898_v3 = vpack.c.bf16 %v6785_v14, %v6781_v13 }
  0xa6   : > { %1285 = vmatmul.mubr.bf16.vlgmr.msra.gmra.mrb[0].mxu1 %v473_v56  ;;  %428 = vst [vmem:[#allocation2 + $0x190] sm:$0xff] %v6795_v17  ;;  %429 = vst [vmem:[#allocation2 + $0x1a8] sm:$0xff] %v6800_v21  ;;  %v6806_v23 = vpack.c.bf16 %v446_v19, %v445_v18  ;;  %v448_v32 = vld [vmem:[#allocation2 + $0xaf] sm:$0xff]  ;;  %v449_v40 = vld [vmem:[#allocation2 + $0xc7] sm:$0xff]  ;;  %v6918_v13 = vpack.c.bf16 %v6803_v22, %v6800_v21  ;;  %v6928_v17 = vpack.c.bf16 %v6817_v27, %v6814_v26 }
  0xa7   : > { %1292 = vmatprep.mubr.bf16.mxu1 %v6751_v63  ;;  %5414 = vmatpush3.bf16.msra.mxu1 %v6083_v4  ;;  %430 = vst [vmem:[#allocation2 + $0x1b0] sm:$0xff] %v6803_v22  ;;  %431 = vst [vmem:[#allocation2 + $0x1c8] sm:$0xff] %v6814_v26  ;;  %v6833_v35 = vpack.c.bf16 %v448_v32, %v447_v31  ;;  %v450_v43 = vld [vmem:[#allocation2 + $0xcf] sm:$0xff]  ;;  %v451_v49 = vld [vmem:[#allocation2 + $0xe7] sm:$0xff]  ;;  %v6938_v21 = vpack.c.bf16 %v6827_v30, %v6824_v29 }
  0xa8   : > { %5415 = vmatprep.subr.bf16.mxu1 %v6085_v12  ;;  %432 = vst [vmem:[#allocation2 + $0x1d0] sm:$0xff] %v6817_v27  ;;  %843 = vmatmul.mubr.bf16.gmra.mrb[12].mxu0 %v6745_v59  ;;  %433 = vst [vmem:[#allocation2 + $0x1e8] sm:$0xff] %v6824_v29  ;;  %v6851_v46 = vpack.c.bf16 %v450_v43, %v449_v40  ;;  %v452_v50 = vld [vmem:[#allocation2 + $0xef] sm:$0xff]  ;;  %v453_v54 = vld [vmem:[#allocation2 + $0x107] sm:$0xff]  ;;  %v6948_v27 = vpack.c.bf16 %v6843_v38, %v6840_v37 }
  0xa9   : > { %850 = vmatprep.mubr.bf16.mxu0 %v6810_v24  ;;  %434 = vst [vmem:[#allocation2 + $0x1f0] sm:$0xff] %v6827_v30  ;;  %5378 = vmatpush3.bf16.msra.mxu0 %v6088_v25  ;;  %435 = vst [vmem:[#allocation2 + $0x208] sm:$0xff] %v6840_v37  ;;  %v6863_v52 = vpack.c.bf16 %v452_v50, %v451_v49  ;;  %v454_v55 = vld [vmem:[#allocation2 + $0x10f] sm:$0xff]  ;;  %v6096_v31 = vld [vmem:[#allocation7 + $0x180] sm:$0xff]  }
  0xaa   : > { %5379 = vmatprep.subr.bf16.mxu0 %v6090_v33  ;;  %436 = vst [vmem:[#allocation2 + $0x210] sm:$0xff] %v6843_v38  ;;  %v6874_v56 = vpack.c.bf16 %v454_v55, %v453_v54  ;;  %v456_v60 = vld [vmem:[#allocation2 + $0x12f] sm:$0xff]  ;;  %v457_v0 = vld [vmem:[#allocation2 + $0x147] sm:$0xff]  ;;  %v6101_v38 = vld [vmem:[#allocation7 + $0x1d8] sm:$0xff]  }
  0xab   : > { %5416 = vmatpush3.bf16.msra.mxu1 %v6085_v12  ;;  %v458_v1 = vld [vmem:[#allocation2 + $0x14f] sm:$0xff]  ;;  %v459_v4 = vld [vmem:[#allocation2 + $0x167] sm:$0xff] }
  0xac   : > { %5417 = vmatprep.subr.bf16.mxu1 %v6087_v20  ;;  %v6894_v2 = vpack.c.bf16 %v458_v1, %v457_v0  ;;  %v460_v5 = vld [vmem:[#allocation2 + $0x16f] sm:$0xff]  ;;  %v461_v10 = vld [vmem:[#allocation2 + $0x187] sm:$0xff] }
  0xad   : > { %5380 = vmatpush3.bf16.msra.mxu0 %v6090_v33  ;;  %v6904_v6 = vpack.c.bf16 %v460_v5, %v459_v4  ;;  %v462_v11 = vld [vmem:[#allocation2 + $0x18f] sm:$0xff]  ;;  %v463_v14 = vld [vmem:[#allocation2 + $0x1a7] sm:$0xff] }
  0xae   : > { %1293 = vmatmul.mubr.bf16.gmra.mrb[4].mxu1 %v474_v58  ;;  %4821 = vmatprep.subr.bf16.mxu0 %v6095_v45  ;;  %v455_v58 = vld [vmem:[#allocation2 + $0x127] sm:$0xff]  ;;  %v6914_v12 = vpack.c.bf16 %v462_v11, %v461_v10  ;;  %v464_v15 = vld [vmem:[#allocation2 + $0x1af] sm:$0xff]  ;;  %v6117_v45 = vld [vmem:[#allocation7 + $0x1b8] sm:$0xff]  }
  0xaf   : > { %1300 = vmatprep.mubr.bf16.mxu1 %v6768_v7  ;;  %5418 = vmatpush3.bf16.msra.mxu1 %v6087_v20  ;;  %v6884_v61 = vpack.c.bf16 %v456_v60, %v455_v58  ;;  %v6924_v16 = vpack.c.bf16 %v464_v15, %v463_v14  ;;  %v465_v18 = vld [vmem:[#allocation2 + $0x1c7] sm:$0xff]  ;;  %v466_v19 = vld [vmem:[#allocation2 + $0x1cf] sm:$0xff] }
  0xb0   : > { %5419 = vmatprep.subr.bf16.mxu1 %v6089_v28  ;;  %851 = vmatmul.mubr.bf16.gmra.mrb[16].mxu0 %v6770_v8  ;;  %v6934_v20 = vpack.c.bf16 %v466_v19, %v465_v18  ;;  %v467_v22 = vld [vmem:[#allocation2 + $0x1e7] sm:$0xff]  ;;  %v468_v25 = vld [vmem:[#allocation2 + $0x1ef] sm:$0xff] }
  0xb1   : > { %858 = vmatprep.mubr.bf16.mxu0 %v6837_v36  ;;  %v6944_v26 = vpack.c.bf16 %v468_v25, %v467_v22  ;;  %v470_v29 = vld [vmem:[#allocation2 + $0x20f] sm:$0xff] }
  0xb2   : > { %v6097_v32 = vld [vmem:[#allocation7 + $0x1c8] sm:$0xff]   ;;  %v6100_v37 = vld [vmem:[#allocation7 + $0x190] sm:$0xff]  }
  0xb3   : > { %5420 = vmatpush3.bf16.msra.mxu1 %v6089_v28  ;;  %v469_v28 = vld [vmem:[#allocation2 + $0x207] sm:$0xff]  ;;  %v1577_v49 = vld [vmem:[#allocation2 + $0x31] sm:$0xff] }
  0xb4   : > { %5421 = vmatprep.subr.bf16.mxu1 %v6091_v34  ;;  %v6954_v30 = vpack.c.bf16 %v470_v29, %v469_v28  ;;  %v6098_v33 = vld [vmem:[#allocation7 + $0x188] sm:$0xff]   ;;  %v1575_v54 = vld [vmem:[#allocation2 + $0x11] sm:$0xff] }
  0xb5   : > { %v6107_v40 = vld [vmem:[#allocation7 + $0x1e8] sm:$0xff]   ;;  %v1585_v4 = vld [vmem:[#allocation2 + $0xb1] sm:$0xff] }
  0xb6   : > { %1301 = vmatmul.mubr.bf16.gmra.mrb[8].mxu1 %v6751_v63  ;;  %v6114_v43 = vld [vmem:[#allocation7 + $0x228] sm:$0xff]   ;;  %v1591_v14 = vld [vmem:[#allocation2 + $0x111] sm:$0xff] }
  0xb7   : > { %1308 = vmatprep.mubr.bf16.mxu1 %v6806_v23  ;;  %5422 = vmatpush3.bf16.msra.mxu1 %v6091_v34  ;;  %v6099_v34 = vld [vmem:[#allocation7 + $0x1d0] sm:$0xff]  }
  0xb8   : > { %5423 = vmatprep.subr.bf16.mxu1 %v6092_v39  ;;  %859 = vmatmul.mubr.bf16.gmra.mrb[20].mxu0 %v6810_v24  ;;  %v1578_v55 = vld [vmem:[#allocation2 + $0x49] sm:$0xff]  ;;  %v1595_v28 = vld [vmem:[#allocation2 + $0x151] sm:$0xff] }
  0xb9   : > { %866 = vmatprep.mubr.bf16.mxu0 %v6855_v47  ;;  %v1582_v0 = vld [vmem:[#allocation2 + $0x89] sm:$0xff] }
  0xba   : > { %v1586_v5 = vld [vmem:[#allocation2 + $0xc9] sm:$0xff] }
  0xbb   : > { %5424 = vmatpush3.bf16.msra.mxu1 %v6092_v39  ;;  %v6106_v39 = vld [vmem:[#allocation7 + $0x208] sm:$0xff]  }
  0xbc   : > { %5425 = vmatprep.subr.bf16.mxu1 %v6093_v42  ;;  %v1588_v11 = vld [vmem:[#allocation2 + $0xe9] sm:$0xff] }
  0xbd   : > { %v1592_v25 = vld [vmem:[#allocation2 + $0x129] sm:$0xff] }
  0xbe   : > { %1309 = vmatmul.mubr.bf16.gmra.mrb[12].mxu1 %v6768_v7 }
  0xbf   : > { %1316 = vmatprep.mubr.bf16.mxu1 %v6833_v35  ;;  %5426 = vmatpush3.bf16.msra.mxu1 %v6093_v42  ;;  %v6113_v42 = vld [vmem:[#allocation7 + $0x1b0] sm:$0xff]  }
  0xc0   : > { %5427 = vmatprep.subr.bf16.mxu1 %v6094_v48  ;;  %867 = vmatmul.mubr.bf16.gmra.mrb[24].mxu0 %v6837_v36 }
  0xc1   : > { %874 = vmatprep.mubr.bf16.mxu0 %v6867_v53 }
  0xc3   : > { %5428 = vmatpush3.bf16.msra.mxu1 %v6094_v48  ;;  %v1576_v48 = vld [vmem:[#allocation2 + $0x29] sm:$0xff] }
  0xc4   : > { %5461 = vmatprep.subr.bf16.mxu1 %v6861_v51  ;;  %v1611_v50 = vpack.c.bf16 %v1577_v49, %v1576_v48 }
  0xc6   : > { %1317 = vmatmul.mubr.bf16.gmra.mrb[16].mxu1 %v6806_v23 }
  0xc7   : > { %1324 = vmatprep.mubr.bf16.mxu1 %v6851_v46 }
  0xc8   : > { %875 = vmatmul.mubr.bf16.gmra.mrb[28].mxu0 %v6855_v47 }
  0xc9   : > { %882 = vmatprep.mubr.bf16.mxu0 %v6878_v57 }
  0xce   : > { %1325 = vmatmul.mubr.bf16.gmra.mrb[20].mxu1 %v6833_v35 }
  0xcf   : > { %1332 = vmatprep.mubr.bf16.mxu1 %v6863_v52 }
  0xd0   : > { %883 = vmatmul.mubr.bf16.gmra.mrb[32].mxu0 %v6867_v53 }
  0xd1   : > { %890 = vmatprep.mubr.bf16.mxu0 %v6888_v62 }
  0xd6   : > { %1333 = vmatmul.mubr.bf16.gmra.mrb[24].mxu1 %v6851_v46 }
  0xd7   : > { %1340 = vmatprep.mubr.bf16.mxu1 %v6874_v56 }
  0xd8   : > { %891 = vmatmul.mubr.bf16.gmra.mrb[36].mxu0 %v6878_v57 }
  0xd9   : > { %898 = vmatprep.mubr.bf16.mxu0 %v6898_v3 }
  0xde   : > { %1341 = vmatmul.mubr.bf16.gmra.mrb[28].mxu1 %v6863_v52 }
  0xdf   : > { %1348 = vmatprep.mubr.bf16.mxu1 %v6884_v61 }
  0xe0   : > { %899 = vmatmul.mubr.bf16.gmra.mrb[40].mxu0 %v6888_v62 }
  0xe1   : > { %906 = vmatprep.mubr.bf16.mxu0 %v6908_v9 }
  0xe6   : > { %1349 = vmatmul.mubr.bf16.gmra.mrb[32].mxu1 %v6874_v56 }
  0xe7   : > { %1356 = vmatprep.mubr.bf16.mxu1 %v6894_v2 }
  0xe8   : > { %907 = vmatmul.mubr.bf16.gmra.mrb[44].mxu0 %v6898_v3 }
  0xe9   : > { %914 = vmatprep.mubr.bf16.mxu0 %v6918_v13 }
  0xee   : > { %1357 = vmatmul.mubr.bf16.gmra.mrb[36].mxu1 %v6884_v61 }
  0xef   : > { %1364 = vmatprep.mubr.bf16.mxu1 %v6904_v6 }
  0xf0   : > { %915 = vmatmul.mubr.bf16.gmra.mrb[48].mxu0 %v6908_v9 }
  0xf1   : > { %922 = vmatprep.mubr.bf16.mxu0 %v6928_v17 }
  0xf6   : > { %1365 = vmatmul.mubr.bf16.gmra.mrb[40].mxu1 %v6894_v2 }
  0xf7   : > { %1372 = vmatprep.mubr.bf16.mxu1 %v6914_v12 }
  0xf8   : > { %923 = vmatmul.mubr.bf16.gmra.mrb[52].mxu0 %v6918_v13 }
  0xf9   : > { %930 = vmatprep.mubr.bf16.mxu0 %v6938_v21 }
  0xfe   : > { %1373 = vmatmul.mubr.bf16.gmra.mrb[44].mxu1 %v6904_v6 }
  0xff   : > { %1380 = vmatprep.mubr.bf16.mxu1 %v6924_v16 }
 0x100   : > { %931 = vmatmul.mubr.bf16.gmra.mrb[56].mxu0 %v6928_v17 }
 0x101   : > { %938 = vmatprep.mubr.bf16.mxu0 %v6948_v27 }
 0x106   : > { %1381 = vmatmul.mubr.bf16.gmra.mrb[48].mxu1 %v6914_v12 }
 0x107   : > { %1388 = vmatprep.mubr.bf16.mxu1 %v6934_v20 }
 0x108   : > { %939 = vmatmul.mubr.bf16.gmra.mrb[60].mxu0 %v6938_v21 }
 0x109   : > { %5381 = vmatprep.mubr.bf16.mxu0 %v6714_v41  ;;  %v6102_v41 = vld [vmem:[#allocation7 + $0x198] sm:$0xff]  }
 0x10e   : > { %1389 = vmatmul.mubr.bf16.gmra.mrb[52].mxu1 %v6924_v16 }
 0x10f   : > { %1396 = vmatprep.mubr.bf16.mxu1 %v6944_v26 }
 0x110   : > { %5382 = vmatmul.mubr.bf16.vlgmr.msra.gmra.mrb[64].mxu0 %v6745_v59  ;;  %v6103_v59 = vld [vmem:[#allocation7 + $0x1e0] sm:$0xff]  }
 0x111   : > { %4822 = vmatpush3.bf16.msra.mxu0 %v6096_v31  ;;  %5385 = vmatprep.mubr.bf16.mxu0 %v6770_v8  ;;  %v6105_v8 = vld [vmem:[#allocation7 + $0x1a0] sm:$0xff]  }
 0x112   : > { %4823 = vmatprep.subr.bf16.mxu0 %v6097_v32 }
 0x115   : > { %4824 = vmatpush3.bf16.msra.mxu0 %v6098_v33 }
 0x116   : > { %1397 = vmatmul.mubr.bf16.gmra.mrb[56].mxu1 %v6934_v20  ;;  %4825 = vmatprep.subr.bf16.mxu0 %v6099_v34 }
 0x117   : > { %1404 = vmatprep.mubr.bf16.mxu1 %v6954_v30 }
 0x118   : > { %5386 = vmatmul.mubr.bf16.gmra.mrb[68].mxu0 %v6810_v24  ;;  %v6111_v24 = vld [vmem:[#allocation7 + $0x1f0] sm:$0xff]  }
 0x119   : > { %5389 = vmatprep.mubr.bf16.mxu0 %v6837_v36  ;;  %4826 = vmatpush3.bf16.msra.mxu0 %v6100_v37  ;;  %v6112_v36 = vld [vmem:[#allocation7 + $0x220] sm:$0xff]  }
 0x11a   : > { %4827 = vmatprep.subr.bf16.mxu0 %v6101_v38 }
 0x11d   : > { %4828 = vmatpush3.bf16.msra.mxu0 %v6102_v41 }
 0x11e   : > { %1405 = vmatmul.mubr.bf16.gmra.mrb[60].mxu1 %v6944_v26  ;;  %4829 = vmatprep.subr.bf16.mxu0 %v6103_v59 }
 0x11f   : > { %5429 = vmatprep.mubr.bf16.mxu1 %v6751_v63  ;;  %v6108_v63 = vld [vmem:[#allocation7 + $0x210] sm:$0xff]  }
 0x120   : > { %5390 = vmatmul.mubr.bf16.gmra.mrb[72].mxu0 %v6855_v47  ;;  %v6118_v47 = vld [vmem:[#allocation7 + $0x238] sm:$0xff]  }
 0x121   : > { %5393 = vmatprep.mubr.bf16.mxu0 %v6867_v53  ;;  %4830 = vmatpush3.bf16.msra.mxu0 %v6105_v8  ;;  %v1574_v53 = vld [vmem:[#allocation2 + $0x9] sm:$0xff] }
 0x122   : > { %4831 = vmatprep.subr.bf16.mxu0 %v6107_v40  ;;  %v1610_v58 = vpack.c.bf16 %v1575_v54, %v1574_v53 }
 0x126   : > { %5430 = vmatmul.mubr.bf16.vlgmr.msra.gmra.mrb[64].mxu1 %v6768_v7  ;;  %v6110_v7 = vld [vmem:[#allocation7 + $0x218] sm:$0xff]  }
 0x127   : > { %5433 = vmatprep.mubr.bf16.mxu1 %v6806_v23  ;;  %5462 = vmatpush3.bf16.msra.mxu1 %v6861_v51  ;;  %v6109_v23 = vld [vmem:[#allocation7 + $0x1a8] sm:$0xff]  }
 0x128   : > { %5463 = vmatprep.subr.bf16.mxu1 %v6106_v39  ;;  %4832 = vmatpush3.bf16.msra.mxu0 %v6109_v23  ;;  %v471_v51 = vld [vmem:[#allocation2 + $0x227] sm:$0xff]  ;;  %v1597_v23 = vld [vmem:[#allocation2 + $0x171] sm:$0xff] }
 0x129   : > { %4833 = vmatprep.subr.bf16.mxu0 %v6111_v24  ;;  %5394 = vmatmul.mubr.bf16.gmra.mrb[76].mxu0 %v6878_v57  ;;  %v1598_v24 = vld [vmem:[#allocation2 + $0x189] sm:$0xff] }
 0x12a   : > { %5397 = vmatprep.mubr.bf16.mxu0 %v6888_v62  ;;  %v1581_v62 = vld [vmem:[#allocation2 + $0x71] sm:$0xff] }
 0x12b   : > { %5464 = vmatpush3.bf16.msra.mxu1 %v6106_v39 }
 0x12c   : > { %5465 = vmatprep.subr.bf16.mxu1 %v6108_v63  ;;  %4834 = vmatpush3.bf16.msra.mxu0 %v6113_v42 }
 0x12e   : > { %5434 = vmatmul.mubr.bf16.gmra.mrb[68].mxu1 %v6833_v35  ;;  %v6115_v35 = vld [vmem:[#allocation7 + $0x1f8] sm:$0xff]  }
 0x12f   : > { %5437 = vmatprep.mubr.bf16.mxu1 %v6851_v46  ;;  %5466 = vmatpush3.bf16.msra.mxu1 %v6108_v63  ;;  %v6116_v46 = vld [vmem:[#allocation7 + $0x230] sm:$0xff]  }
 0x130   : > { %5467 = vmatprep.subr.bf16.mxu1 %v6110_v7  ;;  %4835 = vmatprep.subr.bf16.mxu0 %v6115_v35 }
 0x131   : > { %4836 = vmatpush3.bf16.msra.mxu0 %v6117_v45 }
 0x132   : > { %5398 = vmatmul.mubr.bf16.gmra.mrb[80].mxu0 %v6898_v3  ;;  %v1584_v3 = vld [vmem:[#allocation2 + $0xa9] sm:$0xff] }
 0x133   : > { %5468 = vmatpush3.bf16.msra.mxu1 %v6110_v7  ;;  %5401 = vmatprep.mubr.bf16.mxu0 %v6908_v9  ;;  %v1615_v9 = vpack.c.bf16 %v1585_v4, %v1584_v3  ;;  %v1596_v7 = vld [vmem:[#allocation2 + $0x169] sm:$0xff] }
 0x134   : > { %5469 = vmatprep.subr.bf16.mxu1 %v6112_v36  ;;  %v7020_v35 = vpack.c.bf16 %v1597_v23, %v1596_v7  ;;  %v1608_v7 = vld [vmem:[#allocation2 + $0x229] sm:$0xff]  ;;  %v1609_v23 = vld [vmem:[#allocation2 + $0x231] sm:$0xff] }
 0x136   : > { %5438 = vmatmul.mubr.bf16.gmra.mrb[72].mxu1 %v6863_v52  ;;  %v472_v52 = vld [vmem:[#allocation2 + $0x22f] sm:$0xff] }
 0x137   : > { %5441 = vmatprep.mubr.bf16.mxu1 %v6874_v56  ;;  %5470 = vmatpush3.bf16.msra.mxu1 %v6112_v36  ;;  %v1579_v56 = vld [vmem:[#allocation2 + $0x51] sm:$0xff]  ;;  %v490_v57 = vpack.c.bf16 %v472_v52, %v471_v51 }
 0x138   : > { %5471 = vmatprep.subr.bf16.mxu1 %v6114_v43  ;;  %v1612_v60 = vpack.c.bf16 %v1579_v56, %v1578_v55  ;;  %v1599_v36 = vld [vmem:[#allocation2 + $0x191] sm:$0xff]  ;;  %v1600_v56 = vld [vmem:[#allocation2 + $0x1a9] sm:$0xff] }
 0x139   : > { %v7022_v48 = vpack.c.bf16 %v1599_v36, %v1598_v24 }
 0x13a   : > { %5402 = vmatmul.mubr.bf16.gmra.mrb[84].mxu0 %v6918_v13  ;;  %v1590_v13 = vld [vmem:[#allocation2 + $0x109] sm:$0xff] }
 0x13b   : > { %5472 = vmatpush3.bf16.msra.mxu1 %v6114_v43  ;;  %5405 = vmatprep.mubr.bf16.mxu0 %v6928_v17  ;;  %v6997_v19 = vpack.c.bf16 %v1591_v14, %v1590_v13  ;;  %v1604_v14 = vld [vmem:[#allocation2 + $0x1e9] sm:$0xff] }
 0x13c   : > { %5473 = vmatprep.subr.bf16.mxu1 %v6116_v46 }
 0x13e   : > { %5442 = vmatmul.mubr.bf16.gmra.mrb[76].mxu1 %v6884_v61  ;;  %v1580_v61 = vld [vmem:[#allocation2 + $0x69] sm:$0xff] }
 0x13f   : > { %5445 = vmatprep.mubr.bf16.mxu1 %v6894_v2  ;;  %5474 = vmatpush3.bf16.msra.mxu1 %v6116_v46  ;;  %v1613_v1 = vpack.c.bf16 %v1581_v62, %v1580_v61 }
 0x140   : > { %5475 = vmatprep.subr.bf16.mxu1 %v6118_v47 }
 0x142   : > { %5406 = vmatmul.mubr.bf16.gmra.mrb[88].mxu0 %v6938_v21 }
 0x143   : > { %5476 = vmatpush3.bf16.msra.mxu1 %v6118_v47  ;;  %5409 = vmatprep.mubr.bf16.mxu0 %v6948_v27  ;;  %v1594_v27 = vld [vmem:[#allocation2 + $0x149] sm:$0xff] }
 0x144   : > { %v7007_v37 = vpack.c.bf16 %v1595_v28, %v1594_v27 }
 0x146   : > { %5446 = vmatmul.mubr.bf16.gmra.mrb[80].mxu1 %v6904_v6  ;;  %v1587_v6 = vld [vmem:[#allocation2 + $0xd1] sm:$0xff] }
 0x147   : > { %5449 = vmatprep.mubr.bf16.mxu1 %v6914_v12  ;;  %v6992_v10 = vpack.c.bf16 %v1587_v6, %v1586_v5  ;;  %v1589_v12 = vld [vmem:[#allocation2 + $0xf1] sm:$0xff] }
 0x14a   : > { %5410 = vmatmul.mubr.bf16.gmra.mrb[92].mxu0 %v6390_v44  ;;  %v1583_v44 = vld [vmem:[#allocation2 + $0x91] sm:$0xff] }
 0x14b   : > { %1853 = vmatprep.mubr.bf16.mxu0 %v1611_v50  ;;  %v1614_v2 = vpack.c.bf16 %v1583_v44, %v1582_v0 }
 0x14e   : > { %5450 = vmatmul.mubr.bf16.gmra.mrb[84].mxu1 %v6924_v16  ;;  %v6995_v16 = vpack.c.bf16 %v1589_v12, %v1588_v11 }
 0x14f   : > { %5453 = vmatprep.mubr.bf16.mxu1 %v6934_v20 }
 0x152   : > { %1854 = vmatmul.mubr.bf16.vlgmr.msra.gmra.mrb[96].mxu0 %v1610_v58  ;;  %v1602_v58 = vld [vmem:[#allocation2 + $0x1c9] sm:$0xff] }
 0x153   : > { %1861 = vmatprep.mubr.bf16.mxu0 %v1612_v60 }
 0x156   : > { %5454 = vmatmul.mubr.bf16.gmra.mrb[88].mxu1 %v6944_v26  ;;  %v1593_v26 = vld [vmem:[#allocation2 + $0x131] sm:$0xff] }
 0x157   : > { %5457 = vmatprep.mubr.bf16.mxu1 %v6954_v30  ;;  %v7005_v31 = vpack.c.bf16 %v1593_v26, %v1592_v25 }
 0x15a   : > { %1862 = vmatmul.mubr.bf16.gmra.mrb[100].mxu0 %v1611_v50 }
 0x15b   : > { %1869 = vmatprep.mubr.bf16.mxu0 %v1613_v1 }
 0x15e   : > { %5458 = vmatmul.mubr.bf16.gmra.mrb[92].mxu1 %v490_v57  ;;  %v1601_v57 = vld [vmem:[#allocation2 + $0x1b1] sm:$0xff] }
 0x15f   : > { %5477 = vmatprep.mubr.bf16.mxu1 %v1612_v60  ;;  %v7035_v0 = vpack.c.bf16 %v1601_v57, %v1600_v56 }
 0x162   : > { %1870 = vmatmul.mubr.bf16.gmra.mrb[104].mxu0 %v1612_v60  ;;  %v4565_v15 = vpop.f32.mrb[0].mxu0  ;;  %v1603_v60 = vld [vmem:[#allocation2 + $0x1d1] sm:$0xff] }
 0x163   : > { %1877 = vmatprep.mubr.bf16.mxu0 %v1614_v2  ;;  %v4566_v17 = vpop.f32.mrb[1].mxu0  ;;  %v7037_v3 = vpack.c.bf16 %v1603_v60, %v1602_v58 }
 0x164   : > { %v4568_v18 = vpop.f32.mrb[2].mxu0  ;;  %v6999_v20 = vadd.f32 %v4566_v17, %v4565_v15  ;;  %v1605_v15 = vld [vmem:[#allocation2 + $0x1f1] sm:$0xff]  ;;  %v1606_v17 = vld [vmem:[#allocation2 + $0x209] sm:$0xff] }
 0x165   : > { %v4569_v21 = vpop.f32.mrb[3].mxu0  ;;  %v7051_v26 = vpack.c.bf16 %v1605_v15, %v1604_v14 }
 0x166   : > { %5478 = vmatmul.mubr.bf16.vlgmr.msra.gmra.mrb[64].mxu1 %v1613_v1  ;;  %v7001_v22 = vadd.f32 %v4569_v21, %v4568_v18  ;;  %v1607_v18 = vld [vmem:[#allocation2 + $0x211] sm:$0xff] }
 0x167   : > { %5481 = vmatprep.mubr.bf16.mxu1 %v1614_v2 }
 0x16a   : > { %1878 = vmatmul.mubr.bf16.gmra.mrb[108].mxu0 %v1613_v1  ;;  %v4571_v29 = vpop.f32.mrb[4].mxu0 }
 0x16b   : > { %1885 = vmatprep.mubr.bf16.mxu0 %v1615_v9  ;;  %v4572_v32 = vpop.f32.mrb[5].mxu0 }
 0x16c   : > { %v4574_v34 = vpop.f32.mrb[6].mxu0  ;;  %v7011_v41 = vadd.f32 %v4572_v32, %v4571_v29 }
 0x16d   : > { %v4575_v59 = vpop.f32.mrb[7].mxu0 }
 0x16e   : > { %5482 = vmatmul.mubr.bf16.gmra.mrb[68].mxu1 %v1615_v9  ;;  %v7015_v40 = vadd.f32 %v4575_v59, %v4574_v34 }
 0x16f   : > { %5485 = vmatprep.mubr.bf16.mxu1 %v6992_v10 }
 0x172   : > { %1886 = vmatmul.mubr.bf16.gmra.mrb[112].mxu0 %v1614_v2  ;;  %v4577_v42 = vpop.f32.mrb[8].mxu0 }
 0x173   : > { %1893 = vmatprep.mubr.bf16.mxu0 %v6992_v10  ;;  %v4578_v45 = vpop.f32.mrb[9].mxu0 }
 0x174   : > { %v4580_v47 = vpop.f32.mrb[10].mxu0  ;;  %v7026_v51 = vadd.f32 %v4578_v45, %v4577_v42  ;;  %v1627_v42 = vpack.c.bf16 %v1609_v23, %v1608_v7 }
 0x175   : > { %v4581_v52 = vpop.f32.mrb[11].mxu0 }
 0x176   : > { %5486 = vmatmul.mubr.bf16.gmra.mrb[72].mxu1 %v6995_v16  ;;  %v7030_v55 = vadd.f32 %v4581_v52, %v4580_v47 }
 0x177   : > { %5489 = vmatprep.mubr.bf16.mxu1 %v6997_v19 }
 0x179   : > { %v4701_v30 = vpop.f32.mrb[0].mxu1 }
 0x17a   : > { %v4702_v33 = vpop.f32.mrb[1].mxu1  ;;  %1894 = vmatmul.mubr.bf16.gmra.mrb[116].mxu0 %v1615_v9 }
 0x17b   : > { %v7009_v38 = vadd.f32 %v4702_v33, %v4701_v30  ;;  %v4704_v39 = vpop.f32.mrb[2].mxu1  ;;  %1901 = vmatprep.mubr.bf16.mxu0 %v6995_v16  ;;  %v4583_v61 = vpop.f32.mrb[12].mxu0  ;;  %v7053_v30 = vpack.c.bf16 %v1607_v18, %v1606_v17 }
 0x17c   : > { %v4705_v63 = vpop.f32.mrb[3].mxu1  ;;  %v4584_v44 = vpop.f32.mrb[13].mxu0 }
 0x17d   : > { %v7013_v8 = vadd.f32 %v4705_v63, %v4704_v39  ;;  %v4586_v2 = vpop.f32.mrb[14].mxu0  ;;  %v7041_v6 = vadd.f32 %v4584_v44, %v4583_v61 }
 0x17e   : > { %5490 = vmatmul.mubr.bf16.gmra.mrb[76].mxu1 %v7005_v31  ;;  %v4587_v9 = vpop.f32.mrb[15].mxu0 }
 0x17f   : > { %5493 = vmatprep.mubr.bf16.mxu1 %v7007_v37  ;;  %v7045_v13 = vadd.f32 %v4587_v9, %v4586_v2 }
 0x181   : > { %v4707_v43 = vpop.f32.mrb[4].mxu1 }
 0x182   : > { %v4708_v46 = vpop.f32.mrb[5].mxu1  ;;  %1902 = vmatmul.mubr.bf16.gmra.mrb[120].mxu0 %v6992_v10 }
 0x183   : > { %v7024_v49 = vadd.f32 %v4708_v46, %v4707_v43  ;;  %v4710_v50 = vpop.f32.mrb[6].mxu1  ;;  %1909 = vmatprep.mubr.bf16.mxu0 %v6997_v19  ;;  %v4589_v21 = vpop.f32.mrb[16].mxu0 }
 0x184   : > { %v4711_v53 = vpop.f32.mrb[7].mxu1  ;;  %v4590_v27 = vpop.f32.mrb[17].mxu0 }
 0x185   : > { %v7028_v54 = vadd.f32 %v4711_v53, %v4710_v50  ;;  %v4592_v29 = vpop.f32.mrb[18].mxu0  ;;  %v7057_v33 = vadd.f32 %v4590_v27, %v4589_v21 }
 0x186   : > { %5494 = vmatmul.mubr.bf16.gmra.mrb[80].mxu1 %v7020_v35  ;;  %v4593_v34 = vpop.f32.mrb[19].mxu0 }
 0x187   : > { %5497 = vmatprep.mubr.bf16.mxu1 %v7022_v48  ;;  %v7061_v63 = vadd.f32 %v4593_v34, %v4592_v29  ;;  %v6120_v34 = vld [vmem:[#allocation9 + $0xc0] sm:$0xff]  }
 0x189   : > { %v4713_v62 = vpop.f32.mrb[8].mxu1 }
 0x18a   : > { %v4714_v1 = vpop.f32.mrb[9].mxu1  ;;  %1910 = vmatmul.mubr.bf16.gmra.mrb[124].mxu0 %v6995_v16 }
 0x18b   : > { %v7039_v4 = vadd.f32 %v4714_v1, %v4713_v62  ;;  %v4716_v5 = vpop.f32.mrb[10].mxu1  ;;  %1917 = vmatprep.mubr.bf16.mxu0 %v7005_v31  ;;  %v4595_v24 = vpop.f32.mrb[20].mxu0 }
 0x18c   : > { %v4717_v11 = vpop.f32.mrb[11].mxu1  ;;  %v4596_v43 = vpop.f32.mrb[21].mxu0 }
 0x18d   : > { %v7043_v12 = vadd.f32 %v4717_v11, %v4716_v5  ;;  %v4598_v46 = vpop.f32.mrb[22].mxu0  ;;  %v7069_v52 = vadd.f32 %v4596_v43, %v4595_v24  ;;  %v6121_v24 = vld [vmem:[#allocation9 + $0x108] sm:$0xff]  }
 0x18e   : > { %5498 = vmatmul.mubr.bf16.gmra.mrb[84].mxu1 %v7035_v0  ;;  %v4599_v53 = vpop.f32.mrb[23].mxu0 }
 0x18f   : > { %5501 = vmatprep.mubr.bf16.mxu1 %v7037_v3  ;;  %v7073_v57 = vadd.f32 %v4599_v53, %v4598_v46 }
 0x191   : > { %v4719_v25 = vpop.f32.mrb[12].mxu1 }
 0x192   : > { %v4720_v28 = vpop.f32.mrb[13].mxu1  ;;  %1918 = vmatmul.mubr.bf16.gmra.mrb[128].mxu0 %v6997_v19 }
 0x193   : > { %v7055_v32 = vadd.f32 %v4720_v28, %v4719_v25  ;;  %v4722_v10 = vpop.f32.mrb[14].mxu1  ;;  %1925 = vmatprep.mubr.bf16.mxu0 %v7007_v37  ;;  %v4601_v58 = vpop.f32.mrb[24].mxu0  ;;  %v6119_v25 = vld [vmem:[#allocation9 + $0x100] sm:$0xff]  }
 0x194   : > { %v4723_v39 = vpop.f32.mrb[15].mxu1  ;;  %v4602_v61 = vpop.f32.mrb[25].mxu0  ;;  %4957 = vmatprep.subr.bf16.mxu0 %v6119_v25 }
 0x195   : > { %v7059_v59 = vadd.f32 %v4723_v39, %v4722_v10  ;;  %v4604_v44 = vpop.f32.mrb[26].mxu0  ;;  %v7079_v5 = vadd.f32 %v4602_v61, %v4601_v58  ;;  %4958 = vmatpush3.bf16.msra.mxu0 %v6120_v34  ;;  %v6124_v61 = vld [vmem:[#allocation9 + $0xd0] sm:$0xff]  }
 0x196   : > { %5502 = vmatmul.mubr.bf16.gmra.mrb[88].mxu1 %v7051_v26  ;;  %v4605_v9 = vpop.f32.mrb[27].mxu0  ;;  %4959 = vmatprep.subr.bf16.mxu0 %v6121_v24 }
 0x197   : > { %5505 = vmatprep.mubr.bf16.mxu1 %v7053_v30  ;;  %v7083_v15 = vadd.f32 %v4605_v9, %v4604_v44  ;;  %v6125_v9 = vld [vmem:[#allocation9 + $0x118] sm:$0xff]  }
 0x199   : > { %v4725_v36 = vpop.f32.mrb[16].mxu1 }
 0x19a   : > { %v4726_v45 = vpop.f32.mrb[17].mxu1  ;;  %1926 = vmatmul.mubr.bf16.gmra.mrb[132].mxu0 %v7005_v31 }
 0x19b   : > { %v7067_v47 = vadd.f32 %v4726_v45, %v4725_v36  ;;  %v4728_v50 = vpop.f32.mrb[18].mxu1  ;;  %1933 = vmatprep.mubr.bf16.mxu0 %v7020_v35  ;;  %v4607_v19 = vpop.f32.mrb[28].mxu0  ;;  %v6122_v36 = vld [vmem:[#allocation9 + $0xc8] sm:$0xff]  }
 0x19c   : > { %v4729_v56 = vpop.f32.mrb[19].mxu1  ;;  %v4608_v18 = vpop.f32.mrb[29].mxu0  ;;  %4960 = vmatpush3.bf16.msra.mxu0 %v6122_v36  ;;  %v6129_v36 = vld [vmem:[#allocation9 + $0xe0] sm:$0xff]  }
 0x19d   : > { %v7071_v16 = vadd.f32 %v4729_v56, %v4728_v50  ;;  %v4610_v27 = vpop.f32.mrb[30].mxu0  ;;  %v7089_v10 = vadd.f32 %v4608_v18, %v4607_v19  ;;  %v6123_v50 = vld [vmem:[#allocation9 + $0x110] sm:$0xff]   ;;  %v6127_v18 = vld [vmem:[#allocation9 + $0x140] sm:$0xff]  }
 0x19e   : > { %5506 = vmatmul.mubr.bf16.gmra.mrb[92].mxu1 %v1627_v42  ;;  %v4611_v39 = vpop.f32.mrb[31].mxu0  ;;  %4961 = vmatprep.subr.bf16.mxu0 %v6123_v50  ;;  %v6132_v50 = vld [vmem:[#allocation9 + $0xe8] sm:$0xff]  }
 0x19f   : > { %v7093_v31 = vadd.f32 %v4611_v39, %v4610_v27  ;;  %v6128_v27 = vld [vmem:[#allocation9 + $0x120] sm:$0xff]   ;;  %5509 = vmatprep.subr.bf16.mxu1 %v6127_v18 }
 0x1a0   : > { %4962 = vmatpush3.bf16.msra.mxu0 %v6124_v61  ;;  %5510 = vmatpush3.bf16.msra.mxu1 %v6127_v18  ;;  %v6133_v61 = vld [vmem:[#allocation9 + $0x150] sm:$0xff]  }
 0x1a1   : > { %v4731_v60 = vpop.f32.mrb[20].mxu1  ;;  %4963 = vmatprep.subr.bf16.mxu0 %v6125_v9  ;;  %v6134_v9 = vld [vmem:[#allocation9 + $0x130] sm:$0xff]  }
 0x1a2   : > { %v4732_v62 = vpop.f32.mrb[21].mxu1  ;;  %1934 = vmatmul.mubr.bf16.gmra.mrb[136].mxu0 %v7007_v37  ;;  %v6135_v18 = vld [vmem:[#allocation9 + $0xf0] sm:$0xff]  }
 0x1a3   : > { %v7077_v1 = vadd.f32 %v4732_v62, %v4731_v60  ;;  %v4734_v2 = vpop.f32.mrb[22].mxu1  ;;  %1941 = vmatprep.mubr.bf16.mxu0 %v7022_v48  ;;  %v4613_v42 = vpop.f32.mrb[32].mxu0 }
 0x1a4   : > { %v4735_v11 = vpop.f32.mrb[23].mxu1  ;;  %v4614_v45 = vpop.f32.mrb[33].mxu0 }
 0x1a5   : > { %v7081_v14 = vadd.f32 %v4735_v11, %v4734_v2  ;;  %v7097_v53 = vadd.f32 %v4614_v45, %v4613_v42  ;;  %v4616_v56 = vpop.f32.mrb[34].mxu0  ;;  %v6126_v11 = vld [vmem:[#allocation9 + $0xd8] sm:$0xff]   ;;  %v6130_v45 = vld [vmem:[#allocation9 + $0x148] sm:$0xff]  }
 0x1a6   : > { %v4617_v62 = vpop.f32.mrb[35].mxu0  ;;  %4964 = vmatpush3.bf16.msra.mxu0 %v6126_v11  ;;  %5511 = vmatprep.subr.bf16.mxu1 %v6130_v45 }
 0x1a7   : > { %v7101_v44 = vadd.f32 %v4617_v62, %v4616_v56  ;;  %4965 = vmatprep.subr.bf16.mxu0 %v6128_v27  ;;  %5512 = vmatpush3.bf16.msra.mxu1 %v6130_v45 }
 0x1a8   : > { %5513 = vmatprep.subr.bf16.mxu1 %v6133_v61 }
 0x1a9   : > { %v4737_v17 = vpop.f32.mrb[24].mxu1 }
 0x1aa   : > { %v4738_v21 = vpop.f32.mrb[25].mxu1  ;;  %1942 = vmatmul.mubr.bf16.gmra.mrb[140].mxu0 %v7020_v35 }
 0x1ab   : > { %v7087_v28 = vadd.f32 %v4738_v21, %v4737_v17  ;;  %v4740_v29 = vpop.f32.mrb[26].mxu1  ;;  %1949 = vmatprep.mubr.bf16.mxu0 %v7035_v0  ;;  %v4619_v19 = vpop.f32.mrb[36].mxu0  ;;  %4966 = vmatpush3.bf16.msra.mxu0 %v6129_v36 }
 0x1ac   : > { %v4741_v7 = vpop.f32.mrb[27].mxu1  ;;  %v4620_v21 = vpop.f32.mrb[37].mxu0  ;;  %5514 = vmatpush3.bf16.msra.mxu1 %v6133_v61 }
 0x1ad   : > { %v7091_v23 = vadd.f32 %v4741_v7, %v4740_v29  ;;  %v7107_v29 = vadd.f32 %v4620_v21, %v4619_v19  ;;  %v4622_v34 = vpop.f32.mrb[38].mxu0 }
 0x1ae   : > { %v4623_v35 = vpop.f32.mrb[39].mxu0 }
 0x1af   : > { %v7111_v42 = vadd.f32 %v4623_v35, %v4622_v34  ;;  %v6137_v35 = vld [vmem:[#allocation9 + $0x138] sm:$0xff]  }
 0x1b1   : > { %v4743_v43 = vpop.f32.mrb[28].mxu1 }
 0x1b2   : > { %v4744_v46 = vpop.f32.mrb[29].mxu1  ;;  %1950 = vmatmul.mubr.bf16.gmra.mrb[144].mxu0 %v7022_v48 }
 0x1b3   : > { %v7099_v58 = vadd.f32 %v4744_v46, %v4743_v43  ;;  %v4746_v60 = vpop.f32.mrb[30].mxu1  ;;  %v6131_v46 = vld [vmem:[#allocation9 + $0x128] sm:$0xff]   ;;  %1957 = vmatprep.mubr.bf16.mxu0 %v7037_v3  ;;  %v4625_v56 = vpop.f32.mrb[40].mxu0 }
 0x1b4   : > { %v4747_v37 = vpop.f32.mrb[31].mxu1  ;;  %4967 = vmatprep.subr.bf16.mxu0 %v6131_v46  ;;  %v4626_v62 = vpop.f32.mrb[41].mxu0  ;;  %v6139_v46 = vld [vmem:[#allocation9 + $0x160] sm:$0xff]  }
 0x1b5   : > { %v7103_v2 = vadd.f32 %v4747_v37, %v4746_v60  ;;  %v7117_v11 = vadd.f32 %v4626_v62, %v4625_v56  ;;  %v4628_v19 = vpop.f32.mrb[42].mxu0  ;;  %4968 = vmatpush3.bf16.msra.mxu0 %v6132_v50 }
 0x1b6   : > { %v4629_v21 = vpop.f32.mrb[43].mxu0  ;;  %4969 = vmatprep.subr.bf16.mxu0 %v6134_v9 }
 0x1b7   : > { %v7121_v27 = vadd.f32 %v4629_v21, %v4628_v19 }
 0x1b9   : > { %v4749_v17 = vpop.f32.mrb[32].mxu1  ;;  %8112 = vst [vmem:[#allocation14_spill] sm:$0xff] %v7121_v27  ;;  %4970 = vmatpush3.bf16.msra.mxu0 %v6135_v18  ;;  %v6140_v18 = vld [vmem:[#allocation9 + $0x168] sm:$0xff]  }
 0x1ba   : > { %v4750_v25 = vpop.f32.mrb[33].mxu1  ;;  %1958 = vmatmul.mubr.bf16.gmra.mrb[148].mxu0 %v7035_v0  ;;  %4971 = vmatprep.subr.bf16.mxu0 %v6137_v35 }
 0x1bb   : > { %v7109_v39 = vadd.f32 %v4750_v25, %v4749_v17  ;;  %v4752_v7 = vpop.f32.mrb[34].mxu1  ;;  %1965 = vmatprep.mubr.bf16.mxu0 %v7051_v26  ;;  %v4631_v36 = vpop.f32.mrb[44].mxu0 }
 0x1bc   : > { %v4753_v24 = vpop.f32.mrb[35].mxu1  ;;  %v4632_v50 = vpop.f32.mrb[45].mxu0 }
 0x1bd   : > { %v7113_v43 = vadd.f32 %v4753_v24, %v4752_v7  ;;  %v6136_v7 = vld [vmem:[#allocation9 + $0x158] sm:$0xff]   ;;  %v4634_v62 = vpop.f32.mrb[46].mxu0 }
 0x1be   : > { %v6138_v24 = vld [vmem:[#allocation9 + $0xf8] sm:$0xff]   ;;  %5515 = vmatprep.subr.bf16.mxu1 %v6136_v7  ;;  %v4635_v0 = vpop.f32.mrb[47].mxu0 }
 0x1bf   : > { %5516 = vmatpush3.bf16.msra.mxu1 %v6136_v7  ;;  %4972 = vmatpush3.bf16.msra.mxu0 %v6138_v24  ;;  %v7131_v19 = vadd.f32 %v4635_v0, %v4634_v62  ;;  %v6141_v7 = vld [vmem:[#allocation9 + $0x170] sm:$0xff]  }
 0x1c0   : > { %5517 = vmatprep.subr.bf16.mxu1 %v6139_v46 }
 0x1c1   : > { %v4755_v60 = vpop.f32.mrb[36].mxu1 }
 0x1c2   : > { %v4756_v37 = vpop.f32.mrb[37].mxu1  ;;  %1966 = vmatmul.mubr.bf16.gmra.mrb[152].mxu0 %v7037_v3 }
 0x1c3   : > { %v7119_v17 = vadd.f32 %v4756_v37, %v4755_v60  ;;  %v4758_v48 = vpop.f32.mrb[38].mxu1  ;;  %v7127_v60 = vadd.f32 %v4632_v50, %v4631_v36  ;;  %5518 = vmatpush3.bf16.msra.mxu1 %v6139_v46  ;;  %1973 = vmatprep.mubr.bf16.mxu0 %v7053_v30  ;;  %v4637_v21 = vpop.f32.mrb[48].mxu0  ;;  %v6142_v30 = vld [vmem:[#allocation9 + $0x178] sm:$0xff]  }
 0x1c4   : > { %v4759_v25 = vpop.f32.mrb[39].mxu1  ;;  %5519 = vmatprep.subr.bf16.mxu1 %v6140_v18  ;;  %v4638_v35 = vpop.f32.mrb[49].mxu0 }
 0x1c5   : > { %v7123_v34 = vadd.f32 %v4759_v25, %v4758_v48  ;;  %v7137_v36 = vadd.f32 %v4638_v35, %v4637_v21 }
 0x1c7   : > { %5520 = vmatpush3.bf16.msra.mxu1 %v6140_v18  ;;  %8114 = vst [vmem:[#allocation16_spill] sm:$0xff] %v7137_v36 }
 0x1c8   : > { %5521 = vmatprep.subr.bf16.mxu1 %v6141_v7 }
 0x1c9   : > { %v4761_v45 = vpop.f32.mrb[40].mxu1 }
 0x1ca   : > { %v4762_v56 = vpop.f32.mrb[41].mxu1  ;;  %1974 = vmatmul.mubr.bf16.gmra.mrb[156].mxu0 %v7051_v26 }
 0x1cb   : > { %v7129_v61 = vadd.f32 %v4762_v56, %v4761_v45  ;;  %v4764_v37 = vpop.f32.mrb[42].mxu1  ;;  %v4640_v45 = vpop.f32.mrb[50].mxu0  ;;  %5522 = vmatpush3.bf16.msra.mxu1 %v6141_v7 }
 0x1cc   : > { %v4765_v9 = vpop.f32.mrb[43].mxu1  ;;  %v4641_v46 = vpop.f32.mrb[51].mxu0  ;;  %5523 = vmatprep.subr.bf16.mxu1 %v6142_v30 }
 0x1cd   : > { %v7133_v48 = vadd.f32 %v4765_v9, %v4764_v37  ;;  %v7141_v37 = vadd.f32 %v4641_v46, %v4640_v45  ;;  %v4643_v0 = vpop.f32.mrb[52].mxu0 }
 0x1ce   : > { %v4644_v18 = vpop.f32.mrb[53].mxu0 }
 0x1cf   : > { %8113 = vst [vmem:[#allocation15_spill] sm:$0xff] %v7133_v48  ;;  %8115 = vst [vmem:[#allocation17_spill] sm:$0xff] %v7141_v37  ;;  %5524 = vmatpush3.bf16.msra.mxu1 %v6142_v30  ;;  %v4646_v35 = vpop.f32.mrb[54].mxu0 }
 0x1d0   : > { %v4647_v45 = vpop.f32.mrb[55].mxu0 }
 0x1d1   : > { %v4767_v25 = vpop.f32.mrb[44].mxu1 }
 0x1d2   : > { %v4768_v24 = vpop.f32.mrb[45].mxu1 }
 0x1d3   : > { %v7139_v50 = vadd.f32 %v4768_v24, %v4767_v25  ;;  %v4770_v56 = vpop.f32.mrb[46].mxu1  ;;  %v7146_v25 = vadd.f32 %v4644_v18, %v4643_v0 }
 0x1d4   : > { %v4771_v62 = vpop.f32.mrb[47].mxu1 }
 0x1d5   : > { %v7143_v3 = vadd.f32 %v4771_v62, %v4770_v56  ;;  %8117 = vst [vmem:[#allocation19_spill] sm:$0xff] %v7146_v25  ;;  %v7150_v56 = vadd.f32 %v4647_v45, %v4646_v35  ;;  %v4649_v62 = vpop.f32.mrb[56].mxu0 }
 0x1d6   : > { %v4650_v37 = vpop.f32.mrb[57].mxu0 }
 0x1d7   : > { %8116 = vst [vmem:[#allocation18_spill] sm:$0xff] %v7143_v3  ;;  %8119 = vst [vmem:[#allocation21_spill] sm:$0xff] %v7150_v56  ;;  %v7154_v3 = vadd.f32 %v4650_v37, %v4649_v62  ;;  %v4652_v30 = vpop.f32.mrb[58].mxu0 }
 0x1d8   : > { %v4653_v18 = vpop.f32.mrb[59].mxu0 }
 0x1d9   : > { %v4773_v9 = vpop.f32.mrb[48].mxu1  ;;  %8121 = vst [vmem:[#allocation23_spill] sm:$0xff] %v7154_v3 }
 0x1da   : > { %v4774_v21 = vpop.f32.mrb[49].mxu1 }
 0x1db   : > { %v7148_v24 = vadd.f32 %v4774_v21, %v4773_v9  ;;  %v4776_v36 = vpop.f32.mrb[50].mxu1  ;;  %v7158_v21 = vadd.f32 %v4653_v18, %v4652_v30  ;;  %v4655_v35 = vpop.f32.mrb[60].mxu0 }
 0x1dc   : > { %v4777_v46 = vpop.f32.mrb[51].mxu1 }
 0x1dd   : > { %8118 = vst [vmem:[#allocation20_spill] sm:$0xff] %v7148_v24  ;;  %v7152_v7 = vadd.f32 %v4777_v46, %v4776_v36  ;;  %8122 = vst [vmem:[#allocation24_spill] sm:$0xff] %v7158_v21  ;;  %v4656_v36 = vpop.f32.mrb[61].mxu0 }
 0x1de   : > { %v4658_v56 = vpop.f32.mrb[62].mxu0 }
 0x1df   : > { %8120 = vst [vmem:[#allocation22_spill] sm:$0xff] %v7152_v7  ;;  %v7162_v7 = vadd.f32 %v4656_v36, %v4655_v35  ;;  %v4659_v62 = vpop.f32.mrb[63].mxu0 }
 0x1e1   : > { %v4779_v26 = vpop.f32.mrb[52].mxu1 }
 0x1e2   : > { %v4780_v48 = vpop.f32.mrb[53].mxu1 }
 0x1e3   : > { %v7156_v27 = vadd.f32 %v4780_v48, %v4779_v26  ;;  %v4782_v0 = vpop.f32.mrb[54].mxu1  ;;  %v7166_v26 = vadd.f32 %v4659_v62, %v4658_v56  ;;  %v5383_v30 = vpop.f32.mrb[64].mxu0 }
 0x1e4   : > { %v4783_v9 = vpop.f32.mrb[55].mxu1 }
 0x1e5   : > { %v7160_v24 = vadd.f32 %v4783_v9, %v4782_v0  ;;  %v990_v0 = vadd.f32 %v5383_v30, %v7011_v41  ;;  %v981_v9 = vpop.f32.mrb[65].mxu0 }
 0x1e6   : > { %v5384_v35 = vpop.f32.mrb[66].mxu0 }
 0x1e7   : > { %8123 = vst [vmem:[#allocation25_spill] sm:$0xff] %v7160_v24  ;;  %v982_v24 = vadd.f32 %v6999_v20, %v981_v9  ;;  %v993_v56 = vadd.f32 %v5384_v35, %v7015_v40  ;;  %v984_v62 = vpop.f32.mrb[67].mxu0 }
 0x1e8   : > { %v985_v41 = vadd.f32 %v7001_v22, %v984_v62 }
 0x1e9   : > { %v4785_v45 = vpop.f32.mrb[56].mxu1  ;;  %v7185_v20 = vadd.f32 %v7028_v54, %v993_v56 }
 0x1ea   : > { %v4786_v46 = vpop.f32.mrb[57].mxu1 }
 0x1eb   : > { %v7164_v25 = vadd.f32 %v4786_v46, %v4785_v45  ;;  %v4788_v37 = vpop.f32.mrb[58].mxu1  ;;  %v7175_v46 = vadd.f32 %v7024_v49, %v990_v0 }
 0x1ec   : > { %v4789_v48 = vpop.f32.mrb[59].mxu1 }
 0x1ed   : > { %v7168_v3 = vadd.f32 %v4789_v48, %v4788_v37  ;;  %v7179_v48 = vadd.f32 %v7009_v38, %v982_v24 }
 0x1f1   : > { %v4791_v18 = vpop.f32.mrb[60].mxu1 }
 0x1f2   : > { %v4792_v21 = vpop.f32.mrb[61].mxu1 }
 0x1f3   : > { %v7172_v36 = vadd.f32 %v4792_v21, %v4791_v18  ;;  %v4794_v45 = vpop.f32.mrb[62].mxu1  ;;  %v7188_v21 = vadd.f32 %v7013_v8, %v985_v41  ;;  %v5387_v18 = vpop.f32.mrb[68].mxu0 }
 0x1f4   : > { %v4795_v37 = vpop.f32.mrb[63].mxu1  ;;  %v1006_v49 = vadd.f32 %v5387_v18, %v7041_v6  ;;  %v997_v0 = vpop.f32.mrb[69].mxu0 }
 0x1f5   : > { %v7182_v30 = vadd.f32 %v4795_v37, %v4794_v45  ;;  %v998_v40 = vadd.f32 %v7026_v51, %v997_v0  ;;  %v5388_v9 = vpop.f32.mrb[70].mxu0 }
 0x1f6   : > { %v7193_v38 = vadd.f32 %v7055_v32, %v1006_v49  ;;  %v1009_v22 = vadd.f32 %v5388_v9, %v7045_v13  ;;  %v1000_v24 = vpop.f32.mrb[71].mxu0 }
 0x1f7   : > { %v7197_v35 = vadd.f32 %v7039_v4, %v998_v40  ;;  %v1001_v54 = vadd.f32 %v7030_v55, %v1000_v24  ;;  %v5391_v45 = vpop.f32.mrb[72].mxu0 }
 0x1f8   : > { %v7201_v8 = vadd.f32 %v7059_v59, %v1009_v22  ;;  %v1022_v51 = vadd.f32 %v5391_v45, %v7069_v52  ;;  %v1013_v56 = vpop.f32.mrb[73].mxu0 }
 0x1f9   : > { %v7204_v6 = vadd.f32 %v7043_v12, %v1001_v54  ;;  %v1014_v32 = vadd.f32 %v7057_v33, %v1013_v56  ;;  %v5392_v62 = vpop.f32.mrb[74].mxu0  ;;  %v8124_v56 = vld [vmem:[#allocation14_spill] sm:$0xff] }
 0x1fa   : > { %v7209_v13 = vadd.f32 %v7077_v1, %v1022_v51  ;;  %v1025_v4 = vadd.f32 %v5392_v62, %v7073_v57  ;;  %v1016_v37 = vpop.f32.mrb[75].mxu0  ;;  %v8125_v62 = vld [vmem:[#allocation18_spill] sm:$0xff] }
 0x1fb   : > { %v7213_v55 = vadd.f32 %v7067_v47, %v1014_v32  ;;  %v1017_v59 = vadd.f32 %v7061_v63, %v1016_v37 }
 0x1fc   : > { %v7217_v12 = vadd.f32 %v7081_v14, %v1025_v4  ;;  %v5395_v41 = vpop.f32.mrb[76].mxu0 }
 0x1fd   : > { %v7220_v52 = vadd.f32 %v7071_v16, %v1017_v59  ;;  %v1038_v33 = vadd.f32 %v5395_v41, %v7089_v10  ;;  %v1029_v18 = vpop.f32.mrb[77].mxu0  ;;  %v8127_v59 = vld [vmem:[#allocation19_spill] sm:$0xff] }
 0x1fe   : > { %v1030_v1 = vadd.f32 %v7079_v5, %v1029_v18  ;;  %v5396_v49 = vpop.f32.mrb[78].mxu0 }
 0x1ff   : > { %v7225_v57 = vadd.f32 %v7099_v58, %v1038_v33  ;;  %v1041_v47 = vadd.f32 %v5396_v49, %v7093_v31  ;;  %v1032_v0 = vpop.f32.mrb[79].mxu0 }
 0x200   : > { %v7229_v63 = vadd.f32 %v7087_v28, %v1030_v1  ;;  %v1033_v14 = vadd.f32 %v7083_v15, %v1032_v0  ;;  %v8130_v0 = vld [vmem:[#allocation20_spill] sm:$0xff] }
 0x201   : > { %v7233_v16 = vadd.f32 %v7103_v2, %v1041_v47 }
 0x202   : > { %v7236_v10 = vadd.f32 %v7091_v23, %v1033_v14 }
 0x205   : > { %v5399_v40 = vpop.f32.mrb[80].mxu0 }
 0x206   : > { %v1054_v5 = vadd.f32 %v5399_v40, %v7107_v29  ;;  %v1045_v9 = vpop.f32.mrb[81].mxu0  ;;  %v8131_v40 = vld [vmem:[#allocation17_spill] sm:$0xff] }
 0x207   : > { %v1046_v58 = vadd.f32 %v7097_v53, %v1045_v9  ;;  %v5400_v22 = vpop.f32.mrb[82].mxu0  ;;  %v7254_v53 = vld [vmem:[#allocation9 + $0x80] sm:$0xff]   ;;  %v8132_v9 = vld [vmem:[#allocation25_spill] sm:$0xff] }
 0x208   : > { %v7241_v31 = vadd.f32 %v7119_v17, %v1054_v5  ;;  %v1057_v28 = vadd.f32 %v5400_v22, %v7111_v42  ;;  %v1048_v24 = vpop.f32.mrb[83].mxu0  ;;  %5557 = vmatprep.subr.bf16.mxu1 %v7254_v53  ;;  %v8133_v22 = vld [vmem:[#allocation22_spill] sm:$0xff] }
 0x209   : > { %v7245_v15 = vadd.f32 %v7109_v39, %v1046_v58  ;;  %v1049_v2 = vadd.f32 %v7101_v44, %v1048_v24 }
 0x20a   : > { %v7249_v23 = vadd.f32 %v7123_v34, %v1057_v28 }
 0x20b   : > { %v7252_v29 = vadd.f32 %v7113_v43, %v1049_v2 }
 0x20d   : > { %v5403_v54 = vpop.f32.mrb[84].mxu0 }
 0x20e   : > { %v1070_v17 = vadd.f32 %v5403_v54, %v7127_v60  ;;  %v1061_v45 = vpop.f32.mrb[85].mxu0  ;;  %v8126_v60 = vld [vmem:[#allocation15_spill] sm:$0xff] }
 0x20f   : > { %v1062_v42 = vadd.f32 %v7117_v11, %v1061_v45  ;;  %v5404_v51 = vpop.f32.mrb[86].mxu0 }
 0x210   : > { %v7260_v39 = vadd.f32 %v7139_v50, %v1070_v17  ;;  %v1073_v44 = vadd.f32 %v5404_v51, %v7131_v19  ;;  %v1064_v34 = vpop.f32.mrb[87].mxu0  ;;  %v8128_v50 = vld [vmem:[#allocation16_spill] sm:$0xff]  ;;  %v8134_v17 = vld [vmem:[#allocation23_spill] sm:$0xff] }
 0x211   : > { %v7264_v43 = vadd.f32 %v7129_v61, %v1062_v42  ;;  %v1065_v32 = vadd.f32 %v8124_v56, %v1064_v34  ;;  %v8129_v61 = vld [vmem:[#allocation21_spill] sm:$0xff] }
 0x212   : > { %v7268_v4 = vadd.f32 %v8125_v62, %v1073_v44 }
 0x213   : > { %v7271_v37 = vadd.f32 %v8126_v60, %v1065_v32  ;;  %v8135_v32 = vld [vmem:[#allocation24_spill] sm:$0xff] }
 0x215   : > { %v5407_v11 = vpop.f32.mrb[88].mxu0 }
 0x216   : > { %v1086_v41 = vadd.f32 %v5407_v11, %v8127_v59  ;;  %v1077_v33 = vpop.f32.mrb[89].mxu0 }
 0x217   : > { %v1078_v18 = vadd.f32 %v8128_v50, %v1077_v33  ;;  %v5408_v1 = vpop.f32.mrb[90].mxu0 }
 0x218   : > { %v7276_v19 = vadd.f32 %v7156_v27, %v1086_v41  ;;  %v1089_v49 = vadd.f32 %v5408_v1, %v8129_v61  ;;  %v1080_v47 = vpop.f32.mrb[91].mxu0  ;;  %v6147_v27 = vld [vmem:[#allocation9 + $0x40] sm:$0xff]  }
 0x219   : > { %v7280_v14 = vadd.f32 %v8130_v0, %v1078_v18  ;;  %v1081_v5 = vadd.f32 %v8131_v40, %v1080_v47  ;;  %5093 = vmatprep.subr.bf16.mxu0 %v6147_v27 }
 0x21a   : > { %v7284_v58 = vadd.f32 %v8132_v9, %v1089_v49 }
 0x21b   : > { %v7287_v28 = vadd.f32 %v8133_v22, %v1081_v5 }
 0x21d   : > { %v5411_v24 = vpop.f32.mrb[92].mxu0 }
 0x21e   : > { %v1102_v2 = vadd.f32 %v5411_v24, %v7162_v7  ;;  %v1093_v54 = vpop.f32.mrb[93].mxu0 }
 0x21f   : > { %v1094_v45 = vadd.f32 %v8134_v17, %v1093_v54  ;;  %v5412_v42 = vpop.f32.mrb[94].mxu0 }
 0x220   : > { %v7292_v51 = vadd.f32 %v7172_v36, %v1102_v2  ;;  %v1105_v44 = vadd.f32 %v5412_v42, %v7166_v26  ;;  %v1096_v34 = vpop.f32.mrb[95].mxu0 }
 0x221   : > { %v7296_v56 = vadd.f32 %v7164_v25, %v1094_v45  ;;  %v1097_v62 = vadd.f32 %v8135_v32, %v1096_v34 }
 0x222   : > { %v7300_v60 = vadd.f32 %v7182_v30, %v1105_v44  ;;  %v7310_v30 = vld [vmem:[%s8093_s2] ss:$0 sm:$0xff] }
 0x223   : > { %v7303_v7 = vadd.f32 %v7168_v3, %v1097_v62 }
 0x225   : > { %v4837_v11 = vpop.f32.mrb[96].mxu0 }
 0x226   : > { %v4838_v59 = vpop.f32.mrb[97].mxu0 }
 0x227   : > { %v4839_v41 = vadd.f32 %v4838_v59, %v4837_v11  ;;  %v4840_v36 = vpop.f32.mrb[98].mxu0 }
 0x228   : > { %v4841_v33 = vpop.f32.mrb[99].mxu0 }
 0x229   : > { %v5659_v26 = vadd.f32 %v4839_v41, %v7179_v48  ;;  %v4842_v50 = vadd.f32 %v4841_v33, %v4840_v36  ;;  %v7315_v48 = vld [vmem:[%s8094_s3] ss:$0 sm:$0xff] }
 0x22b   : > { %v5667_v18 = vadd.f32 %v4842_v50, %v7188_v21 }
 0x22d   : > { %v4843_v1 = vpop.f32.mrb[100].mxu0 }
 0x22e   : > { %v4844_v3 = vpop.f32.mrb[101].mxu0 }
 0x22f   : > { %v4845_v0 = vadd.f32 %v4844_v3, %v4843_v1  ;;  %v4846_v40 = vpop.f32.mrb[102].mxu0  ;;  %v6191_v1 = vld [vmem:[#allocation2 + $0x8] sm:$0xff] }
 0x230   : > { %v4847_v21 = vpop.f32.mrb[103].mxu0 }
 0x231   : > { %v5655_v24 = vadd.f32 %v4845_v0, %v7175_v46  ;;  %v4848_v2 = vadd.f32 %v4847_v21, %v4846_v40 }
 0x233   : > { %v5663_v45 = vadd.f32 %v4848_v2, %v7185_v20 }
 0x235   : > { %v4849_v11 = vpop.f32.mrb[104].mxu0 }
 0x236   : > { %v4850_v41 = vpop.f32.mrb[105].mxu0 }
 0x237   : > { %v4851_v50 = vadd.f32 %v4850_v41, %v4849_v11  ;;  %v6152_v41 = vld [vmem:[#allocation9 + $0x50] sm:$0xff]  }
 0x239   : > { %v5479_v25 = vpop.f32.mrb[64].mxu1 }
 0x23a   : > { %v2016_v61 = vpop.f32.mrb[65].mxu1  ;;  %v5656_v17 = vadd.f32 %v5655_v24, %v5479_v25  ;;  %v6150_v24 = vld [vmem:[#allocation9 + $0x48] sm:$0xff]  }
 0x23b   : > { %v5660_v49 = vadd.f32 %v5659_v26, %v2016_v61  ;;  %v5480_v47 = vpop.f32.mrb[66].mxu1  ;;  %v7326_v61 = vpack.c.bf16 %v6191_v1, %v6191_v1 }
 0x23c   : > { %v2019_v5 = vpop.f32.mrb[67].mxu1  ;;  %v2185_v32 = vmul.f32 %v5656_v17, %v7310_v30  ;;  %v5664_v62 = vadd.f32 %v5663_v45, %v5480_v47  ;;  %v5675_v47 = vadd.f32 %v4851_v50, %v7197_v35 }
 0x23d   : > { %v2183_v9 = vmul.f32 %v5660_v49, %v7310_v30  ;;  %v5668_v22 = vadd.f32 %v5667_v18, %v2019_v5  ;;  %v4852_v18 = vpop.f32.mrb[106].mxu0  ;;  %v6149_v5 = vld [vmem:[#allocation9] sm:$0xff]  }
 0x23e   : > { %v2223_v36 = vadd.f32 %v7315_v48, %v2185_v32  ;;  %v2186_v26 = vmul.f32 %v5664_v62, %v7310_v30  ;;  %v4853_v25 = vpop.f32.mrb[107].mxu0 }
 0x23f   : > { %v2221_v54 = vadd.f32 %v7315_v48, %v2183_v9  ;;  %v2184_v27 = vmul.f32 %v5668_v22, %v7310_v30  ;;  %v4854_v0 = vadd.f32 %v4853_v25, %v4852_v18  ;;  %v4855_v17 = vpop.f32.mrb[108].mxu0  ;;  %v6154_v25 = vld [vmem:[#allocation9 + $0x10] sm:$0xff]  }
 0x240   : > { %v2255_v3 = vmax.f32 %v2223_v36, 0.0  ;;  %v2224_v49 = vadd.f32 %v7315_v48, %v2186_v26 }
 0x241   : > { %v2253_v42 = vmax.f32 %v2221_v54, 0.0  ;;  %v2222_v44 = vadd.f32 %v7315_v48, %v2184_v27  ;;  %v5483_v34 = vpop.f32.mrb[68].mxu1  ;;  %v5683_v22 = vadd.f32 %v4854_v0, %v7204_v6 }
 0x242   : > { %v2032_v59 = vpop.f32.mrb[69].mxu1  ;;  %2333 = vst [vmem:[#allocation3 + $0x48] sm:$0xff] %v2255_v3  ;;  %v2256_v21 = vmax.f32 %v2224_v49, 0.0 }
 0x243   : > { %2331 = vst [vmem:[#allocation3 + $0x28] sm:$0xff] %v2253_v42  ;;  %v2254_v46 = vmax.f32 %v2222_v44, 0.0  ;;  %v5484_v33 = vpop.f32.mrb[70].mxu1  ;;  %v5676_v9 = vadd.f32 %v5675_v47, %v2032_v59  ;;  %v6151_v44 = vld [vmem:[#allocation9 + $0x8] sm:$0xff]   ;;  %v6155_v47 = vld [vmem:[#allocation9 + $0x58] sm:$0xff]  }
 0x244   : > { %v2035_v20 = vpop.f32.mrb[71].mxu1  ;;  %2334 = vst [vmem:[#allocation3 + $0x50] sm:$0xff] %v2256_v21  ;;  %v7335_v35 = vpack.c.bf16 %v2256_v21, %v2255_v3 }
 0x245   : > { %2332 = vst [vmem:[#allocation3 + $0x30] sm:$0xff] %v2254_v46  ;;  %v2502_v40 = vpack.c.bf16 %v2254_v46, %v2253_v42  ;;  %v2187_v54 = vmul.f32 %v5676_v9, %v7310_v30  ;;  %v5684_v27 = vadd.f32 %v5683_v22, %v2035_v20  ;;  %v4856_v42 = vpop.f32.mrb[109].mxu0 }
 0x246   : > { %v4857_v11 = vadd.f32 %v4856_v42, %v4855_v17  ;;  %v4858_v59 = vpop.f32.mrb[110].mxu0  ;;  %5525 = vmatprep.mubr.bf16.mxu1 %v7335_v35 }
 0x247   : > { %2744 = vmatprep.mubr.bf16.mxu0 %v2502_v40  ;;  %v2225_v32 = vadd.f32 %v7315_v48, %v2187_v54  ;;  %v2188_v62 = vmul.f32 %v5684_v27, %v7310_v30  ;;  %v4859_v36 = vpop.f32.mrb[111].mxu0 }
 0x248   : > { %2745 = vmatmul.mubr.bf16.vlgmr.msra.gmra.mrb[160].mxu0 %v7326_v61  ;;  %v5671_v18 = vadd.f32 %v4857_v11, %v7193_v38  ;;  %v4860_v20 = vadd.f32 %v4859_v36, %v4858_v59  ;;  %v4861_v9 = vpop.f32.mrb[112].mxu0  ;;  %v6144_v38 = vld [vmem:[#allocation9 + $0x88] sm:$0xff]   ;;  %v6145_v36 = vld [vmem:[#allocation9 + $0x90] sm:$0xff]  }
 0x249   : > { %v7331_v2 = vpop.f32.mrb[72].mxu1  ;;  %5094 = vmatpush3.bf16.msra.mxu0 %v6149_v5  ;;  %2752 = vmatprep.mubr.bf16.mxu0 %v7335_v35  ;;  %v2257_v26 = vmax.f32 %v2225_v32, 0.0  ;;  %v2226_v50 = vadd.f32 %v7315_v48, %v2188_v62  ;;  %v4862_v54 = vpop.f32.mrb[113].mxu0 }
 0x24a   : > { %v2048_v45 = vpop.f32.mrb[73].mxu1  ;;  %5095 = vmatprep.subr.bf16.mxu0 %v6150_v24  ;;  %v5672_v3 = vadd.f32 %v5671_v18, %v5483_v34  ;;  %v5679_v49 = vadd.f32 %v4860_v20, %v7201_v8  ;;  %v6156_v34 = vld [vmem:[#allocation9 + $0x18] sm:$0xff]   ;;  %v4863_v42 = vadd.f32 %v4862_v54, %v4861_v9 }
 0x24b   : > { %v7338_v6 = vpop.f32.mrb[74].mxu1  ;;  %2335 = vst [vmem:[#allocation3 + $0x68] sm:$0xff] %v2257_v26  ;;  %v2258_v1 = vmax.f32 %v2226_v50, 0.0 }
 0x24c   : > { %v2051_v46 = vpop.f32.mrb[75].mxu1  ;;  %v2189_v5 = vmul.f32 %v5672_v3, %v7310_v30  ;;  %v5680_v21 = vadd.f32 %v5679_v49, %v5484_v33  ;;  %v6157_v33 = vld [vmem:[#allocation9 + $0x60] sm:$0xff]   ;;  %v5691_v59 = vadd.f32 %v4863_v42, %v7213_v55 }
 0x24d   : > { %5096 = vmatpush3.bf16.msra.mxu0 %v6151_v44  ;;  %2336 = vst [vmem:[#allocation3 + $0x70] sm:$0xff] %v2258_v1  ;;  %v7349_v22 = vpack.c.bf16 %v2258_v1, %v2257_v26  ;;  %v4864_v44 = vpop.f32.mrb[114].mxu0  ;;  %v6159_v26 = vld [vmem:[#allocation9 + $0x20] sm:$0xff]  }
 0x24e   : > { %5097 = vmatprep.subr.bf16.mxu0 %v6152_v41  ;;  %v2227_v8 = vadd.f32 %v7315_v48, %v2189_v5  ;;  %v2190_v17 = vmul.f32 %v5680_v21, %v7310_v30  ;;  %v4865_v32 = vpop.f32.mrb[115].mxu0  ;;  %v5692_v18 = vadd.f32 %v5691_v59, %v2048_v45 }
 0x24f   : > { %5526 = vmatmul.mubr.bf16.vlgmr.msra.gmra.mrb[96].mxu1 %v7349_v22  ;;  %v4866_v41 = vadd.f32 %v4865_v32, %v4864_v44  ;;  %v4867_v55 = vpop.f32.mrb[116].mxu0  ;;  %v6148_v32 = vld [vmem:[#allocation9 + $0xa0] sm:$0xff]  }
 0x250   : > { %2753 = vmatmul.mubr.bf16.gmra.mrb[164].mxu0 %v2502_v40  ;;  %5558 = vmatpush3.bf16.msra.mxu1 %v7254_v53  ;;  %v2259_v62 = vmax.f32 %v2227_v8, 0.0  ;;  %v2228_v11 = vadd.f32 %v7315_v48, %v2190_v17  ;;  %v2191_v1 = vmul.f32 %v5692_v18, %v7310_v30  ;;  %v4868_v45 = vpop.f32.mrb[117].mxu0 }
 0x251   : > { %v7346_v0 = vpop.f32.mrb[76].mxu1  ;;  %5098 = vmatpush3.bf16.msra.mxu0 %v6154_v25  ;;  %2760 = vmatprep.mubr.bf16.mxu0 %v7349_v22  ;;  %v5699_v20 = vadd.f32 %v4866_v41, %v7220_v52  ;;  %v6160_v25 = vld [vmem:[#allocation9 + $0x68] sm:$0xff]   ;;  %v4869_v54 = vadd.f32 %v4868_v45, %v4867_v55 }
 0x252   : > { %v7351_v24 = vpop.f32.mrb[77].mxu1  ;;  %5099 = vmatprep.subr.bf16.mxu0 %v6155_v47  ;;  %5559 = vmatprep.subr.bf16.mxu1 %v6144_v38  ;;  %2337 = vst [vmem:[#allocation3 + $0x88] sm:$0xff] %v2259_v62  ;;  %v2260_v50 = vmax.f32 %v2228_v11, 0.0  ;;  %v6146_v47 = vld [vmem:[#allocation9 + $0x98] sm:$0xff]   ;;  %v6161_v52 = vld [vmem:[#allocation9 + $0x28] sm:$0xff]   ;;  %v2229_v21 = vadd.f32 %v7315_v48, %v2191_v1 }
 0x253   : > { %v7354_v27 = vpop.f32.mrb[78].mxu1  ;;  %v5700_v3 = vadd.f32 %v5699_v20, %v2051_v46  ;;  %v4870_v46 = vpop.f32.mrb[118].mxu0  ;;  %v5687_v44 = vadd.f32 %v4869_v54, %v7209_v13  ;;  %v6166_v1 = vld [vmem:[#allocation9 + $0x38] sm:$0xff]  }
 0x254   : > { %v7359_v40 = vpop.f32.mrb[79].mxu1  ;;  %5560 = vmatpush3.bf16.msra.mxu1 %v6144_v38  ;;  %2338 = vst [vmem:[#allocation3 + $0x90] sm:$0xff] %v2260_v50  ;;  %v7369_v49 = vpack.c.bf16 %v2260_v50, %v2259_v62  ;;  %v4871_v8 = vpop.f32.mrb[119].mxu0  ;;  %v2261_v17 = vmax.f32 %v2229_v21, 0.0  ;;  %v6164_v62 = vld [vmem:[#allocation9 + $0x30] sm:$0xff]  }
 0x255   : > { %5100 = vmatpush3.bf16.msra.mxu0 %v6156_v34  ;;  %5561 = vmatprep.subr.bf16.mxu1 %v6145_v36  ;;  %v2192_v38 = vmul.f32 %v5700_v3, %v7310_v30  ;;  %v5688_v59 = vadd.f32 %v5687_v44, %v7331_v2  ;;  %v4873_v18 = vpop.f32.mrb[120].mxu0 }
 0x256   : > { %5101 = vmatprep.subr.bf16.mxu0 %v6157_v33  ;;  %5529 = vmatprep.mubr.bf16.mxu1 %v7369_v49  ;;  %v4872_v33 = vadd.f32 %v4871_v8, %v4870_v46  ;;  %2339 = vst [vmem:[#allocation3 + $0xa8] sm:$0xff] %v2261_v17 }
 0x257   : > { %v2230_v42 = vadd.f32 %v7315_v48, %v2192_v38  ;;  %v2193_v50 = vmul.f32 %v5688_v59, %v7310_v30 }
 0x258   : > { %2761 = vmatmul.mubr.bf16.gmra.mrb[168].mxu0 %v7335_v35  ;;  %v6162_v35 = vld [vmem:[#allocation9 + $0x70] sm:$0xff]   ;;  %5562 = vmatpush3.bf16.msra.mxu1 %v6145_v36  ;;  %v5695_v41 = vadd.f32 %v4872_v33, %v7217_v12  ;;  %v6165_v36 = vld [vmem:[#allocation9 + $0x78] sm:$0xff]   ;;  %v4874_v12 = vpop.f32.mrb[121].mxu0 }
 0x259   : > { %v7365_v53 = vpop.f32.mrb[80].mxu1  ;;  %5102 = vmatpush3.bf16.msra.mxu0 %v6159_v26  ;;  %2768 = vmatprep.mubr.bf16.mxu0 %v7369_v49  ;;  %v2262_v11 = vmax.f32 %v2230_v42, 0.0  ;;  %v2231_v3 = vadd.f32 %v7315_v48, %v2193_v50  ;;  %v4875_v45 = vadd.f32 %v4874_v12, %v4873_v18 }
 0x25a   : > { %v7371_v5 = vpop.f32.mrb[81].mxu1  ;;  %5103 = vmatprep.subr.bf16.mxu0 %v6160_v25  ;;  %5563 = vmatprep.subr.bf16.mxu1 %v6146_v47  ;;  %v5696_v13 = vadd.f32 %v5695_v41, %v7338_v6  ;;  %v6153_v25 = vld [vmem:[#allocation9 + $0xa8] sm:$0xff]   ;;  %v4876_v6 = vpop.f32.mrb[122].mxu0 }
 0x25b   : > { %v7374_v9 = vpop.f32.mrb[82].mxu1  ;;  %2340 = vst [vmem:[#allocation3 + $0xb0] sm:$0xff] %v2262_v11  ;;  %v7390_v20 = vpack.c.bf16 %v2262_v11, %v2261_v17  ;;  %v2263_v21 = vmax.f32 %v2231_v3, 0.0  ;;  %v5707_v54 = vadd.f32 %v4875_v45, %v7229_v63  ;;  %v6163_v11 = vld [vmem:[#allocation9 + $0xb8] sm:$0xff]   ;;  %v6167_v3 = vld [vmem:[#allocation9 + $0x1c0] sm:$0xff]  }
 0x25c   : > { %v7379_v34 = vpop.f32.mrb[83].mxu1  ;;  %5564 = vmatpush3.bf16.msra.mxu1 %v6146_v47  ;;  %v2194_v47 = vmul.f32 %v5696_v13, %v7310_v30 }
 0x25d   : > { %5104 = vmatpush3.bf16.msra.mxu0 %v6161_v52  ;;  %5565 = vmatprep.subr.bf16.mxu1 %v6148_v32  ;;  %v4877_v52 = vpop.f32.mrb[123].mxu0  ;;  %2341 = vst [vmem:[#allocation3 + $0xc8] sm:$0xff] %v2263_v21  ;;  %v5708_v17 = vadd.f32 %v5707_v54, %v7351_v24 }
 0x25e   : > { %5105 = vmatprep.subr.bf16.mxu0 %v6162_v35  ;;  %5530 = vmatmul.mubr.bf16.gmra.mrb[100].mxu1 %v7390_v20  ;;  %v2232_v38 = vadd.f32 %v7315_v48, %v2194_v47  ;;  %v4878_v46 = vadd.f32 %v4877_v52, %v4876_v6  ;;  %v6158_v35 = vld [vmem:[#allocation9 + $0xb0] sm:$0xff]  }
 0x25f   : > { %v2195_v33 = vmul.f32 %v5708_v17, %v7310_v30 }
 0x260   : > { %2769 = vmatmul.mubr.bf16.gmra.mrb[172].mxu0 %v7349_v22  ;;  %5566 = vmatpush3.bf16.msra.mxu1 %v6148_v32  ;;  %v2264_v8 = vmax.f32 %v2232_v38, 0.0  ;;  %v5715_v42 = vadd.f32 %v4878_v46, %v7236_v10 }
 0x261   : > { %v7385_v26 = vpop.f32.mrb[84].mxu1  ;;  %5106 = vmatpush3.bf16.msra.mxu0 %v6164_v62  ;;  %2776 = vmatprep.mubr.bf16.mxu0 %v7390_v20  ;;  %v4879_v62 = vpop.f32.mrb[124].mxu0  ;;  %v2233_v24 = vadd.f32 %v7315_v48, %v2195_v33 }
 0x262   : > { %v7392_v2 = vpop.f32.mrb[85].mxu1  ;;  %5107 = vmatprep.subr.bf16.mxu0 %v6165_v36  ;;  %5567 = vmatprep.subr.bf16.mxu1 %v6153_v25  ;;  %2342 = vst [vmem:[#allocation3 + $0xd0] sm:$0xff] %v2264_v8  ;;  %v5716_v32 = vadd.f32 %v5715_v42, %v7359_v40  ;;  %v2507_v63 = vpack.c.bf16 %v2264_v8, %v2263_v21  ;;  %v4880_v41 = vpop.f32.mrb[125].mxu0 }
 0x263   : > { %v7395_v55 = vpop.f32.mrb[86].mxu1  ;;  %v4881_v50 = vadd.f32 %v4880_v41, %v4879_v62  ;;  %v4882_v13 = vpop.f32.mrb[126].mxu0 }
 0x264   : > { %v7400_v22 = vpop.f32.mrb[87].mxu1  ;;  %5568 = vmatpush3.bf16.msra.mxu1 %v6153_v25  ;;  %v2196_v36 = vmul.f32 %v5716_v32, %v7310_v30  ;;  %5533 = vmatprep.mubr.bf16.mxu1 %v2507_v63  ;;  %v4883_v18 = vpop.f32.mrb[127].mxu0 }
 0x265   : > { %5108 = vmatpush3.bf16.msra.mxu0 %v6166_v1  ;;  %5569 = vmatprep.subr.bf16.mxu1 %v6158_v35  ;;  %v5703_v12 = vadd.f32 %v4881_v50, %v7225_v57  ;;  %v4884_v1 = vadd.f32 %v4883_v18, %v4882_v13  ;;  %v4885_v54 = vpop.f32.mrb[128].mxu0 }
 0x266   : > { %v2234_v25 = vadd.f32 %v7315_v48, %v2196_v36 }
 0x267   : > { %v5704_v45 = vadd.f32 %v5703_v12, %v7346_v0  ;;  %v5711_v6 = vadd.f32 %v4884_v1, %v7233_v16 }
 0x268   : > { %2777 = vmatmul.mubr.bf16.gmra.mrb[176].mxu0 %v7369_v49  ;;  %5570 = vmatpush3.bf16.msra.mxu1 %v6158_v35  ;;  %v2265_v49 = vmax.f32 %v2233_v24, 0.0  ;;  %v2266_v47 = vmax.f32 %v2234_v25, 0.0  ;;  %v4886_v35 = vpop.f32.mrb[129].mxu0 }
 0x269   : > { %v7406_v44 = vpop.f32.mrb[88].mxu1  ;;  %2784 = vmatprep.mubr.bf16.mxu0 %v2507_v63  ;;  %5571 = vmatprep.subr.bf16.mxu1 %v6163_v11  ;;  %v2197_v21 = vmul.f32 %v5704_v45, %v7310_v30  ;;  %v5712_v38 = vadd.f32 %v5711_v6, %v7354_v27  ;;  %v4887_v17 = vadd.f32 %v4886_v35, %v4885_v54  ;;  %v4888_v42 = vpop.f32.mrb[130].mxu0 }
 0x26a   : > { %v7411_v59 = vpop.f32.mrb[89].mxu1  ;;  %2343 = vst [vmem:[#allocation3 + $0xe8] sm:$0xff] %v2265_v49  ;;  %2344 = vst [vmem:[#allocation3 + $0xf0] sm:$0xff] %v2266_v47  ;;  %v2508_v57 = vpack.c.bf16 %v2266_v47, %v2265_v49  ;;  %v4889_v27 = vpop.f32.mrb[131].mxu0 }
 0x26b   : > { %v7414_v10 = vpop.f32.mrb[90].mxu1  ;;  %v2235_v0 = vadd.f32 %v7315_v48, %v2197_v21  ;;  %v2198_v16 = vmul.f32 %v5712_v38, %v7310_v30  ;;  %v5723_v62 = vadd.f32 %v4887_v17, %v7245_v15 }
 0x26c   : > { %v7417_v40 = vpop.f32.mrb[91].mxu1  ;;  %5572 = vmatpush3.bf16.msra.mxu1 %v6163_v11  ;;  %v4890_v11 = vadd.f32 %v4889_v27, %v4888_v42 }
 0x26d   : > { %5229 = vmatprep.subr.bf16.mxu1 %v6167_v3  ;;  %5534 = vmatmul.mubr.bf16.gmra.mrb[104].mxu1 %v2508_v57  ;;  %v2267_v32 = vmax.f32 %v2235_v0, 0.0  ;;  %v5724_v24 = vadd.f32 %v5723_v62, %v7371_v5  ;;  %v4891_v18 = vpop.f32.mrb[132].mxu0 }
 0x26e   : > { %v5731_v36 = vadd.f32 %v4890_v11, %v7252_v29  ;;  %v4892_v25 = vpop.f32.mrb[133].mxu0 }
 0x26f   : > { %2345 = vst [vmem:[#allocation3 + $0x108] sm:$0xff] %v2267_v32  ;;  %v2199_v50 = vmul.f32 %v5724_v24, %v7310_v30  ;;  %v4893_v1 = vadd.f32 %v4892_v25, %v4891_v18  ;;  %v4894_v3 = vpop.f32.mrb[134].mxu0 }
 0x270   : > { %2785 = vmatmul.mubr.bf16.gmra.mrb[180].mxu0 %v7390_v20  ;;  %v2236_v20 = vadd.f32 %v7315_v48, %v2198_v16  ;;  %v5732_v13 = vadd.f32 %v5731_v36, %v7379_v34  ;;  %v4895_v5 = vpop.f32.mrb[135].mxu0 }
 0x271   : > { %v7423_v52 = vpop.f32.mrb[92].mxu1  ;;  %2792 = vmatprep.mubr.bf16.mxu0 %v2508_v57  ;;  %v2237_v12 = vadd.f32 %v7315_v48, %v2199_v50  ;;  %v5719_v45 = vadd.f32 %v4893_v1, %v7241_v31  ;;  %v4896_v6 = vadd.f32 %v4895_v5, %v4894_v3 }
 0x272   : > { %v7428_v46 = vpop.f32.mrb[93].mxu1  ;;  %v2268_v41 = vmax.f32 %v2236_v20, 0.0  ;;  %v2200_v15 = vmul.f32 %v5732_v13, %v7310_v30 }
 0x273   : > { %v7431_v8 = vpop.f32.mrb[94].mxu1  ;;  %v2269_v47 = vmax.f32 %v2237_v12, 0.0  ;;  %v5727_v21 = vadd.f32 %v4896_v6, %v7249_v23 }
 0x274   : > { %v7434_v33 = vpop.f32.mrb[95].mxu1  ;;  %2346 = vst [vmem:[#allocation3 + $0x110] sm:$0xff] %v2268_v41  ;;  %v2509_v49 = vpack.c.bf16 %v2268_v41, %v2267_v32  ;;  %v2238_v29 = vadd.f32 %v7315_v48, %v2200_v15 }
 0x275   : > { %2347 = vst [vmem:[#allocation3 + $0x128] sm:$0xff] %v2269_v47  ;;  %v5728_v54 = vadd.f32 %v5727_v21, %v7374_v9  ;;  %v4897_v35 = vpop.f32.mrb[136].mxu0 }
 0x276   : > { %5537 = vmatprep.mubr.bf16.mxu1 %v2509_v49  ;;  %v2270_v34 = vmax.f32 %v2238_v29, 0.0  ;;  %v4898_v16 = vpop.f32.mrb[137].mxu0 }
 0x277   : > { %v2202_v31 = vmul.f32 %v5728_v54, %v7310_v30  ;;  %v4899_v42 = vadd.f32 %v4898_v16, %v4897_v35  ;;  %v4900_v27 = vpop.f32.mrb[138].mxu0 }
 0x278   : > { %2793 = vmatmul.mubr.bf16.gmra.mrb[184].mxu0 %v2507_v63  ;;  %v5720_v63 = vadd.f32 %v5719_v45, %v7365_v53  ;;  %2348 = vst [vmem:[#allocation3 + $0x130] sm:$0xff] %v2270_v34  ;;  %v2510_v0 = vpack.c.bf16 %v2270_v34, %v2269_v47  ;;  %v4901_v53 = vpop.f32.mrb[139].mxu0 }
 0x279   : > { %2800 = vmatprep.mubr.bf16.mxu0 %v2509_v49  ;;  %v2240_v23 = vadd.f32 %v7315_v48, %v2202_v31  ;;  %v5739_v20 = vadd.f32 %v4899_v42, %v7264_v43  ;;  %v4902_v62 = vadd.f32 %v4901_v53, %v4900_v27 }
 0x27a   : > { %v2201_v38 = vmul.f32 %v5720_v63, %v7310_v30  ;;  %5538 = vmatmul.mubr.bf16.gmra.mrb[108].mxu1 %v2510_v0 }
 0x27b   : > { %v2272_v9 = vmax.f32 %v2240_v23, 0.0  ;;  %v5747_v11 = vadd.f32 %v4902_v62, %v7271_v37 }
 0x27c   : > { %v2239_v17 = vadd.f32 %v7315_v48, %v2201_v38 }
 0x27d   : > { %2350 = vst [vmem:[#allocation3 + $0x150] sm:$0xff] %v2272_v9  ;;  %v5748_v24 = vadd.f32 %v5747_v11, %v7400_v22  ;;  %v4903_v36 = vpop.f32.mrb[140].mxu0 }
 0x27e   : > { %v2271_v32 = vmax.f32 %v2239_v17, 0.0  ;;  %v4904_v13 = vpop.f32.mrb[141].mxu0 }
 0x27f   : > { %v2204_v43 = vmul.f32 %v5748_v24, %v7310_v30  ;;  %v4905_v25 = vadd.f32 %v4904_v13, %v4903_v36  ;;  %v4906_v12 = vpop.f32.mrb[142].mxu0 }
 0x280   : > { %2801 = vmatmul.mubr.bf16.gmra.mrb[188].mxu0 %v2508_v57  ;;  %2349 = vst [vmem:[#allocation3 + $0x148] sm:$0xff] %v2271_v32  ;;  %v5740_v57 = vadd.f32 %v5739_v20, %v7392_v2  ;;  %v2511_v50 = vpack.c.bf16 %v2272_v9, %v2271_v32  ;;  %v4907_v2 = vpop.f32.mrb[143].mxu0 }
 0x281   : > { %2808 = vmatprep.mubr.bf16.mxu0 %v2510_v0  ;;  %v2242_v37 = vadd.f32 %v7315_v48, %v2204_v43  ;;  %v5735_v1 = vadd.f32 %v4905_v25, %v7260_v39  ;;  %v4908_v3 = vadd.f32 %v4907_v2, %v4906_v12 }
 0x282   : > { %v2203_v41 = vmul.f32 %v5740_v57, %v7310_v30  ;;  %5541 = vmatprep.mubr.bf16.mxu1 %v2511_v50 }
 0x283   : > { %v2274_v22 = vmax.f32 %v2242_v37, 0.0  ;;  %v5743_v5 = vadd.f32 %v4908_v3, %v7268_v4 }
 0x284   : > { %v2241_v18 = vadd.f32 %v7315_v48, %v2203_v41 }
 0x285   : > { %2352 = vst [vmem:[#allocation3 + $0x170] sm:$0xff] %v2274_v22  ;;  %v5744_v29 = vadd.f32 %v5743_v5, %v7395_v55  ;;  %v4909_v45 = vpop.f32.mrb[144].mxu0 }
 0x286   : > { %v2273_v15 = vmax.f32 %v2241_v18, 0.0  ;;  %v4910_v34 = vpop.f32.mrb[145].mxu0 }
 0x287   : > { %v2206_v39 = vmul.f32 %v5744_v29, %v7310_v30  ;;  %v4911_v21 = vadd.f32 %v4910_v34, %v4909_v45  ;;  %v4912_v38 = vpop.f32.mrb[146].mxu0 }
 0x288   : > { %2809 = vmatmul.mubr.bf16.gmra.mrb[192].mxu0 %v2509_v49  ;;  %2351 = vst [vmem:[#allocation3 + $0x168] sm:$0xff] %v2273_v15  ;;  %v5736_v49 = vadd.f32 %v5735_v1, %v7385_v26  ;;  %v2512_v6 = vpack.c.bf16 %v2274_v22, %v2273_v15  ;;  %v4913_v26 = vpop.f32.mrb[147].mxu0 }
 0x289   : > { %2816 = vmatprep.mubr.bf16.mxu0 %v2511_v50  ;;  %v2244_v4 = vadd.f32 %v7315_v48, %v2206_v39  ;;  %v5755_v35 = vadd.f32 %v4911_v21, %v7280_v14  ;;  %v4914_v16 = vadd.f32 %v4913_v26, %v4912_v38 }
 0x28a   : > { %v2205_v47 = vmul.f32 %v5736_v49, %v7310_v30  ;;  %5542 = vmatmul.mubr.bf16.gmra.mrb[112].mxu1 %v2512_v6 }
 0x28b   : > { %v2276_v55 = vmax.f32 %v2244_v4, 0.0  ;;  %v5763_v17 = vadd.f32 %v4914_v16, %v7287_v28 }
 0x28c   : > { %v2243_v63 = vadd.f32 %v7315_v48, %v2205_v47 }
 0x28d   : > { %2354 = vst [vmem:[#allocation3 + $0x190] sm:$0xff] %v2276_v55  ;;  %v5764_v42 = vadd.f32 %v5763_v17, %v7417_v40  ;;  %v4915_v27 = vpop.f32.mrb[148].mxu0 }
 0x28e   : > { %v2275_v54 = vmax.f32 %v2243_v63, 0.0  ;;  %v4916_v32 = vpop.f32.mrb[149].mxu0 }
 0x28f   : > { %v2208_v14 = vmul.f32 %v5764_v42, %v7310_v30  ;;  %v4917_v20 = vadd.f32 %v4916_v32, %v4915_v27  ;;  %v4918_v62 = vpop.f32.mrb[150].mxu0  ;;  %v2367_v42 = vld [vmem:[#allocation3 + $0x47] sm:$0xff]  ;;  %v2366_v27 = vld [vmem:[#allocation3 + $0x2f] sm:$0xff] }
 0x290   : > { %2817 = vmatmul.mubr.bf16.gmra.mrb[196].mxu0 %v2510_v0  ;;  %2353 = vst [vmem:[#allocation3 + $0x188] sm:$0xff] %v2275_v54  ;;  %v5756_v0 = vadd.f32 %v5755_v35, %v7411_v59  ;;  %v2513_v53 = vpack.c.bf16 %v2276_v55, %v2275_v54  ;;  %v4919_v59 = vpop.f32.mrb[151].mxu0 }
 0x291   : > { %2824 = vmatprep.mubr.bf16.mxu0 %v2512_v6  ;;  %v2246_v28 = vadd.f32 %v7315_v48, %v2208_v14  ;;  %v5751_v57 = vadd.f32 %v4917_v20, %v7276_v19  ;;  %v4920_v11 = vadd.f32 %v4919_v59, %v4918_v62  ;;  %v2369_v14 = vld [vmem:[#allocation3 + $0x67] sm:$0xff]  ;;  %v2364_v62 = vld [vmem:[#allocation3 + $0xf] sm:$0xff] }
 0x292   : > { %v2207_v31 = vmul.f32 %v5756_v0, %v7310_v30  ;;  %5545 = vmatprep.mubr.bf16.mxu1 %v2513_v53  ;;  %v6168_v20 = vld [vmem:[#allocation9 + $0x180] sm:$0xff]  }
 0x293   : > { %v2278_v40 = vmax.f32 %v2246_v28, 0.0  ;;  %v5752_v41 = vadd.f32 %v5751_v57, %v7406_v44  ;;  %v5759_v24 = vadd.f32 %v4920_v11, %v7284_v58  ;;  %v6169_v28 = vld [vmem:[#allocation9 + $0x1c8] sm:$0xff]  }
 0x294   : > { %v2245_v23 = vadd.f32 %v7315_v48, %v2207_v31  ;;  %v2368_v31 = vld [vmem:[#allocation3 + $0x4f] sm:$0xff] }
 0x295   : > { %2356 = vst [vmem:[#allocation3 + $0x1b0] sm:$0xff] %v2278_v40  ;;  %v2209_v36 = vmul.f32 %v5752_v41, %v7310_v30  ;;  %v4921_v13 = vpop.f32.mrb[152].mxu0  ;;  %v6170_v11 = vld [vmem:[#allocation9 + $0x188] sm:$0xff]  }
 0x296   : > { %v2277_v9 = vmax.f32 %v2245_v23, 0.0  ;;  %v4922_v43 = vpop.f32.mrb[153].mxu0  ;;  %v2372_v23 = vld [vmem:[#allocation3 + $0x8f] sm:$0xff] }
 0x297   : > { %v2247_v25 = vadd.f32 %v7315_v48, %v2209_v36  ;;  %v4923_v12 = vadd.f32 %v4922_v43, %v4921_v13  ;;  %v4924_v2 = vpop.f32.mrb[154].mxu0  ;;  %v2374_v41 = vld [vmem:[#allocation3 + $0xaf] sm:$0xff]  ;;  %v2373_v36 = vld [vmem:[#allocation3 + $0xa7] sm:$0xff]  ;;  %v6173_v43 = vld [vmem:[#allocation9 + $0x1d8] sm:$0xff]  }
 0x298   : > { %2825 = vmatmul.mubr.bf16.gmra.mrb[200].mxu0 %v2511_v50  ;;  %2355 = vst [vmem:[#allocation3 + $0x1a8] sm:$0xff] %v2277_v9  ;;  %v5760_v50 = vadd.f32 %v5759_v24, %v7414_v10  ;;  %v2514_v18 = vpack.c.bf16 %v2278_v40, %v2277_v9  ;;  %v4925_v44 = vpop.f32.mrb[155].mxu0  ;;  %v2371_v9 = vld [vmem:[#allocation3 + $0x87] sm:$0xff]  ;;  %v6171_v40 = vld [vmem:[#allocation9 + $0x1d0] sm:$0xff]   ;;  %v7508_v13 = vpack.c.bf16 %v2374_v41, %v2373_v36  ;;  %v6186_v41 = vld [vmem:[#allocation9 + $0x218] sm:$0xff]  }
 0x299   : > { %2832 = vmatprep.mubr.bf16.mxu0 %v2513_v53  ;;  %v2279_v15 = vmax.f32 %v2247_v25, 0.0  ;;  %v5771_v37 = vadd.f32 %v4923_v12, %v7296_v56  ;;  %v4926_v1 = vadd.f32 %v4925_v44, %v4924_v2  ;;  %v7504_v57 = vpack.c.bf16 %v2372_v23, %v2371_v9  ;;  %v2376_v24 = vld [vmem:[#allocation3 + $0xcf] sm:$0xff]  ;;  %v6175_v12 = vld [vmem:[#allocation9 + $0x1e0] sm:$0xff]  }
 0x29a   : > { %v2210_v19 = vmul.f32 %v5760_v50, %v7310_v30  ;;  %5546 = vmatmul.mubr.bf16.gmra.mrb[116].mxu1 %v2514_v18  ;;  %v6172_v50 = vld [vmem:[#allocation9 + $0x190] sm:$0xff]   ;;  %v6187_v36 = vld [vmem:[#allocation9 + $0x220] sm:$0xff]  }
 0x29b   : > { %2357 = vst [vmem:[#allocation3 + $0x1c8] sm:$0xff] %v2279_v15  ;;  %v5772_v3 = vadd.f32 %v5771_v37, %v7428_v46  ;;  %v5779_v22 = vadd.f32 %v4926_v1, %v7303_v7  ;;  %v2378_v2 = vld [vmem:[#allocation3 + $0xef] sm:$0xff]  ;;  %v2379_v1 = vld [vmem:[#allocation3 + $0x107] sm:$0xff] }
 0x29c   : > { %v2248_v58 = vadd.f32 %v7315_v48, %v2210_v19  ;;  %v6174_v19 = vld [vmem:[#allocation9 + $0x198] sm:$0xff]   ;;  %v2380_v44 = vld [vmem:[#allocation3 + $0x10f] sm:$0xff] }
 0x29d   : > { %v2211_v49 = vmul.f32 %v5772_v3, %v7310_v30  ;;  %v5780_v5 = vadd.f32 %v5779_v22, %v7434_v33  ;;  %v4927_v47 = vpop.f32.mrb[156].mxu0  ;;  %v7517_v3 = vpack.c.bf16 %v2380_v44, %v2379_v1  ;;  %v6178_v22 = vld [vmem:[#allocation9 + $0x1a8] sm:$0xff]   ;;  %v3503_v23 = vld [vmem:[#allocation3 + $0x31] sm:$0xff] }
 0x29e   : > { %v2280_v10 = vmax.f32 %v2248_v58, 0.0  ;;  %v4928_v45 = vpop.f32.mrb[157].mxu0  ;;  %v6176_v58 = vld [vmem:[#allocation9 + $0x1a0] sm:$0xff]   ;;  %v3505_v9 = vld [vmem:[#allocation3 + $0x51] sm:$0xff] }
 0x29f   : > { %v2212_v56 = vmul.f32 %v5780_v5, %v7310_v30  ;;  %v4929_v34 = vadd.f32 %v4928_v45, %v4927_v47  ;;  %v4930_v63 = vpop.f32.mrb[158].mxu0  ;;  %v2382_v5 = vld [vmem:[#allocation3 + $0x12f] sm:$0xff] }
 0x2a0   : > { %2833 = vmatmul.mubr.bf16.gmra.mrb[204].mxu0 %v2512_v6  ;;  %2358 = vst [vmem:[#allocation3 + $0x1d0] sm:$0xff] %v2280_v10  ;;  %v2515_v29 = vpack.c.bf16 %v2280_v10, %v2279_v15  ;;  %v2249_v6 = vadd.f32 %v7315_v48, %v2211_v49  ;;  %v4931_v46 = vpop.f32.mrb[159].mxu0  ;;  %v2377_v15 = vld [vmem:[#allocation3 + $0xe7] sm:$0xff]  ;;  %v6179_v49 = vld [vmem:[#allocation9 + $0x1f0] sm:$0xff]  }
 0x2a1   : > { %2840 = vmatprep.mubr.bf16.mxu0 %v2514_v18  ;;  %v2250_v7 = vadd.f32 %v7315_v48, %v2212_v56  ;;  %v5767_v21 = vadd.f32 %v4929_v34, %v7292_v51  ;;  %v4932_v38 = vadd.f32 %v4931_v46, %v4930_v63  ;;  %v7515_v37 = vpack.c.bf16 %v2378_v2, %v2377_v15  ;;  %v6177_v10 = vld [vmem:[#allocation9 + $0x1e8] sm:$0xff]   ;;  %v6180_v45 = vld [vmem:[#allocation9 + $0x1b0] sm:$0xff]   ;;  %v6181_v34 = vld [vmem:[#allocation9 + $0x1f8] sm:$0xff]  }
 0x2a2   : > { %5549 = vmatprep.mubr.bf16.mxu1 %v2515_v29  ;;  %v2281_v39 = vmax.f32 %v2249_v6, 0.0  ;;  %v2384_v47 = vld [vmem:[#allocation3 + $0x14f] sm:$0xff]  ;;  %v2383_v56 = vld [vmem:[#allocation3 + $0x147] sm:$0xff]  ;;  %v6182_v46 = vld [vmem:[#allocation9 + $0x1b8] sm:$0xff]  }
 0x2a3   : > { %v2282_v33 = vmax.f32 %v2250_v7, 0.0  ;;  %v5768_v26 = vadd.f32 %v5767_v21, %v7423_v52  ;;  %v5775_v54 = vadd.f32 %v4932_v38, %v7300_v60  ;;  %v7524_v63 = vpack.c.bf16 %v2384_v47, %v2383_v56  ;;  %v2386_v7 = vld [vmem:[#allocation3 + $0x16f] sm:$0xff]  ;;  %v2385_v38 = vld [vmem:[#allocation3 + $0x167] sm:$0xff]  ;;  %v6190_v2 = vld [vmem:[#allocation9 + $0x238] sm:$0xff]  }
 0x2a4   : > { %2359 = vst [vmem:[#allocation3 + $0x1e8] sm:$0xff] %v2281_v39  ;;  %v2388_v21 = vld [vmem:[#allocation3 + $0x18f] sm:$0xff] }
 0x2a5   : > { %2360 = vst [vmem:[#allocation3 + $0x1f0] sm:$0xff] %v2282_v33  ;;  %v2213_v4 = vmul.f32 %v5768_v26, %v7310_v30  ;;  %v5776_v35 = vadd.f32 %v5775_v54, %v7431_v8  ;;  %v2516_v16 = vpack.c.bf16 %v2282_v33, %v2281_v39  ;;  %v2401_v8 = vpack.c.bf16 %v2368_v31, %v2367_v42  ;;  %v6183_v39 = vld [vmem:[#allocation9 + $0x200] sm:$0xff]  }
 0x2a6   : > { %v7530_v33 = vpack.c.bf16 %v2386_v7, %v2385_v38  ;;  %v2387_v26 = vld [vmem:[#allocation3 + $0x187] sm:$0xff] }
 0x2a7   : > { %v2251_v55 = vadd.f32 %v7315_v48, %v2213_v4  ;;  %v2214_v0 = vmul.f32 %v5776_v35, %v7310_v30  ;;  %5550 = vmatmul.mubr.bf16.gmra.mrb[120].mxu1 %v2516_v16  ;;  %v2365_v30 = vld [vmem:[#allocation3 + $0x27] sm:$0xff]  ;;  %v7532_v54 = vpack.c.bf16 %v2388_v21, %v2387_v26  ;;  %v2390_v4 = vld [vmem:[#allocation3 + $0x1af] sm:$0xff] }
 0x2a8   : > { %2841 = vmatmul.mubr.bf16.gmra.mrb[208].mxu0 %v2513_v53  ;;  %v2370_v53 = vld [vmem:[#allocation3 + $0x6f] sm:$0xff]  ;;  %v2400_v32 = vpack.c.bf16 %v2366_v27, %v2365_v30  ;;  %v2397_v27 = vld [vmem:[#allocation3 + $0x227] sm:$0xff] }
 0x2a9   : > { %2848 = vmatprep.mubr.bf16.mxu0 %v2515_v29  ;;  %v2283_v51 = vmax.f32 %v2251_v55, 0.0  ;;  %v2252_v17 = vadd.f32 %v7315_v48, %v2214_v0  ;;  %v2363_v48 = vld [vmem:[#allocation3 + $0x7] sm:$0xff]  ;;  %v7502_v59 = vpack.c.bf16 %v2370_v53, %v2369_v14  ;;  %v2392_v35 = vld [vmem:[#allocation3 + $0x1cf] sm:$0xff] }
 0x2aa   : > { %v2391_v0 = vld [vmem:[#allocation3 + $0x1c7] sm:$0xff]  ;;  %v2398_v30 = vld [vmem:[#allocation3 + $0x22f] sm:$0xff] }
 0x2ab   : > { %2361 = vst [vmem:[#allocation3 + $0x208] sm:$0xff] %v2283_v51  ;;  %v2284_v52 = vmax.f32 %v2252_v17, 0.0  ;;  %v2393_v31 = vld [vmem:[#allocation3 + $0x1e7] sm:$0xff]  ;;  %v2416_v53 = vpack.c.bf16 %v2398_v30, %v2397_v27 }
 0x2ac   : > { %v2394_v17 = vld [vmem:[#allocation3 + $0x1ef] sm:$0xff] }
 0x2ad   : > { %2362 = vst [vmem:[#allocation3 + $0x210] sm:$0xff] %v2284_v52  ;;  %v2517_v60 = vpack.c.bf16 %v2284_v52, %v2283_v51  ;;  %v7540_v51 = vpack.c.bf16 %v2392_v35, %v2391_v0  ;;  %v3500_v14 = vld [vmem:[#allocation3 + $0x9] sm:$0xff] }
 0x2ae   : > { %v3516_v35 = vld [vmem:[#allocation3 + $0x109] sm:$0xff] }
 0x2af   : > { %5553 = vmatprep.mubr.bf16.mxu1 %v2517_v60  ;;  %v3518_v30 = vld [vmem:[#allocation3 + $0x129] sm:$0xff] }
 0x2b0   : > { %2849 = vmatmul.mubr.bf16.gmra.mrb[212].mxu0 %v2514_v18  ;;  %5554 = vmatmul.mubr.bf16.gmra.mrb[124].mxu1 %v7326_v61  ;;  %v2399_v61 = vpack.c.bf16 %v2364_v62, %v2363_v48  ;;  %v2375_v18 = vld [vmem:[#allocation3 + $0xc7] sm:$0xff] }
 0x2b1   : > { %2856 = vmatprep.mubr.bf16.mxu0 %v2516_v16  ;;  %5573 = vmatprep.mubr.bf16.mxu1 %v2401_v8  ;;  %v7510_v25 = vpack.c.bf16 %v2376_v24, %v2375_v18  ;;  %v6188_v18 = vld [vmem:[#allocation9 + $0x228] sm:$0xff]  }
 0x2b2   : > { %v2395_v42 = vld [vmem:[#allocation3 + $0x207] sm:$0xff] }
 0x2b4   : > { %v2396_v52 = vld [vmem:[#allocation3 + $0x20f] sm:$0xff] }
 0x2b8   : > { %2857 = vmatmul.mubr.bf16.gmra.mrb[216].mxu0 %v2515_v29  ;;  %5574 = vmatmul.mubr.bf16.vlgmr.msra.gmra.mrb[96].mxu1 %v7502_v59  ;;  %v2381_v29 = vld [vmem:[#allocation3 + $0x127] sm:$0xff] }
 0x2b9   : > { %2864 = vmatprep.mubr.bf16.mxu0 %v2517_v60  ;;  %5577 = vmatprep.mubr.bf16.mxu1 %v7504_v57  ;;  %v7522_v6 = vpack.c.bf16 %v2382_v5, %v2381_v29  ;;  %v7546_v60 = vpack.c.bf16 %v2394_v17, %v2393_v31 }
 0x2ba   : > { %5230 = vmatpush3.bf16.msra.mxu1 %v6168_v20  ;;  %v3501_v20 = vld [vmem:[#allocation3 + $0x11] sm:$0xff] }
 0x2bb   : > { %5231 = vmatprep.subr.bf16.mxu1 %v6169_v28  ;;  %v3536_v62 = vpack.c.bf16 %v3501_v20, %v3500_v14  ;;  %v6184_v28 = vld [vmem:[#allocation9 + $0x208] sm:$0xff]  }
 0x2be   : > { %5232 = vmatpush3.bf16.msra.mxu1 %v6170_v11  ;;  %v3506_v11 = vld [vmem:[#allocation3 + $0x69] sm:$0xff] }
 0x2bf   : > { %5233 = vmatprep.subr.bf16.mxu1 %v6171_v40  ;;  %v3507_v40 = vld [vmem:[#allocation3 + $0x71] sm:$0xff] }
 0x2c0   : > { %2865 = vmatmul.mubr.bf16.gmra.mrb[220].mxu0 %v2516_v16  ;;  %5578 = vmatmul.mubr.bf16.gmra.mrb[100].mxu1 %v7508_v13  ;;  %v2389_v16 = vld [vmem:[#allocation3 + $0x1a7] sm:$0xff]  ;;  %v7561_v24 = vpack.c.bf16 %v3507_v40, %v3506_v11 }
 0x2c1   : > { %3210 = vmatprep.mubr.bf16.mxu0 %v2400_v32  ;;  %5581 = vmatprep.mubr.bf16.mxu1 %v7510_v25  ;;  %v7538_v55 = vpack.c.bf16 %v2390_v4, %v2389_v16  ;;  %v3517_v16 = vld [vmem:[#allocation3 + $0x111] sm:$0xff] }
 0x2c2   : > { %5234 = vmatpush3.bf16.msra.mxu1 %v6172_v50  ;;  %v3508_v50 = vld [vmem:[#allocation3 + $0x89] sm:$0xff] }
 0x2c3   : > { %5235 = vmatprep.subr.bf16.mxu1 %v6173_v43 }
 0x2c6   : > { %5236 = vmatpush3.bf16.msra.mxu1 %v6174_v19  ;;  %v3510_v19 = vld [vmem:[#allocation3 + $0xa9] sm:$0xff] }
 0x2c7   : > { %5237 = vmatprep.subr.bf16.mxu1 %v6175_v12  ;;  %v3511_v12 = vld [vmem:[#allocation3 + $0xb1] sm:$0xff] }
 0x2c8   : > { %3211 = vmatmul.mubr.bf16.vlgmr.msra.gmra.mrb[224].mxu0 %v2399_v61  ;;  %5582 = vmatmul.mubr.bf16.gmra.mrb[104].mxu1 %v7515_v37  ;;  %v6185_v61 = vld [vmem:[#allocation9 + $0x210] sm:$0xff]   ;;  %v7572_v44 = vpack.c.bf16 %v3511_v12, %v3510_v19 }
 0x2c9   : > { %3218 = vmatprep.mubr.bf16.mxu0 %v2401_v8  ;;  %5585 = vmatprep.mubr.bf16.mxu1 %v7517_v3 }
 0x2ca   : > { %5238 = vmatpush3.bf16.msra.mxu1 %v6176_v58 }
 0x2cb   : > { %5239 = vmatprep.subr.bf16.mxu1 %v6177_v10 }
 0x2ce   : > { %5240 = vmatpush3.bf16.msra.mxu1 %v6178_v22  ;;  %v3512_v22 = vld [vmem:[#allocation3 + $0xc9] sm:$0xff] }
 0x2cf   : > { %5241 = vmatprep.subr.bf16.mxu1 %v6179_v49  ;;  %v3513_v49 = vld [vmem:[#allocation3 + $0xd1] sm:$0xff] }
 0x2d0   : > { %3219 = vmatmul.mubr.bf16.gmra.mrb[228].mxu0 %v2400_v32  ;;  %5586 = vmatmul.mubr.bf16.gmra.mrb[108].mxu1 %v7522_v6  ;;  %v3502_v32 = vld [vmem:[#allocation3 + $0x29] sm:$0xff]  ;;  %v7582_v5 = vpack.c.bf16 %v3513_v49, %v3512_v22 }
 0x2d1   : > { %3226 = vmatprep.mubr.bf16.mxu0 %v7502_v59  ;;  %5589 = vmatprep.mubr.bf16.mxu1 %v7524_v63  ;;  %v3537_v48 = vpack.c.bf16 %v3503_v23, %v3502_v32 }
 0x2d2   : > { %5242 = vmatpush3.bf16.msra.mxu1 %v6180_v45 }
 0x2d3   : > { %5243 = vmatprep.subr.bf16.mxu1 %v6181_v34 }
 0x2d6   : > { %5244 = vmatpush3.bf16.msra.mxu1 %v6182_v46  ;;  %v3515_v46 = vld [vmem:[#allocation3 + $0xf1] sm:$0xff] }
 0x2d7   : > { %5605 = vmatprep.subr.bf16.mxu1 %v6183_v39 }
 0x2d8   : > { %3227 = vmatmul.mubr.bf16.gmra.mrb[232].mxu0 %v2401_v8  ;;  %5590 = vmatmul.mubr.bf16.gmra.mrb[112].mxu1 %v7530_v33  ;;  %v7548_v8 = vpack.c.bf16 %v2396_v52, %v2395_v42 }
 0x2d9   : > { %3234 = vmatprep.mubr.bf16.mxu0 %v7504_v57  ;;  %5593 = vmatprep.mubr.bf16.mxu1 %v7532_v54 }
 0x2e0   : > { %3235 = vmatmul.mubr.bf16.gmra.mrb[236].mxu0 %v7502_v59  ;;  %5594 = vmatmul.mubr.bf16.gmra.mrb[116].mxu1 %v7538_v55  ;;  %v3504_v59 = vld [vmem:[#allocation3 + $0x49] sm:$0xff] }
 0x2e1   : > { %3242 = vmatprep.mubr.bf16.mxu0 %v7508_v13  ;;  %5597 = vmatprep.mubr.bf16.mxu1 %v7540_v51 }
 0x2e8   : > { %3243 = vmatmul.mubr.bf16.gmra.mrb[240].mxu0 %v7504_v57  ;;  %5598 = vmatmul.mubr.bf16.gmra.mrb[120].mxu1 %v7546_v60  ;;  %v7556_v57 = vpack.c.bf16 %v3505_v9, %v3504_v59  ;;  %v3520_v59 = vld [vmem:[#allocation3 + $0x149] sm:$0xff]  ;;  %v3521_v9 = vld [vmem:[#allocation3 + $0x151] sm:$0xff] }
 0x2e9   : > { %3250 = vmatprep.mubr.bf16.mxu0 %v7510_v25  ;;  %5601 = vmatprep.mubr.bf16.mxu1 %v7548_v8 }
 0x2f0   : > { %3251 = vmatmul.mubr.bf16.gmra.mrb[244].mxu0 %v7508_v13  ;;  %5602 = vmatmul.mubr.bf16.gmra.mrb[124].mxu1 %v2416_v53  ;;  %v3509_v13 = vld [vmem:[#allocation3 + $0x91] sm:$0xff] }
 0x2f1   : > { %3258 = vmatprep.mubr.bf16.mxu0 %v7515_v37  ;;  %3779 = vmatprep.mubr.bf16.mxu1 %v3537_v48  ;;  %v7566_v43 = vpack.c.bf16 %v3509_v13, %v3508_v50  ;;  %v3519_v53 = vld [vmem:[#allocation3 + $0x131] sm:$0xff] }
 0x2f2   : > { %v3523_v50 = vld [vmem:[#allocation3 + $0x171] sm:$0xff] }
 0x2f8   : > { %3259 = vmatmul.mubr.bf16.gmra.mrb[248].mxu0 %v7510_v25  ;;  %3780 = vmatmul.mubr.bf16.vlgmr.msra.gmra.mrb[128].mxu1 %v3536_v62  ;;  %v6189_v25 = vld [vmem:[#allocation9 + $0x230] sm:$0xff]  }
 0x2f9   : > { %3266 = vmatprep.mubr.bf16.mxu0 %v7517_v3  ;;  %3787 = vmatprep.mubr.bf16.mxu1 %v7556_v57 }
 0x2fa   : > { %5606 = vmatpush3.bf16.msra.mxu1 %v6183_v39 }
 0x2fb   : > { %5607 = vmatprep.subr.bf16.mxu1 %v6184_v28 }
 0x2fe   : > { %5608 = vmatpush3.bf16.msra.mxu1 %v6184_v28 }
 0x2ff   : > { %5609 = vmatprep.subr.bf16.mxu1 %v6185_v61 }
 0x300   : > { %3267 = vmatmul.mubr.bf16.gmra.mrb[252].mxu0 %v7515_v37  ;;  %3788 = vmatmul.mubr.bf16.gmra.mrb[132].mxu1 %v3537_v48 }
 0x301   : > { %3274 = vmatprep.mubr.bf16.mxu0 %v7522_v6  ;;  %3795 = vmatprep.mubr.bf16.mxu1 %v7561_v24 }
 0x302   : > { %5610 = vmatpush3.bf16.msra.mxu1 %v6185_v61 }
 0x303   : > { %5611 = vmatprep.subr.bf16.mxu1 %v6186_v41 }
 0x306   : > { %5612 = vmatpush3.bf16.msra.mxu1 %v6186_v41 }
 0x307   : > { %5613 = vmatprep.subr.bf16.mxu1 %v6187_v36 }
 0x308   : > { %3275 = vmatmul.mubr.bf16.gmra.mrb[0].mxu0 %v7517_v3  ;;  %3796 = vmatmul.mubr.bf16.gmra.mrb[136].mxu1 %v7556_v57 }
 0x309   : > { %3282 = vmatprep.mubr.bf16.mxu0 %v7524_v63  ;;  %3803 = vmatprep.mubr.bf16.mxu1 %v7566_v43 }
 0x30a   : > { %5614 = vmatpush3.bf16.msra.mxu1 %v6187_v36  ;;  %v3522_v36 = vld [vmem:[#allocation3 + $0x169] sm:$0xff] }
 0x30b   : > { %5615 = vmatprep.subr.bf16.mxu1 %v6188_v18  ;;  %v7629_v13 = vpack.c.bf16 %v3523_v50, %v3522_v36 }
 0x30e   : > { %5616 = vmatpush3.bf16.msra.mxu1 %v6188_v18 }
 0x30f   : > { %5617 = vmatprep.subr.bf16.mxu1 %v6189_v25 }
 0x310   : > { %3283 = vmatmul.mubr.bf16.gmra.mrb[4].mxu0 %v7522_v6  ;;  %3804 = vmatmul.mubr.bf16.gmra.mrb[140].mxu1 %v7561_v24 }
 0x311   : > { %3290 = vmatprep.mubr.bf16.mxu0 %v7530_v33  ;;  %3811 = vmatprep.mubr.bf16.mxu1 %v7572_v44 }
 0x312   : > { %5618 = vmatpush3.bf16.msra.mxu1 %v6189_v25 }
 0x313   : > { %5619 = vmatprep.subr.bf16.mxu1 %v6190_v2 }
 0x316   : > { %5620 = vmatpush3.bf16.msra.mxu1 %v6190_v2 }
 0x318   : > { %3291 = vmatmul.mubr.bf16.gmra.mrb[8].mxu0 %v7524_v63  ;;  %3812 = vmatmul.mubr.bf16.gmra.mrb[144].mxu1 %v7566_v43  ;;  %v3514_v63 = vld [vmem:[#allocation3 + $0xe9] sm:$0xff] }
 0x319   : > { %3298 = vmatprep.mubr.bf16.mxu0 %v7532_v54  ;;  %3819 = vmatprep.mubr.bf16.mxu1 %v7582_v5  ;;  %v7592_v39 = vpack.c.bf16 %v3515_v46, %v3514_v63  ;;  %v3527_v63 = vld [vmem:[#allocation3 + $0x1b1] sm:$0xff] }
 0x31b   : > { %v4973_v15 = vpop.f32.mrb[160].mxu0 }
 0x31c   : > { %v4974_v58 = vpop.f32.mrb[161].mxu0 }
 0x31d   : > { %v7576_v37 = vadd.f32 %v4974_v58, %v4973_v15  ;;  %v4976_v1 = vpop.f32.mrb[162].mxu0  ;;  %v3524_v15 = vld [vmem:[#allocation3 + $0x189] sm:$0xff]  ;;  %v3525_v58 = vld [vmem:[#allocation3 + $0x191] sm:$0xff] }
 0x31e   : > { %v4977_v10 = vpop.f32.mrb[163].mxu0 }
 0x31f   : > { %v7578_v3 = vadd.f32 %v4977_v10, %v4976_v1  ;;  %v7637_v1 = vpack.c.bf16 %v3525_v58, %v3524_v15 }
 0x320   : > { %3299 = vmatmul.mubr.bf16.gmra.mrb[12].mxu0 %v7530_v33  ;;  %3820 = vmatmul.mubr.bf16.gmra.mrb[148].mxu1 %v7572_v44 }
 0x321   : > { %3306 = vmatprep.mubr.bf16.mxu0 %v7538_v55  ;;  %3827 = vmatprep.mubr.bf16.mxu1 %v7592_v39 }
 0x323   : > { %v4979_v47 = vpop.f32.mrb[164].mxu0 }
 0x324   : > { %v4980_v29 = vpop.f32.mrb[165].mxu0 }
 0x325   : > { %v7586_v45 = vadd.f32 %v4980_v29, %v4979_v47  ;;  %v4982_v6 = vpop.f32.mrb[166].mxu0 }
 0x326   : > { %v4983_v56 = vpop.f32.mrb[167].mxu0 }
 0x327   : > { %v7588_v34 = vadd.f32 %v4983_v56, %v4982_v6  ;;  %v3526_v56 = vld [vmem:[#allocation3 + $0x1a9] sm:$0xff] }
 0x328   : > { %3307 = vmatmul.mubr.bf16.gmra.mrb[16].mxu0 %v7532_v54  ;;  %v7602_v54 = vpack.c.bf16 %v3517_v16, %v3516_v35  ;;  %3828 = vmatmul.mubr.bf16.gmra.mrb[152].mxu1 %v7582_v5  ;;  %v7645_v46 = vpack.c.bf16 %v3527_v63, %v3526_v56 }
 0x329   : > { %3314 = vmatprep.mubr.bf16.mxu0 %v7540_v51 }
 0x32a   : > { %3835 = vmatprep.mubr.bf16.mxu1 %v7602_v54 }
 0x32b   : > { %v4985_v7 = vpop.f32.mrb[168].mxu0 }
 0x32c   : > { %v4986_v21 = vpop.f32.mrb[169].mxu0 }
 0x32d   : > { %v7596_v38 = vadd.f32 %v4986_v21, %v4985_v7  ;;  %v4988_v33 = vpop.f32.mrb[170].mxu0 }
 0x32e   : > { %v4989_v26 = vpop.f32.mrb[171].mxu0 }
 0x32f   : > { %v7598_v4 = vadd.f32 %v4989_v26, %v4988_v33 }
 0x330   : > { %3315 = vmatmul.mubr.bf16.gmra.mrb[20].mxu0 %v7538_v55  ;;  %v7612_v55 = vpack.c.bf16 %v3519_v53, %v3518_v30  ;;  %3836 = vmatmul.mubr.bf16.gmra.mrb[156].mxu1 %v7592_v39 }
 0x331   : > { %3322 = vmatprep.mubr.bf16.mxu0 %v7546_v60 }
 0x332   : > { %3843 = vmatprep.mubr.bf16.mxu1 %v7612_v55 }
 0x333   : > { %v4991_v0 = vpop.f32.mrb[172].mxu0 }
 0x334   : > { %v4992_v17 = vpop.f32.mrb[173].mxu0 }
 0x335   : > { %v7606_v52 = vadd.f32 %v4992_v17, %v4991_v0  ;;  %v4994_v31 = vpop.f32.mrb[174].mxu0  ;;  %v3528_v0 = vld [vmem:[#allocation3 + $0x1c9] sm:$0xff]  ;;  %v3529_v17 = vld [vmem:[#allocation3 + $0x1d1] sm:$0xff] }
 0x336   : > { %v4995_v42 = vpop.f32.mrb[175].mxu0 }
 0x337   : > { %v7608_v27 = vadd.f32 %v4995_v42, %v4994_v31  ;;  %v7653_v31 = vpack.c.bf16 %v3529_v17, %v3528_v0 }
 0x338   : > { %3323 = vmatmul.mubr.bf16.gmra.mrb[24].mxu0 %v7540_v51  ;;  %v7621_v51 = vpack.c.bf16 %v3521_v9, %v3520_v59  ;;  %3844 = vmatmul.mubr.bf16.gmra.mrb[160].mxu1 %v7602_v54  ;;  %v3531_v59 = vld [vmem:[#allocation3 + $0x1f1] sm:$0xff] }
 0x339   : > { %3330 = vmatprep.mubr.bf16.mxu0 %v7548_v8 }
 0x33a   : > { %3851 = vmatprep.mubr.bf16.mxu1 %v7621_v51 }
 0x33b   : > { %v4997_v32 = vpop.f32.mrb[176].mxu0 }
 0x33c   : > { %v4998_v23 = vpop.f32.mrb[177].mxu0 }
 0x33d   : > { %v7616_v48 = vadd.f32 %v4998_v23, %v4997_v32  ;;  %v5000_v14 = vpop.f32.mrb[178].mxu0 }
 0x33e   : > { %v5001_v20 = vpop.f32.mrb[179].mxu0 }
 0x33f   : > { %v7618_v62 = vadd.f32 %v5001_v20, %v5000_v14  ;;  %v3530_v20 = vld [vmem:[#allocation3 + $0x1e9] sm:$0xff] }
 0x340   : > { %3331 = vmatmul.mubr.bf16.gmra.mrb[28].mxu0 %v7546_v60  ;;  %3852 = vmatmul.mubr.bf16.gmra.mrb[164].mxu1 %v7612_v55  ;;  %v7661_v9 = vpack.c.bf16 %v3531_v59, %v3530_v20 }
 0x341   : > { %3859 = vmatprep.mubr.bf16.mxu1 %v7629_v13 }
 0x343   : > { %v5003_v8 = vpop.f32.mrb[180].mxu0 }
 0x344   : > { %v5004_v28 = vpop.f32.mrb[181].mxu0 }
 0x345   : > { %v7625_v61 = vadd.f32 %v5004_v28, %v5003_v8  ;;  %v5006_v11 = vpop.f32.mrb[182].mxu0 }
 0x346   : > { %v5007_v40 = vpop.f32.mrb[183].mxu0 }
 0x347   : > { %v7627_v41 = vadd.f32 %v5007_v40, %v5006_v11 }
 0x348   : > { %3860 = vmatmul.mubr.bf16.gmra.mrb[168].mxu1 %v7621_v51 }
 0x349   : > { %3867 = vmatprep.mubr.bf16.mxu1 %v7637_v1 }
 0x34b   : > { %v5009_v18 = vpop.f32.mrb[184].mxu0 }
 0x34c   : > { %v5010_v60 = vpop.f32.mrb[185].mxu0 }
 0x34d   : > { %v7633_v25 = vadd.f32 %v5010_v60, %v5009_v18  ;;  %v5012_v19 = vpop.f32.mrb[186].mxu0  ;;  %v3532_v18 = vld [vmem:[#allocation3 + $0x209] sm:$0xff]  ;;  %v3533_v60 = vld [vmem:[#allocation3 + $0x211] sm:$0xff] }
 0x34e   : > { %v5013_v12 = vpop.f32.mrb[187].mxu0 }
 0x34f   : > { %v7635_v2 = vadd.f32 %v5013_v12, %v5012_v19  ;;  %v7669_v19 = vpack.c.bf16 %v3533_v60, %v3532_v18 }
 0x350   : > { %3868 = vmatmul.mubr.bf16.gmra.mrb[172].mxu1 %v7629_v13 }
 0x351   : > { %3875 = vmatprep.mubr.bf16.mxu1 %v7645_v46 }
 0x353   : > { %v5015_v10 = vpop.f32.mrb[188].mxu0 }
 0x354   : > { %v5016_v22 = vpop.f32.mrb[189].mxu0 }
 0x355   : > { %v7641_v49 = vadd.f32 %v5016_v22, %v5015_v10  ;;  %v5018_v47 = vpop.f32.mrb[190].mxu0 }
 0x356   : > { %v5019_v29 = vpop.f32.mrb[191].mxu0 }
 0x357   : > { %v7643_v6 = vadd.f32 %v5019_v29, %v5018_v47 }
 0x358   : > { %3876 = vmatmul.mubr.bf16.gmra.mrb[176].mxu1 %v7637_v1 }
 0x359   : > { %3883 = vmatprep.mubr.bf16.mxu1 %v7653_v31 }
 0x35b   : > { %v5021_v7 = vpop.f32.mrb[192].mxu0 }
 0x35c   : > { %v5022_v21 = vpop.f32.mrb[193].mxu0 }
 0x35d   : > { %v7649_v33 = vadd.f32 %v5022_v21, %v5021_v7  ;;  %v5024_v26 = vpop.f32.mrb[194].mxu0 }
 0x35e   : > { %v5025_v35 = vpop.f32.mrb[195].mxu0 }
 0x35f   : > { %v7651_v16 = vadd.f32 %v5025_v35, %v5024_v26 }
 0x360   : > { %3884 = vmatmul.mubr.bf16.gmra.mrb[180].mxu1 %v7645_v46 }
 0x361   : > { %3891 = vmatprep.mubr.bf16.mxu1 %v7661_v9 }
 0x363   : > { %v5027_v42 = vpop.f32.mrb[196].mxu0 }
 0x364   : > { %v5028_v30 = vpop.f32.mrb[197].mxu0 }
 0x365   : > { %v7657_v53 = vadd.f32 %v5028_v30, %v5027_v42  ;;  %v5030_v32 = vpop.f32.mrb[198].mxu0 }
 0x366   : > { %v5031_v23 = vpop.f32.mrb[199].mxu0 }
 0x367   : > { %v7659_v14 = vadd.f32 %v5031_v23, %v5030_v32 }
 0x368   : > { %3892 = vmatmul.mubr.bf16.gmra.mrb[184].mxu1 %v7653_v31 }
 0x369   : > { %3899 = vmatprep.mubr.bf16.mxu1 %v7669_v19 }
 0x36b   : > { %v5033_v8 = vpop.f32.mrb[200].mxu0 }
 0x36c   : > { %v5034_v28 = vpop.f32.mrb[201].mxu0 }
 0x36d   : > { %v7665_v11 = vadd.f32 %v5034_v28, %v5033_v8  ;;  %v5036_v40 = vpop.f32.mrb[202].mxu0 }
 0x36e   : > { %v5037_v36 = vpop.f32.mrb[203].mxu0 }
 0x36f   : > { %v7667_v50 = vadd.f32 %v5037_v36, %v5036_v40 }
 0x370   : > { %3900 = vmatmul.mubr.bf16.gmra.mrb[188].mxu1 %v7661_v9 }
 0x371   : > { %5621 = vmatprep.mubr.bf16.mxu1 %v7556_v57 }
 0x373   : > { %v5039_v12 = vpop.f32.mrb[204].mxu0 }
 0x374   : > { %v5040_v15 = vpop.f32.mrb[205].mxu0 }
 0x375   : > { %v7673_v58 = vadd.f32 %v5040_v15, %v5039_v12  ;;  %v5042_v10 = vpop.f32.mrb[206].mxu0 }
 0x376   : > { %v5043_v22 = vpop.f32.mrb[207].mxu0 }
 0x377   : > { %v7675_v47 = vadd.f32 %v5043_v22, %v5042_v10 }
 0x378   : > { %5622 = vmatmul.mubr.bf16.vlgmr.msra.gmra.mrb[96].mxu1 %v7561_v24 }
 0x379   : > { %5625 = vmatprep.mubr.bf16.mxu1 %v7566_v43 }
 0x37b   : > { %v5045_v29 = vpop.f32.mrb[208].mxu0 }
 0x37c   : > { %v5046_v56 = vpop.f32.mrb[209].mxu0 }
 0x37d   : > { %v7679_v63 = vadd.f32 %v5046_v56, %v5045_v29  ;;  %v5048_v7 = vpop.f32.mrb[210].mxu0 }
 0x37e   : > { %v5049_v21 = vpop.f32.mrb[211].mxu0 }
 0x37f   : > { %v7681_v26 = vadd.f32 %v5049_v21, %v5048_v7 }
 0x380   : > { %5626 = vmatmul.mubr.bf16.gmra.mrb[100].mxu1 %v7572_v44 }
 0x381   : > { %5629 = vmatprep.mubr.bf16.mxu1 %v7582_v5 }
 0x383   : > { %v5051_v35 = vpop.f32.mrb[212].mxu0 }
 0x384   : > { %v5052_v0 = vpop.f32.mrb[213].mxu0 }
 0x385   : > { %v7685_v17 = vadd.f32 %v5052_v0, %v5051_v35  ;;  %v5054_v42 = vpop.f32.mrb[214].mxu0 }
 0x386   : > { %v5055_v30 = vpop.f32.mrb[215].mxu0 }
 0x387   : > { %v7687_v32 = vadd.f32 %v5055_v30, %v5054_v42 }
 0x388   : > { %5630 = vmatmul.mubr.bf16.gmra.mrb[104].mxu1 %v7592_v39 }
 0x389   : > { %5633 = vmatprep.mubr.bf16.mxu1 %v7602_v54 }
 0x38b   : > { %v5057_v23 = vpop.f32.mrb[216].mxu0 }
 0x38c   : > { %v5058_v57 = vpop.f32.mrb[217].mxu0 }
 0x38d   : > { %v7691_v20 = vadd.f32 %v5058_v57, %v5057_v23  ;;  %v5060_v59 = vpop.f32.mrb[218].mxu0 }
 0x38e   : > { %v5061_v8 = vpop.f32.mrb[219].mxu0 }
 0x38f   : > { %v7693_v24 = vadd.f32 %v5061_v8, %v5060_v59  ;;  %v3535_v59 = vld [vmem:[#allocation3 + $0x231] sm:$0xff] }
 0x390   : > { %5634 = vmatmul.mubr.bf16.gmra.mrb[108].mxu1 %v7612_v55 }
 0x391   : > { %5637 = vmatprep.mubr.bf16.mxu1 %v7621_v51 }
 0x393   : > { %v5063_v28 = vpop.f32.mrb[220].mxu0 }
 0x394   : > { %v5064_v43 = vpop.f32.mrb[221].mxu0 }
 0x395   : > { %v7697_v40 = vadd.f32 %v5064_v43, %v5063_v28  ;;  %v5066_v36 = vpop.f32.mrb[222].mxu0 }
 0x396   : > { %v5067_v18 = vpop.f32.mrb[223].mxu0 }
 0x397   : > { %v7699_v44 = vadd.f32 %v5067_v18, %v5066_v36 }
 0x398   : > { %5638 = vmatmul.mubr.bf16.gmra.mrb[112].mxu1 %v7629_v13 }
 0x399   : > { %5641 = vmatprep.mubr.bf16.mxu1 %v7637_v1 }
 0x39b   : > { %v5109_v60 = vpop.f32.mrb[224].mxu0 }
 0x39c   : > { %v5110_v5 = vpop.f32.mrb[225].mxu0 }
 0x39d   : > { %v5111_v12 = vadd.f32 %v5110_v5, %v5109_v60  ;;  %v5112_v15 = vpop.f32.mrb[226].mxu0 }
 0x39e   : > { %v5113_v10 = vpop.f32.mrb[227].mxu0 }
 0x39f   : > { %v7704_v39 = vadd.f32 %v5111_v12, %v7576_v37  ;;  %v5114_v22 = vadd.f32 %v5113_v10, %v5112_v15 }
 0x3a0   : > { %5642 = vmatmul.mubr.bf16.gmra.mrb[116].mxu1 %v7645_v46  ;;  %v3534_v46 = vld [vmem:[#allocation3 + $0x229] sm:$0xff] }
 0x3a1   : > { %v7707_v54 = vadd.f32 %v5114_v22, %v7578_v3  ;;  %5645 = vmatprep.mubr.bf16.mxu1 %v7653_v31  ;;  %v3553_v36 = vpack.c.bf16 %v3535_v59, %v3534_v46 }
 0x3a3   : > { %v5115_v29 = vpop.f32.mrb[228].mxu0 }
 0x3a4   : > { %v5116_v56 = vpop.f32.mrb[229].mxu0 }
 0x3a5   : > { %v5117_v55 = vadd.f32 %v5116_v56, %v5115_v29  ;;  %v5118_v7 = vpop.f32.mrb[230].mxu0 }
 0x3a6   : > { %v5119_v21 = vpop.f32.mrb[231].mxu0 }
 0x3a7   : > { %v7712_v51 = vadd.f32 %v5117_v55, %v7586_v45  ;;  %v5120_v35 = vadd.f32 %v5119_v21, %v5118_v7 }
 0x3a8   : > { %5646 = vmatmul.mubr.bf16.gmra.mrb[120].mxu1 %v7661_v9 }
 0x3a9   : > { %v7715_v37 = vadd.f32 %v5120_v35, %v7588_v34  ;;  %5649 = vmatprep.mubr.bf16.mxu1 %v7669_v19 }
 0x3ab   : > { %v5121_v0 = vpop.f32.mrb[232].mxu0 }
 0x3ac   : > { %v5122_v3 = vpop.f32.mrb[233].mxu0 }
 0x3ad   : > { %v5123_v13 = vadd.f32 %v5122_v3, %v5121_v0  ;;  %v5124_v42 = vpop.f32.mrb[234].mxu0 }
 0x3ae   : > { %v5125_v30 = vpop.f32.mrb[235].mxu0 }
 0x3af   : > { %v7720_v1 = vadd.f32 %v5123_v13, %v7596_v38  ;;  %v5126_v23 = vadd.f32 %v5125_v30, %v5124_v42 }
 0x3b0   : > { %5650 = vmatmul.mubr.bf16.gmra.mrb[124].mxu1 %v3553_v36 }
 0x3b1   : > { %v7723_v45 = vadd.f32 %v5126_v23, %v7598_v4 }
 0x3b3   : > { %v5127_v57 = vpop.f32.mrb[236].mxu0 }
 0x3b4   : > { %v5128_v34 = vpop.f32.mrb[237].mxu0 }
 0x3b5   : > { %v5129_v8 = vadd.f32 %v5128_v34, %v5127_v57  ;;  %v5130_v31 = vpop.f32.mrb[238].mxu0 }
 0x3b6   : > { %v5131_v28 = vpop.f32.mrb[239].mxu0 }
 0x3b7   : > { %v7728_v43 = vadd.f32 %v5129_v8, %v7606_v52  ;;  %v5132_v38 = vadd.f32 %v5131_v28, %v5130_v31 }
 0x3b9   : > { %v7731_v18 = vadd.f32 %v5132_v38, %v7608_v27 }
 0x3bb   : > { %v5133_v4 = vpop.f32.mrb[240].mxu0 }
 0x3bc   : > { %v5134_v60 = vpop.f32.mrb[241].mxu0 }
 0x3bd   : > { %v5135_v9 = vadd.f32 %v5134_v60, %v5133_v4  ;;  %v5136_v5 = vpop.f32.mrb[242].mxu0 }
 0x3be   : > { %v5137_v12 = vpop.f32.mrb[243].mxu0 }
 0x3bf   : > { %v7734_v19 = vadd.f32 %v5135_v9, %v7616_v48  ;;  %v5138_v15 = vadd.f32 %v5137_v12, %v5136_v5 }
 0x3c1   : > { %v7737_v10 = vadd.f32 %v5138_v15, %v7618_v62 }
 0x3c3   : > { %v5139_v52 = vpop.f32.mrb[244].mxu0 }
 0x3c4   : > { %v5140_v22 = vpop.f32.mrb[245].mxu0 }
 0x3c5   : > { %v5141_v29 = vadd.f32 %v5140_v22, %v5139_v52  ;;  %v5142_v56 = vpop.f32.mrb[246].mxu0 }
 0x3c6   : > { %v5143_v55 = vpop.f32.mrb[247].mxu0 }
 0x3c7   : > { %v7740_v27 = vadd.f32 %v5141_v29, %v7625_v61  ;;  %v5144_v7 = vadd.f32 %v5143_v55, %v5142_v56 }
 0x3c9   : > { %v7743_v21 = vadd.f32 %v5144_v7, %v7627_v41 }
 0x3cb   : > { %v5145_v35 = vpop.f32.mrb[248].mxu0  ;;  %v5245_v59 = vpop.f32.mrb[128].mxu1 }
 0x3cc   : > { %v5146_v0 = vpop.f32.mrb[249].mxu0  ;;  %v5246_v31 = vpop.f32.mrb[129].mxu1 }
 0x3cd   : > { %v5147_v48 = vadd.f32 %v5146_v0, %v5145_v35  ;;  %v5148_v3 = vpop.f32.mrb[250].mxu0  ;;  %v5247_v28 = vadd.f32 %v5246_v31, %v5245_v59  ;;  %v5248_v38 = vpop.f32.mrb[130].mxu1 }
 0x3ce   : > { %v5149_v13 = vpop.f32.mrb[251].mxu0  ;;  %v5249_v36 = vpop.f32.mrb[131].mxu1 }
 0x3cf   : > { %v7746_v62 = vadd.f32 %v5147_v48, %v7633_v25  ;;  %v5150_v42 = vadd.f32 %v5149_v13, %v5148_v3  ;;  %v5250_v4 = vadd.f32 %v5249_v36, %v5248_v38 }
 0x3d1   : > { %v7749_v30 = vadd.f32 %v5150_v42, %v7635_v2  ;;  %v7758_v2 = vadd.f32 %v7704_v39, %v5247_v28  ;;  %v7761_v5 = vadd.f32 %v7707_v54, %v5250_v4 }
 0x3d3   : > { %v5151_v23 = vpop.f32.mrb[252].mxu0  ;;  %v5251_v52 = vpop.f32.mrb[132].mxu1 }
 0x3d4   : > { %v5152_v57 = vpop.f32.mrb[253].mxu0 }
 0x3d5   : > { %v5153_v61 = vadd.f32 %v5152_v57, %v5151_v23  ;;  %v5154_v34 = vpop.f32.mrb[254].mxu0 }
 0x3d6   : > { %v5155_v46 = vpop.f32.mrb[255].mxu0 }
 0x3d7   : > { %v7752_v41 = vadd.f32 %v5153_v61, %v7641_v49  ;;  %v5156_v8 = vadd.f32 %v5155_v46, %v5154_v34 }
 0x3d9   : > { %v7755_v25 = vadd.f32 %v5156_v8, %v7643_v6  ;;  %v5252_v6 = vpop.f32.mrb[133].mxu1 }
 0x3da   : > { %v5253_v56 = vadd.f32 %v5252_v6, %v5251_v52  ;;  %v5254_v55 = vpop.f32.mrb[134].mxu1 }
 0x3db   : > { %v5157_v60 = vpop.f32.mrb[0].mxu0  ;;  %v5255_v39 = vpop.f32.mrb[135].mxu1 }
 0x3dc   : > { %v5158_v9 = vpop.f32.mrb[1].mxu0  ;;  %v5256_v35 = vadd.f32 %v5255_v39, %v5254_v55  ;;  %v7770_v0 = vadd.f32 %v7712_v51, %v5253_v56  ;;  %v5257_v23 = vpop.f32.mrb[136].mxu1 }
 0x3dd   : > { %v5159_v12 = vadd.f32 %v5158_v9, %v5157_v60  ;;  %v5160_v49 = vpop.f32.mrb[2].mxu0 }
 0x3de   : > { %v5161_v15 = vpop.f32.mrb[3].mxu0  ;;  %v7773_v3 = vadd.f32 %v7715_v37, %v5256_v35 }
 0x3df   : > { %v7764_v22 = vadd.f32 %v5159_v12, %v7649_v33  ;;  %v5162_v29 = vadd.f32 %v5161_v15, %v5160_v49 }
 0x3e1   : > { %v7767_v7 = vadd.f32 %v5162_v29, %v7651_v16  ;;  %v5258_v16 = vpop.f32.mrb[137].mxu1 }
 0x3e2   : > { %v5259_v34 = vadd.f32 %v5258_v16, %v5257_v23  ;;  %v5260_v46 = vpop.f32.mrb[138].mxu1 }
 0x3e3   : > { %v5163_v54 = vpop.f32.mrb[4].mxu0  ;;  %v5261_v51 = vpop.f32.mrb[139].mxu1 }
 0x3e4   : > { %v5164_v48 = vpop.f32.mrb[5].mxu0  ;;  %v5262_v8 = vadd.f32 %v5261_v51, %v5260_v46  ;;  %v7782_v31 = vadd.f32 %v7720_v1, %v5259_v34  ;;  %v5263_v60 = vpop.f32.mrb[140].mxu1 }
 0x3e5   : > { %v5165_v13 = vadd.f32 %v5164_v48, %v5163_v54  ;;  %v5166_v33 = vpop.f32.mrb[6].mxu0 }
 0x3e6   : > { %v5167_v42 = vpop.f32.mrb[7].mxu0  ;;  %v7785_v38 = vadd.f32 %v7723_v45, %v5262_v8 }
 0x3e7   : > { %v7776_v57 = vadd.f32 %v5165_v13, %v7657_v53  ;;  %v5168_v61 = vadd.f32 %v5167_v42, %v5166_v33 }
 0x3e9   : > { %v7779_v59 = vadd.f32 %v5168_v61, %v7659_v14  ;;  %v5264_v14 = vpop.f32.mrb[141].mxu1 }
 0x3ea   : > { %v5265_v49 = vadd.f32 %v5264_v14, %v5263_v60  ;;  %v5266_v15 = vpop.f32.mrb[142].mxu1 }
 0x3eb   : > { %v5169_v37 = vpop.f32.mrb[8].mxu0  ;;  %v5267_v1 = vpop.f32.mrb[143].mxu1 }
 0x3ec   : > { %v5170_v28 = vpop.f32.mrb[9].mxu0  ;;  %v5268_v29 = vadd.f32 %v5267_v1, %v5266_v15  ;;  %v7794_v6 = vadd.f32 %v7728_v43, %v5265_v49  ;;  %v5269_v54 = vpop.f32.mrb[144].mxu1 }
 0x3ed   : > { %v5171_v36 = vadd.f32 %v5170_v28, %v5169_v37  ;;  %v5172_v53 = vpop.f32.mrb[10].mxu0 }
 0x3ee   : > { %v5173_v4 = vpop.f32.mrb[11].mxu0  ;;  %v7797_v55 = vadd.f32 %v7731_v18, %v5268_v29 }
 0x3ef   : > { %v7788_v9 = vadd.f32 %v5171_v36, %v7665_v11  ;;  %v5174_v12 = vadd.f32 %v5173_v4, %v5172_v53 }
 0x3f1   : > { %v7791_v52 = vadd.f32 %v5174_v12, %v7667_v50  ;;  %v5270_v50 = vpop.f32.mrb[145].mxu1 }
 0x3f2   : > { %v5271_v33 = vadd.f32 %v5270_v50, %v5269_v54  ;;  %v5272_v42 = vpop.f32.mrb[146].mxu1 }
 0x3f3   : > { %v5175_v45 = vpop.f32.mrb[12].mxu0  ;;  %v5273_v43 = vpop.f32.mrb[147].mxu1 }
 0x3f4   : > { %v5176_v56 = vpop.f32.mrb[13].mxu0  ;;  %v5274_v61 = vadd.f32 %v5273_v43, %v5272_v42  ;;  %v7806_v16 = vadd.f32 %v7734_v19, %v5271_v33  ;;  %v5275_v37 = vpop.f32.mrb[148].mxu1 }
 0x3f5   : > { %v5177_v39 = vadd.f32 %v5176_v56, %v5175_v45  ;;  %v5178_v11 = vpop.f32.mrb[14].mxu0 }
 0x3f6   : > { %v5179_v35 = vpop.f32.mrb[15].mxu0  ;;  %v7809_v46 = vadd.f32 %v7737_v10, %v5274_v61 }
 0x3f7   : > { %v7800_v48 = vadd.f32 %v5177_v39, %v7673_v58  ;;  %v5180_v13 = vadd.f32 %v5179_v35, %v5178_v11 }
 0x3f9   : > { %v7803_v23 = vadd.f32 %v5180_v13, %v7675_v47  ;;  %v5276_v47 = vpop.f32.mrb[149].mxu1 }
 0x3fa   : > { %v5277_v53 = vadd.f32 %v5276_v47, %v5275_v37  ;;  %v5278_v4 = vpop.f32.mrb[150].mxu1 }
 0x3fb   : > { %v5181_v18 = vpop.f32.mrb[16].mxu0  ;;  %v5279_v19 = vpop.f32.mrb[151].mxu1 }
 0x3fc   : > { %v5182_v34 = vpop.f32.mrb[17].mxu0  ;;  %v5280_v12 = vadd.f32 %v5279_v19, %v5278_v4  ;;  %v7818_v14 = vadd.f32 %v7740_v27, %v5277_v53  ;;  %v5281_v45 = vpop.f32.mrb[152].mxu1 }
 0x3fd   : > { %v5183_v51 = vadd.f32 %v5182_v34, %v5181_v18  ;;  %v5184_v58 = vpop.f32.mrb[18].mxu0 }
 0x3fe   : > { %v5185_v8 = vpop.f32.mrb[19].mxu0  ;;  %v7821_v15 = vadd.f32 %v7743_v21, %v5280_v12 }
 0x3ff   : > { %v7812_v28 = vadd.f32 %v5183_v51, %v7679_v63  ;;  %v5186_v36 = vadd.f32 %v5185_v8, %v5184_v58 }
 0x401   : > { %v7815_v60 = vadd.f32 %v5186_v36, %v7681_v26  ;;  %v5282_v26 = vpop.f32.mrb[153].mxu1 }
 0x402   : > { %v5283_v11 = vadd.f32 %v5282_v26, %v5281_v45  ;;  %v5284_v35 = vpop.f32.mrb[154].mxu1 }
 0x403   : > { %v5187_v10 = vpop.f32.mrb[20].mxu0  ;;  %v5285_v27 = vpop.f32.mrb[155].mxu1 }
 0x404   : > { %v5188_v49 = vpop.f32.mrb[21].mxu0  ;;  %v5286_v13 = vadd.f32 %v5285_v27, %v5284_v35  ;;  %v7830_v50 = vadd.f32 %v7746_v62, %v5283_v11  ;;  %v5287_v18 = vpop.f32.mrb[156].mxu1 }
 0x405   : > { %v5189_v1 = vadd.f32 %v5188_v49, %v5187_v10  ;;  %v5190_v63 = vpop.f32.mrb[22].mxu0 }
 0x406   : > { %v5191_v29 = vpop.f32.mrb[23].mxu0  ;;  %v7833_v42 = vadd.f32 %v7749_v30, %v5286_v13 }
 0x407   : > { %v7824_v56 = vadd.f32 %v5189_v1, %v7685_v17  ;;  %v5192_v39 = vadd.f32 %v5191_v29, %v5190_v63 }
 0x409   : > { %v7827_v54 = vadd.f32 %v5192_v39, %v7687_v32  ;;  %v5288_v32 = vpop.f32.mrb[157].mxu1 }
 0x40a   : > { %v5289_v58 = vadd.f32 %v5288_v32, %v5287_v18  ;;  %v5290_v8 = vpop.f32.mrb[158].mxu1 }
 0x40b   : > { %v5193_v21 = vpop.f32.mrb[24].mxu0  ;;  %v5291_v62 = vpop.f32.mrb[159].mxu1 }
 0x40c   : > { %v5194_v33 = vpop.f32.mrb[25].mxu0  ;;  %v5292_v36 = vadd.f32 %v5291_v62, %v5290_v8  ;;  %v7842_v47 = vadd.f32 %v7752_v41, %v5289_v58  ;;  %v5293_v10 = vpop.f32.mrb[160].mxu1 }
 0x40d   : > { %v5195_v43 = vadd.f32 %v5194_v33, %v5193_v21  ;;  %v5196_v17 = vpop.f32.mrb[26].mxu0 }
 0x40e   : > { %v5197_v61 = vpop.f32.mrb[27].mxu0  ;;  %v7845_v4 = vadd.f32 %v7755_v25, %v5292_v36 }
 0x40f   : > { %v7836_v34 = vadd.f32 %v5195_v43, %v7691_v20  ;;  %v5198_v51 = vadd.f32 %v5197_v61, %v5196_v17 }
 0x411   : > { %v7839_v37 = vadd.f32 %v5198_v51, %v7693_v24  ;;  %v5294_v24 = vpop.f32.mrb[161].mxu1 }
 0x412   : > { %v5295_v63 = vadd.f32 %v5294_v24, %v5293_v10  ;;  %v5296_v29 = vpop.f32.mrb[162].mxu1 }
 0x413   : > { %v5199_v30 = vpop.f32.mrb[28].mxu0  ;;  %v5297_v41 = vpop.f32.mrb[163].mxu1 }
 0x414   : > { %v5200_v53 = vpop.f32.mrb[29].mxu0  ;;  %v5298_v39 = vadd.f32 %v5297_v41, %v5296_v29  ;;  %v7852_v26 = vadd.f32 %v7764_v22, %v5295_v63  ;;  %v5299_v11 = vpop.f32.mrb[164].mxu1 }
 0x415   : > { %v5201_v19 = vadd.f32 %v5200_v53, %v5199_v30  ;;  %v5202_v20 = vpop.f32.mrb[30].mxu0  ;;  %v5300_v35 = vpop.f32.mrb[165].mxu1 }
 0x416   : > { %v5203_v12 = vpop.f32.mrb[31].mxu0  ;;  %v7855_v25 = vadd.f32 %v7767_v7, %v5298_v39  ;;  %v5301_v27 = vadd.f32 %v5300_v35, %v5299_v11  ;;  %v5302_v13 = vpop.f32.mrb[166].mxu1 }
 0x417   : > { %v7848_v49 = vadd.f32 %v5201_v19, %v7697_v40  ;;  %v5204_v1 = vadd.f32 %v5203_v12, %v5202_v20  ;;  %v5303_v40 = vpop.f32.mrb[167].mxu1 }
 0x418   : > { %v5304_v21 = vadd.f32 %v5303_v40, %v5302_v13  ;;  %v7858_v33 = vadd.f32 %v7776_v57, %v5301_v27 }
 0x419   : > { %v5871_v45 = vadd.f32 %v5204_v1, %v7699_v44 }
 0x41a   : > { %v7861_v43 = vadd.f32 %v7779_v59, %v5304_v21 }
 0x41b   : > { %v5305_v44 = vpop.f32.mrb[168].mxu1 }
 0x41c   : > { %v5306_v17 = vpop.f32.mrb[169].mxu1 }
 0x41d   : > { %v5307_v61 = vadd.f32 %v5306_v17, %v5305_v44  ;;  %v5308_v22 = vpop.f32.mrb[170].mxu1 }
 0x41e   : > { %v5309_v18 = vpop.f32.mrb[171].mxu1 }
 0x41f   : > { %v5310_v51 = vadd.f32 %v5309_v18, %v5308_v22  ;;  %v7864_v7 = vadd.f32 %v7788_v9, %v5307_v61 }
 0x421   : > { %v7867_v32 = vadd.f32 %v7791_v52, %v5310_v51 }
 0x423   : > { %v5311_v58 = vpop.f32.mrb[172].mxu1 }
 0x424   : > { %v5312_v8 = vpop.f32.mrb[173].mxu1 }
 0x425   : > { %v5313_v62 = vadd.f32 %v5312_v8, %v5311_v58  ;;  %v5314_v57 = vpop.f32.mrb[174].mxu1 }
 0x426   : > { %v5315_v36 = vpop.f32.mrb[175].mxu1 }
 0x427   : > { %v5316_v30 = vadd.f32 %v5315_v36, %v5314_v57  ;;  %v7870_v59 = vadd.f32 %v7800_v48, %v5313_v62  ;;  %v7907_v36 = vld [vmem:[%s8097_s6] ss:$0 sm:$0xff] }
 0x429   : > { %v7873_v53 = vadd.f32 %v7803_v23, %v5316_v30 }
 0x42b   : > { %v5317_v19 = vpop.f32.mrb[176].mxu1 }
 0x42c   : > { %v5318_v20 = vpop.f32.mrb[177].mxu1 }
 0x42d   : > { %v5319_v12 = vadd.f32 %v5318_v20, %v5317_v19  ;;  %v5320_v9 = vpop.f32.mrb[178].mxu1 }
 0x42e   : > { %v5321_v10 = vpop.f32.mrb[179].mxu1 }
 0x42f   : > { %v5322_v1 = vadd.f32 %v5321_v10, %v5320_v9  ;;  %v7876_v52 = vadd.f32 %v7812_v28, %v5319_v12 }
 0x431   : > { %v7879_v24 = vadd.f32 %v7815_v60, %v5322_v1 }
 0x433   : > { %v5323_v63 = vpop.f32.mrb[180].mxu1 }
 0x434   : > { %v5324_v29 = vpop.f32.mrb[181].mxu1 }
 0x435   : > { %v5325_v41 = vadd.f32 %v5324_v29, %v5323_v63  ;;  %v5326_v48 = vpop.f32.mrb[182].mxu1  ;;  %v6192_v29 = vld [vmem:[#allocation2 + $0x48] sm:$0xff] }
 0x436   : > { %v5327_v39 = vpop.f32.mrb[183].mxu1 }
 0x437   : > { %v5328_v11 = vadd.f32 %v5327_v39, %v5326_v48  ;;  %v7882_v23 = vadd.f32 %v7824_v56, %v5325_v41  ;;  %v6193_v48 = vld [vmem:[#allocation2 + $0x28] sm:$0xff] }
 0x439   : > { %v7885_v35 = vadd.f32 %v7827_v54, %v5328_v11 }
 0x43b   : > { %v5329_v27 = vpop.f32.mrb[184].mxu1 }
 0x43c   : > { %v5330_v13 = vpop.f32.mrb[185].mxu1 }
 0x43d   : > { %v5331_v40 = vadd.f32 %v5330_v13, %v5329_v27  ;;  %v5332_v28 = vpop.f32.mrb[186].mxu1 }
 0x43e   : > { %v5333_v21 = vpop.f32.mrb[187].mxu1 }
 0x43f   : > { %v5334_v44 = vadd.f32 %v5333_v21, %v5332_v28  ;;  %v7888_v60 = vadd.f32 %v7836_v34, %v5331_v40  ;;  %v7901_v34 = vld [vmem:[%s8096_s5] ss:$0 sm:$0xff] }
 0x441   : > { %v7891_v17 = vadd.f32 %v7839_v37, %v5334_v44  ;;  %v6195_v44 = vld [vmem:[#allocation2 + $0x30] sm:$0xff] }
 0x443   : > { %v5335_v61 = vpop.f32.mrb[188].mxu1 }
 0x444   : > { %v5336_v22 = vpop.f32.mrb[189].mxu1 }
 0x445   : > { %v5337_v18 = vadd.f32 %v5336_v22, %v5335_v61  ;;  %v5338_v56 = vpop.f32.mrb[190].mxu1 }
 0x446   : > { %v5339_v51 = vpop.f32.mrb[191].mxu1 }
 0x447   : > { %v5340_v58 = vadd.f32 %v5339_v51, %v5338_v56  ;;  %v7894_v54 = vadd.f32 %v7848_v49, %v5337_v18 }
 0x449   : > { %v7896_v8 = vadd.f32 %v5871_v45, %v5340_v58 }
 0x44b   : > { %v5623_v62 = vpop.f32.mrb[96].mxu1 }
 0x44c   : > { %v5783_v37 = vadd.f32 %v7770_v0, %v5623_v62  ;;  %v3942_v57 = vpop.f32.mrb[97].mxu1 }
 0x44d   : > { %v5786_v30 = vadd.f32 %v7758_v2, %v3942_v57  ;;  %v5624_v49 = vpop.f32.mrb[98].mxu1 }
 0x44e   : > { %v4111_v45 = vmul.f32 %v5783_v37, %v7901_v34  ;;  %v5789_v19 = vadd.f32 %v7773_v3, %v5624_v49  ;;  %v3945_v20 = vpop.f32.mrb[99].mxu1 }
 0x44f   : > { %v4109_v12 = vmul.f32 %v5786_v30, %v7901_v34  ;;  %v5792_v9 = vadd.f32 %v7761_v5, %v3945_v20  ;;  %v6194_v5 = vld [vmem:[#allocation2 + $0x50] sm:$0xff] }
 0x450   : > { %v4149_v0 = vadd.f32 %v7907_v36, %v4111_v45  ;;  %v4112_v10 = vmul.f32 %v5789_v19, %v7901_v34  ;;  %v6196_v19 = vld [vmem:[#allocation2 + $0x88] sm:$0xff] }
 0x451   : > { %v4147_v1 = vadd.f32 %v7907_v36, %v4109_v12  ;;  %v4110_v63 = vmul.f32 %v5792_v9, %v7901_v34  ;;  %v6197_v12 = vld [vmem:[#allocation2 + $0x68] sm:$0xff] }
 0x452   : > { %v4181_v2 = vadd.f32 %v6192_v29, %v4149_v0  ;;  %v4150_v41 = vadd.f32 %v7907_v36, %v4112_v10 }
 0x453   : > { %v4179_v3 = vadd.f32 %v6193_v48, %v4147_v1  ;;  %v4148_v39 = vadd.f32 %v7907_v36, %v4110_v63  ;;  %v5627_v11 = vpop.f32.mrb[100].mxu1  ;;  %v6198_v1 = vld [vmem:[#allocation2 + $0x90] sm:$0xff] }
 0x454   : > { %v4213_v27 = vmax.f32 %v4181_v2, 0.0  ;;  %v4182_v13 = vadd.f32 %v6194_v5, %v4150_v41  ;;  %v5795_v40 = vadd.f32 %v7794_v6, %v5627_v11  ;;  %v3958_v28 = vpop.f32.mrb[101].mxu1  ;;  %v6199_v48 = vld [vmem:[#allocation2 + $0x70] sm:$0xff] }
 0x455   : > { %v4211_v21 = vmax.f32 %v4179_v3, 0.0  ;;  %v4180_v61 = vadd.f32 %v6195_v44, %v4148_v39  ;;  %v5798_v22 = vadd.f32 %v7782_v31, %v3958_v28  ;;  %v5628_v18 = vpop.f32.mrb[102].mxu1 }
 0x456   : > { %4245 = vst [vmem:[%s7924_s12 + $0x10] sm:$0xff] %v4213_v27  ;;  %v4214_v56 = vmax.f32 %v4182_v13, 0.0  ;;  %v4115_v51 = vmul.f32 %v5795_v40, %v7901_v34  ;;  %v5801_v6 = vadd.f32 %v7797_v55, %v5628_v18  ;;  %v3961_v58 = vpop.f32.mrb[103].mxu1  ;;  %v6200_v18 = vld [vmem:[#allocation2 + $0xc8] sm:$0xff] }
 0x457   : > { %4243 = vst [vmem:[%s7924_s12] sm:$0xff] %v4211_v21  ;;  %v4212_v62 = vmax.f32 %v4180_v61, 0.0  ;;  %v4113_v37 = vmul.f32 %v5798_v22, %v7901_v34  ;;  %v5804_v31 = vadd.f32 %v7785_v38, %v3961_v58 }
 0x458   : > { %4246 = vst [vmem:[%s7924_s12 + $0x18] sm:$0xff] %v4214_v56  ;;  %v4153_v57 = vadd.f32 %v7907_v36, %v4115_v51  ;;  %v4116_v30 = vmul.f32 %v5801_v6, %v7901_v34  ;;  %v6201_v51 = vld [vmem:[#allocation2 + $0xa8] sm:$0xff] }
 0x459   : > { %4244 = vst [vmem:[%s7924_s12 + $0x8] sm:$0xff] %v4212_v62  ;;  %v4151_v49 = vadd.f32 %v7907_v36, %v4113_v37  ;;  %v4114_v45 = vmul.f32 %v5804_v31, %v7901_v34  ;;  %v6202_v37 = vld [vmem:[#allocation2 + $0xd0] sm:$0xff] }
 0x45a   : > { %v4185_v20 = vadd.f32 %v6196_v19, %v4153_v57  ;;  %v4154_v55 = vadd.f32 %v7907_v36, %v4116_v30 }
 0x45b   : > { %v4183_v9 = vadd.f32 %v6197_v12, %v4151_v49  ;;  %v4152_v0 = vadd.f32 %v7907_v36, %v4114_v45  ;;  %v5631_v38 = vpop.f32.mrb[104].mxu1  ;;  %v6203_v45 = vld [vmem:[#allocation2 + $0xb0] sm:$0xff] }
 0x45c   : > { %v4217_v10 = vmax.f32 %v4185_v20, 0.0  ;;  %v4186_v63 = vadd.f32 %v6198_v1, %v4154_v55  ;;  %v5807_v29 = vadd.f32 %v7818_v14, %v5631_v38  ;;  %v3974_v2 = vpop.f32.mrb[105].mxu1 }
 0x45d   : > { %v4215_v41 = vmax.f32 %v4183_v9, 0.0  ;;  %v4184_v3 = vadd.f32 %v6199_v48, %v4152_v0  ;;  %v5810_v39 = vadd.f32 %v7806_v16, %v3974_v2  ;;  %v5632_v11 = vpop.f32.mrb[106].mxu1 }
 0x45e   : > { %4249 = vst [vmem:[%s7924_s12 + $0x30] sm:$0xff] %v4217_v10  ;;  %v4218_v27 = vmax.f32 %v4186_v63, 0.0  ;;  %v4119_v5 = vmul.f32 %v5807_v29, %v7901_v34  ;;  %v5813_v13 = vadd.f32 %v7821_v15, %v5632_v11  ;;  %v3977_v40 = vpop.f32.mrb[107].mxu1 }
 0x45f   : > { %4247 = vst [vmem:[%s7924_s12 + $0x20] sm:$0xff] %v4215_v41  ;;  %v4216_v28 = vmax.f32 %v4184_v3, 0.0  ;;  %v4117_v14 = vmul.f32 %v5810_v39, %v7901_v34  ;;  %v5816_v21 = vadd.f32 %v7809_v46, %v3977_v40  ;;  %v6204_v41 = vld [vmem:[#allocation2 + $0x108] sm:$0xff] }
 0x460   : > { %4250 = vst [vmem:[%s7924_s12 + $0x38] sm:$0xff] %v4218_v27  ;;  %v4157_v44 = vadd.f32 %v7907_v36, %v4119_v5  ;;  %v4120_v61 = vmul.f32 %v5813_v13, %v7901_v34  ;;  %v6205_v3 = vld [vmem:[#allocation2 + $0xe8] sm:$0xff]  ;;  %v6206_v5 = vld [vmem:[#allocation2 + $0x110] sm:$0xff] }
 0x461   : > { %4248 = vst [vmem:[%s7924_s12 + $0x28] sm:$0xff] %v4216_v28  ;;  %v4155_v16 = vadd.f32 %v7907_v36, %v4117_v14  ;;  %v4118_v22 = vmul.f32 %v5816_v21, %v7901_v34  ;;  %v6207_v21 = vld [vmem:[#allocation2 + $0xf0] sm:$0xff] }
 0x462   : > { %v4189_v56 = vadd.f32 %v6200_v18, %v4157_v44  ;;  %v4158_v15 = vadd.f32 %v7907_v36, %v4120_v61 }
 0x463   : > { %v4187_v6 = vadd.f32 %v6201_v51, %v4155_v16  ;;  %v4156_v58 = vadd.f32 %v7907_v36, %v4118_v22  ;;  %v5635_v46 = vpop.f32.mrb[108].mxu1 }
 0x464   : > { %v4221_v62 = vmax.f32 %v4189_v56, 0.0  ;;  %v4190_v31 = vadd.f32 %v6202_v37, %v4158_v15  ;;  %v5819_v57 = vadd.f32 %v7842_v47, %v5635_v46  ;;  %v3990_v30 = vpop.f32.mrb[109].mxu1  ;;  %v6208_v37 = vld [vmem:[#allocation2 + $0x148] sm:$0xff] }
 0x465   : > { %v4219_v49 = vmax.f32 %v4187_v6, 0.0  ;;  %v4188_v19 = vadd.f32 %v6203_v45, %v4156_v58  ;;  %v5822_v20 = vadd.f32 %v7830_v50, %v3990_v30  ;;  %v5636_v55 = vpop.f32.mrb[110].mxu1 }
 0x466   : > { %4253 = vst [vmem:[%s7924_s12 + $0x50] sm:$0xff] %v4221_v62  ;;  %v4222_v12 = vmax.f32 %v4190_v31, 0.0  ;;  %v4123_v9 = vmul.f32 %v5819_v57, %v7901_v34  ;;  %v5825_v0 = vadd.f32 %v7845_v4, %v5636_v55  ;;  %v3993_v38 = vpop.f32.mrb[111].mxu1  ;;  %v6209_v57 = vld [vmem:[#allocation2 + $0x128] sm:$0xff] }
 0x467   : > { %4251 = vst [vmem:[%s7924_s12 + $0x40] sm:$0xff] %v4219_v49  ;;  %v4220_v10 = vmax.f32 %v4188_v19, 0.0  ;;  %v4121_v47 = vmul.f32 %v5822_v20, %v7901_v34  ;;  %v5828_v1 = vadd.f32 %v7833_v42, %v3993_v38  ;;  %v6210_v19 = vld [vmem:[#allocation2 + $0x150] sm:$0xff] }
 0x468   : > { %4254 = vst [vmem:[%s7924_s12 + $0x58] sm:$0xff] %v4222_v12  ;;  %v4161_v63 = vadd.f32 %v7907_v36, %v4123_v9  ;;  %v4124_v29 = vmul.f32 %v5825_v0, %v7901_v34  ;;  %v6211_v0 = vld [vmem:[#allocation2 + $0x130] sm:$0xff] }
 0x469   : > { %4252 = vst [vmem:[%s7924_s12 + $0x48] sm:$0xff] %v4220_v10  ;;  %v4159_v50 = vadd.f32 %v7907_v36, %v4121_v47  ;;  %v4122_v2 = vmul.f32 %v5828_v1, %v7901_v34 }
 0x46a   : > { %v4193_v48 = vadd.f32 %v6204_v41, %v4161_v63  ;;  %v4162_v4 = vadd.f32 %v7907_v36, %v4124_v29 }
 0x46b   : > { %v4191_v39 = vadd.f32 %v6205_v3, %v4159_v50  ;;  %v4160_v11 = vadd.f32 %v7907_v36, %v4122_v2  ;;  %v5639_v42 = vpop.f32.mrb[112].mxu1 }
 0x46c   : > { %v4225_v27 = vmax.f32 %v4193_v48, 0.0  ;;  %v4194_v13 = vadd.f32 %v6206_v5, %v4162_v4  ;;  %v5831_v40 = vadd.f32 %v7858_v33, %v5639_v42  ;;  %v4006_v28 = vpop.f32.mrb[113].mxu1  ;;  %v6213_v42 = vld [vmem:[#allocation2 + $0x168] sm:$0xff] }
 0x46d   : > { %v4223_v14 = vmax.f32 %v4191_v39, 0.0  ;;  %v4192_v44 = vadd.f32 %v6207_v21, %v4160_v11  ;;  %v5834_v61 = vadd.f32 %v7852_v26, %v4006_v28  ;;  %v5640_v16 = vpop.f32.mrb[114].mxu1  ;;  %v6212_v39 = vld [vmem:[#allocation2 + $0x188] sm:$0xff] }
 0x46e   : > { %4257 = vst [vmem:[%s7924_s12 + $0x70] sm:$0xff] %v4225_v27  ;;  %v4226_v22 = vmax.f32 %v4194_v13, 0.0  ;;  %v4127_v18 = vmul.f32 %v5831_v40, %v7901_v34  ;;  %v5837_v56 = vadd.f32 %v7861_v43, %v5640_v16  ;;  %v4009_v15 = vpop.f32.mrb[115].mxu1  ;;  %v6214_v40 = vld [vmem:[#allocation2 + $0x190] sm:$0xff] }
 0x46f   : > { %4255 = vst [vmem:[%s7924_s12 + $0x60] sm:$0xff] %v4223_v14  ;;  %v4224_v51 = vmax.f32 %v4192_v44, 0.0  ;;  %v4125_v33 = vmul.f32 %v5834_v61, %v7901_v34  ;;  %v5840_v6 = vadd.f32 %v7855_v25, %v4009_v15  ;;  %v6215_v61 = vld [vmem:[#allocation2 + $0x170] sm:$0xff] }
 0x470   : > { %4258 = vst [vmem:[%s7924_s12 + $0x78] sm:$0xff] %v4226_v22  ;;  %v4165_v58 = vadd.f32 %v7907_v36, %v4127_v18  ;;  %v4128_v46 = vmul.f32 %v5837_v56, %v7901_v34 }
 0x471   : > { %4256 = vst [vmem:[%s7924_s12 + $0x68] sm:$0xff] %v4224_v51  ;;  %v4163_v26 = vadd.f32 %v7907_v36, %v4125_v33  ;;  %v4126_v62 = vmul.f32 %v5840_v6, %v7901_v34 }
 0x472   : > { %v4197_v31 = vadd.f32 %v6208_v37, %v4165_v58  ;;  %v4166_v43 = vadd.f32 %v7907_v36, %v4128_v46  ;;  %v6216_v37 = vld [vmem:[#allocation2 + $0x1c8] sm:$0xff] }
 0x473   : > { %v4195_v30 = vadd.f32 %v6209_v57, %v4163_v26  ;;  %v4164_v49 = vadd.f32 %v7907_v36, %v4126_v62  ;;  %v5643_v25 = vpop.f32.mrb[116].mxu1 }
 0x474   : > { %v4229_v45 = vmax.f32 %v4197_v31, 0.0  ;;  %v4198_v20 = vadd.f32 %v6210_v19, %v4166_v43  ;;  %v5843_v55 = vadd.f32 %v7870_v59, %v5643_v25  ;;  %v4022_v12 = vpop.f32.mrb[117].mxu1  ;;  %v6217_v43 = vld [vmem:[#allocation2 + $0x1a8] sm:$0xff]  ;;  %v6218_v25 = vld [vmem:[#allocation2 + $0x1d0] sm:$0xff] }
 0x475   : > { %v4227_v9 = vmax.f32 %v4195_v30, 0.0  ;;  %v4196_v38 = vadd.f32 %v6211_v0, %v4164_v49  ;;  %v5846_v10 = vadd.f32 %v7864_v7, %v4022_v12  ;;  %v5644_v47 = vpop.f32.mrb[118].mxu1  ;;  %v6219_v12 = vld [vmem:[#allocation2 + $0x1b0] sm:$0xff] }
 0x476   : > { %4261 = vst [vmem:[%s7924_s12 + $0x90] sm:$0xff] %v4229_v45  ;;  %v4230_v1 = vmax.f32 %v4198_v20, 0.0  ;;  %v4131_v63 = vmul.f32 %v5843_v55, %v7901_v34  ;;  %v5849_v29 = vadd.f32 %v7873_v53, %v5644_v47  ;;  %v4025_v50 = vpop.f32.mrb[119].mxu1 }
 0x477   : > { %4259 = vst [vmem:[%s7924_s12 + $0x80] sm:$0xff] %v4227_v9  ;;  %v4228_v2 = vmax.f32 %v4196_v38, 0.0  ;;  %v4129_v59 = vmul.f32 %v5846_v10, %v7901_v34  ;;  %v5852_v41 = vadd.f32 %v7867_v32, %v4025_v50 }
 0x478   : > { %4262 = vst [vmem:[%s7924_s12 + $0x98] sm:$0xff] %v4230_v1  ;;  %v4169_v48 = vadd.f32 %v7907_v36, %v4131_v63  ;;  %v4132_v4 = vmul.f32 %v5849_v29, %v7901_v34 }
 0x479   : > { %4260 = vst [vmem:[%s7924_s12 + $0x88] sm:$0xff] %v4228_v2  ;;  %v4167_v7 = vadd.f32 %v7907_v36, %v4129_v59  ;;  %v4130_v3 = vmul.f32 %v5852_v41, %v7901_v34  ;;  %v6220_v41 = vld [vmem:[#allocation2 + $0x208] sm:$0xff] }
 0x47a   : > { %v4201_v11 = vadd.f32 %v6212_v39, %v4169_v48  ;;  %v4170_v53 = vadd.f32 %v7907_v36, %v4132_v4 }
 0x47b   : > { %v4199_v27 = vadd.f32 %v6213_v42, %v4167_v7  ;;  %v4168_v5 = vadd.f32 %v7907_v36, %v4130_v3  ;;  %v5647_v32 = vpop.f32.mrb[120].mxu1  ;;  %v6221_v7 = vld [vmem:[#allocation2 + $0x1e8] sm:$0xff] }
 0x47c   : > { %v4233_v13 = vmax.f32 %v4201_v11, 0.0  ;;  %v4202_v28 = vadd.f32 %v6214_v40, %v4170_v53  ;;  %v5855_v14 = vadd.f32 %v7882_v23, %v5647_v32  ;;  %v4038_v21 = vpop.f32.mrb[121].mxu1  ;;  %v6222_v11 = vld [vmem:[#allocation2 + $0x210] sm:$0xff] }
 0x47d   : > { %v4231_v44 = vmax.f32 %v4199_v27, 0.0  ;;  %v4200_v16 = vadd.f32 %v6215_v61, %v4168_v5  ;;  %v5858_v22 = vadd.f32 %v7876_v52, %v4038_v21  ;;  %v5648_v18 = vpop.f32.mrb[122].mxu1 }
 0x47e   : > { %4265 = vst [vmem:[%s7924_s12 + $0xb0] sm:$0xff] %v4233_v13  ;;  %v4234_v56 = vmax.f32 %v4202_v28, 0.0  ;;  %v4135_v15 = vmul.f32 %v5855_v14, %v7901_v34  ;;  %v5861_v51 = vadd.f32 %v7885_v35, %v5648_v18  ;;  %v4041_v33 = vpop.f32.mrb[123].mxu1 }
 0x47f   : > { %4263 = vst [vmem:[%s7924_s12 + $0xa0] sm:$0xff] %v4231_v44  ;;  %v4232_v6 = vmax.f32 %v4200_v16, 0.0  ;;  %v4133_v23 = vmul.f32 %v5858_v22, %v7901_v34  ;;  %v5864_v58 = vadd.f32 %v7879_v24, %v4041_v33 }
 0x480   : > { %4266 = vst [vmem:[%s7924_s12 + $0xb8] sm:$0xff] %v4234_v56  ;;  %v4173_v46 = vadd.f32 %v7907_v36, %v4135_v15  ;;  %v4136_v26 = vmul.f32 %v5861_v51, %v7901_v34 }
 0x481   : > { %4264 = vst [vmem:[%s7924_s12 + $0xa8] sm:$0xff] %v4232_v6  ;;  %v4171_v52 = vadd.f32 %v7907_v36, %v4133_v23  ;;  %v4134_v62 = vmul.f32 %v5864_v58, %v7901_v34 }
 0x482   : > { %v4205_v31 = vadd.f32 %v6216_v37, %v4173_v46  ;;  %v4174_v35 = vadd.f32 %v7907_v36, %v4136_v26 }
 0x483   : > { %v4203_v57 = vadd.f32 %v6217_v43, %v4171_v52  ;;  %v4172_v30 = vadd.f32 %v7907_v36, %v4134_v62  ;;  %v5651_v24 = vpop.f32.mrb[124].mxu1 }
 0x484   : > { %v4237_v49 = vmax.f32 %v4205_v31, 0.0  ;;  %v4206_v45 = vadd.f32 %v6218_v25, %v4174_v35  ;;  %v5867_v19 = vadd.f32 %v7894_v54, %v5651_v24  ;;  %v4054_v20 = vpop.f32.mrb[125].mxu1 }
 0x485   : > { %v4235_v55 = vmax.f32 %v4203_v57, 0.0  ;;  %v4204_v9 = vadd.f32 %v6219_v12, %v4172_v30  ;;  %v5870_v0 = vadd.f32 %v7888_v60, %v4054_v20  ;;  %v5652_v38 = vpop.f32.mrb[126].mxu1 }
 0x486   : > { %4269 = vst [vmem:[%s7924_s12 + $0xd0] sm:$0xff] %v4237_v49  ;;  %v4238_v10 = vmax.f32 %v4206_v45, 0.0  ;;  %v4139_v47 = vmul.f32 %v5867_v19, %v7901_v34  ;;  %v5873_v1 = vadd.f32 %v7896_v8, %v5652_v38  ;;  %v4057_v63 = vpop.f32.mrb[127].mxu1 }
 0x487   : > { %4267 = vst [vmem:[%s7924_s12 + $0xc0] sm:$0xff] %v4235_v55  ;;  %v4236_v29 = vmax.f32 %v4204_v9, 0.0  ;;  %v4137_v54 = vmul.f32 %v5870_v0, %v7901_v34  ;;  %v5876_v50 = vadd.f32 %v7891_v17, %v4057_v63 }
 0x488   : > { %4270 = vst [vmem:[%s7924_s12 + $0xd8] sm:$0xff] %v4238_v10  ;;  %v4177_v2 = vadd.f32 %v7907_v36, %v4139_v47  ;;  %v4140_v60 = vmul.f32 %v5873_v1, %v7901_v34 }
 0x489   : > { %4268 = vst [vmem:[%s7924_s12 + $0xc8] sm:$0xff] %v4236_v29  ;;  %v4175_v59 = vadd.f32 %v7907_v36, %v4137_v54  ;;  %v4138_v8 = vmul.f32 %v5876_v50, %v7901_v34  ;;  %v6223_v34 = vld [vmem:[#allocation2 + $0x1f0] sm:$0xff] }
 0x48a   : > { %v4209_v48 = vadd.f32 %v6220_v41, %v4177_v2  ;;  %v4178_v4 = vadd.f32 %v7907_v36, %v4140_v60 }
 0x48b   : > { %v4207_v3 = vadd.f32 %v6221_v7, %v4175_v59  ;;  %v4176_v17 = vadd.f32 %v7907_v36, %v4138_v8 }
 0x48c   : > { %v4241_v39 = vmax.f32 %v4209_v48, 0.0  ;;  %v4210_v53 = vadd.f32 %v6222_v11, %v4178_v4 }
 0x48d   : > { %v4239_v42 = vmax.f32 %v4207_v3, 0.0  ;;  %v4208_v27 = vadd.f32 %v6223_v34, %v4176_v17 }
 0x48e   : > { %4273 = vst [vmem:[%s7924_s12 + $0xf0] sm:$0xff] %v4241_v39  ;;  %v4242_v5 = vmax.f32 %v4210_v53, 0.0 }
 0x48f   : > { %4271 = vst [vmem:[%s7924_s12 + $0xe0] sm:$0xff] %v4239_v42  ;;  %v4240_v36 = vmax.f32 %v4208_v27, 0.0 }
 0x490   : > { %4274 = vst [vmem:[%s7924_s12 + $0xf8] sm:$0xff] %v4242_v5 }
 0x491   : > { %4272 = vst [vmem:[%s7924_s12 + $0xe8] sm:$0xff] %v4240_v36 }
 0x492   : > { %6323 = shalt.err (!%p6320_p2)
}
 0x493   : > { %s6324_s10 = scalar_lea.hbm %s8042_s30, 4096  ;;  %s6328_s12 = scalar_lea.hbm %s8098_s7, 8192 }
 0x494   : > { %p6325_p13 = scmp.ne.s32.totalorder %s8042_s30, %s6324_s10  ;;  %p6329_p4 = scmp.lt.u32.totalorder %s8042_s30, %s8098_s7 }
 0x495   : > { %p6330_p5 = scmp.lt.u32.totalorder %s6328_s12, %s6324_s10  ;;  %p6332_p11 = scmp.lt.u32.totalorder %s6324_s10, %s8042_s30 }
 0x496   : > { %p6326_p6 = pnand %p6325_p13, %p8136_p0 }
 0x497   : > { %p6331_p8 = por %p6330_p5, %p6329_p4 }
 0x498   : > { %p6327_p10 = pneg %p6326_p6 }
 0x499   : > { %p6333_p1 = por %p6332_p11, %p6331_p8 }
 0x49b   : > { %p6334_p3 = pnand %p6333_p1, %p6327_p10 }
 0x49d   : > { %6337 = shalt.err (!%p6334_p3)
}
 0x49e   : > { %s6392_s21 = smov 128   ;;  %s6393_s9 = smov 8  }
 0x49f   : > { %5983 = dma.vmem_to_hbm [thread:$0]  (%p8136_p0), %s8044_s29, 4096, %s8042_s30, %s4276_s28, %s6392_s21, %s6392_s21, %s6393_s9  }
 0x4a0 PF: > { %s4304_s20 = sand.u32 1, %s6368_s24   ;;  %p8137_p7 = scmp.ne.s32.totalorder %s8103_s8, 0 }
 0x4a1   : > { %p8138_p9 = scmp.ge.s32.totalorder %s6380_s27, 2  ;;  %s4305_s11 = scalar_lea.sflag [#allocation6], %s4304_s20 }
 0x4a3   : > { %p5997_p12 = pnand %p8138_p9, %p8137_p7 }
 0x4a5   : > { %6363 = dma.done.wait (!%p5997_p12), %s4305_s11, 4096  }
 0x4a6   : > { %6365 = vsyncadd (!%p5997_p12), %s4305_s11, 4294963200  ;;  %p21_p2 = scmp.ge.s32.totalorder %s6544_s13, 4   ;;  %s8139_s24 = smov %s6372_s25 }
 0x4a7   : > { %s8140_s25 = smov %s6376_s26  ;;  %s8141_s26 = smov %s6560_s17 }
 0x4a8   : > { %s8142_s27 = smov %s6544_s13  ;;  %23 = sbr.rel (!%p21_p2) target bundleno = 6 (0x6), region = 109 }
 0x4af   :  { %4310 = vsyncpa [#allocation5], 1 }
 0x4b0   :  { %4312 = vsyncpa [#allocation5 + $0x1], 1 }
 0x4b1   :  { %4313 = vsyncpa [#allocation8], 1 }
 0x4b2   :  { %4314 = vsyncpa [#allocation6], 1 }
 0x4b3   :  { %4316 = vsyncpa [#allocation6 + $0x1], 1 }

</bundles_post_ra>
